<compile_context>
chip_gen: v7x
topology: tpu7x:2x2x1
jax: 0.10.0
libtpu: 0.0.40
codegen_flags: <defaults>
</compile_context>

<pallas_src>
import math

import jax
import jax.numpy as jnp
from jax.experimental import pallas as pl
from jax.experimental.pallas import tpu as pltpu

# ---- ConvFlow hyper-parameters (in_channels=4, filter=32, k=3, n_layers=3) ----
IN_CHANNELS = 4
HALF_CHANNELS = IN_CHANNELS // 2
FILTER_CHANNELS = 32
KERNEL_SIZE = 3
N_LAYERS = 3
NUM_BINS = 10
TAIL_BOUND = 5.0
MIN_BIN_WIDTH = 1e-3
MIN_BIN_HEIGHT = 1e-3
MIN_DERIVATIVE = 1e-3
SPLINE_PARAMS = 3 * NUM_BINS - 1          # 29
PROJ_OUT = HALF_CHANNELS * SPLINE_PARAMS  # 58


# --------------------------- helpers (in-kernel) ---------------------------
def _layer_norm_c(y, gamma, beta, eps=1e-5):
    # LayerNorm over the channel (sublane) axis; gamma/beta are (C, 1).
    mean = jnp.mean(y, axis=0, keepdims=True)
    var = jnp.mean(jnp.square(y - mean), axis=0, keepdims=True)
    return (y - mean) * jax.lax.rsqrt(var + eps) * gamma + beta


def _gelu(x):
    # TODO(synk): PyTorch F.gelu defaults to the exact erf GELU; erf has no
    # reliable Mosaic lowering, so the tanh approximation is used (|err| ~ 1e-3).
    c = math.sqrt(2.0 / math.pi)
    return 0.5 * x * (1.0 + jnp.tanh(c * (x + 0.044715 * x * x * x)))


def _shift_time(xm, off, lane, t_pad):
    """shifted[:, t] = xm[:, t + off] with implicit zero padding at both edges.

    Lane rotation on the XLU (pltpu.roll follows jnp.roll semantics:
    out[t] = in[(t - shift) % n]) plus an iota edge mask to zero wrapped lanes.
    """
    if off == 0:
        return xm
    rolled = pltpu.roll(xm, (-off) % t_pad, axis=1)
    if off > 0:
        keep = lane < (t_pad - off)
    else:
        keep = lane >= (-off)
    return jnp.where(keep, rolled, 0.0)


def _rq_spline_fwd(x1c, p_raw, tri):
    """Forward unconstrained rational-quadratic spline (tails='linear').

    x1c:   (1, L)  inputs (both half-channels concatenated along lanes)
    p_raw: (29, L) spline parameters (widths / heights / derivatives on sublanes)
    tri:   (nb, nb) lower-triangular ones (prefix-sum as a tiny MXU matmul)
    Returns (transformed (1, L), logabsdet (1, L)).
    """
    # TODO(synk): only the forward direction (reverse=False) is implemented.
    nb = NUM_BINS
    tb = TAIL_BOUND
    t = x1c.shape[-1]
    inv_sqrt_fc = 1.0 / math.sqrt(FILTER_CHANNELS)

    p_wh = p_raw[:2 * nb, :] * inv_sqrt_fc     # single scaled slab (20, L)
    uw = p_wh[:nb, :]                          # (nb, L)
    uh = p_wh[nb:, :]                          # (nb, L)
    ud = p_raw[2 * nb:, :]                     # (nb-1, L), unscaled

    inside = jnp.logical_and(x1c >= -tb, x1c <= tb)
    # Clamp into the interval so the discarded jnp.where branch stays NaN-free.
    xin = jnp.clip(x1c, -tb, tb)

    row_b = jax.lax.broadcasted_iota(jnp.int32, (nb, t), 0)   # bins on sublanes

    def softmax_bins(a):
        m = jnp.max(a, axis=0, keepdims=True)
        e = jnp.exp(a - m)
        return e / jnp.sum(e, axis=0, keepdims=True)

    def knots(unnorm, min_size):
        p = min_size + (1.0 - min_size * nb) * softmax_bins(unnorm)   # (nb, L)
        cum = jnp.dot(tri, p, preferred_element_type=jnp.float32)     # inclusive prefix (MXU)
        # left knot of each bin: exclusive prefix (row 0 is exactly -tail_bound)
        left = 2.0 * tb * (cum - p) - tb
        # right knot of each bin, last one pinned to +tail_bound (as the reference)
        right = jnp.where(row_b == nb - 1, tb, 2.0 * tb * cum - tb)
        return left, right - left                                     # left knots, bin sizes

    left_w, width = knots(uw, MIN_BIN_WIDTH)
    left_h, height = knots(uh, MIN_BIN_HEIGHT)

    # searchsorted over the left knots (equivalent to the reference 11-knot search
    # for in-interval inputs; the +eps last knot never matches a clamped input).
    ge = (xin >= left_w).astype(jnp.int32)
    bin_idx = jnp.clip(jnp.sum(ge, axis=0, keepdims=True) - 1, 0, nb - 1)  # (1, L)
    onehot = row_b == bin_idx

    def sel(a):
        return jnp.sum(jnp.where(onehot, a, 0.0), axis=0, keepdims=True)

    in_cumw = sel(left_w)
    in_w = sel(width)
    in_cumh = sel(left_h)
    in_h = sel(height)
    in_delta = in_h / in_w

    # derivatives: interior knots from the network, boundary knots from the
    # tails='linear' constant pad (softplus(const) + min_derivative == 1.0).
    d_inner = MIN_DERIVATIVE + jnp.where(
        ud > 20.0, ud, jnp.log(1.0 + jnp.exp(jnp.minimum(ud, 20.0))))      # (nb-1, L)
    const = math.log(math.exp(1.0 - MIN_DERIVATIVE) - 1.0)
    d_bound = MIN_DERIVATIVE + math.log(1.0 + math.exp(const))
    row_d = jax.lax.broadcasted_iota(jnp.int32, (nb - 1, t), 0)
    in_d = jnp.where(
        bin_idx == 0, d_bound,
        jnp.sum(jnp.where(row_d == bin_idx - 1, d_inner, 0.0), axis=0, keepdims=True))
    in_d1 = jnp.where(
        bin_idx == nb - 1, d_bound,
        jnp.sum(jnp.where(row_d == bin_idx, d_inner, 0.0), axis=0, keepdims=True))

    theta = (xin - in_cumw) / in_w
    tmt = theta * (1.0 - theta)
    numer = in_h * (in_delta * theta * theta + in_d * tmt)
    denom = in_delta + (in_d + in_d1 - 2.0 * in_delta) * tmt
    out_s = in_cumh + numer / denom
    dnum = (in_delta * in_delta) * (in_d1 * theta * theta
                                    + 2.0 * in_delta * tmt
                                    + in_d * (1.0 - theta) * (1.0 - theta))
    inv_den = 1.0 / denom
    # == log(dnum) - 2*log(denom), folded into a single log (EUP-friendly).
    lad_s = jnp.log(dnum * inv_den * inv_den)

    x1_new = jnp.where(inside, out_s, x1c)    # linear tails: identity outside
    lad = jnp.where(inside, lad_s, 0.0)
    return x1_new, lad


# ------------------------------ fused kernel --------------------------------
def _conv_flow_kernel(x_ref, mask_ref, w_pre_ref, b_pre_ref,
                      conv_w_ref, conv_b_ref, lin_w_ref, lin_b_ref,
                      g1_ref, b1_ref, g2_ref, b2_ref,
                      w_proj_ref, b_proj_ref,
                      xout_ref, logdet_ref):
    x = x_ref[0]                              # (4, Tp)  channels x time
    mask = mask_ref[0]                        # (1, Tp)
    t_pad = x.shape[-1]

    x0 = x[:HALF_CHANNELS, :]                 # (2, Tp)
    x1 = x[HALF_CHANNELS:, :]                 # (2, Tp)

    # ---- pre Linear (K = half_channels = 2): broadcast FMAs on the VPU ----
    h = w_pre_ref[0] * x0[0:1, :]
    for j in range(1, HALF_CHANNELS):
        h = h + w_pre_ref[j] * x0[j:j + 1, :]
    h = h + b_pre_ref[...]                    # (32, Tp)

    lane = jax.lax.broadcasted_iota(jnp.int32, (FILTER_CHANNELS, t_pad), 1)

    # ---- DDSConv (dropout p=0.0 -> no-op) ----
    for i in range(N_LAYERS):
        dil = KERNEL_SIZE ** i
        xm = h * mask
        acc = xm * conv_w_ref[i, 1]           # centre tap (offset 0)
        for k in (0, 2):
            off = (k - 1) * dil               # -dil / +dil (static)
            acc = acc + _shift_time(xm, off, lane, t_pad) * conv_w_ref[i, k]
        y = acc + conv_b_ref[i]
        y = _gelu(_layer_norm_c(y, g1_ref[i], b1_ref[i]))
        y = jnp.dot(lin_w_ref[i], y, preferred_element_type=jnp.float32) + lin_b_ref[i]
        y = _gelu(_layer_norm_c(y, g2_ref[i], b2_ref[i]))
        h = h + y
    h = h * mask

    # ---- proj (32 -> 58) on the MXU; spline params stay in VMEM ----
    hp = jnp.dot(w_proj_ref[...], h, preferred_element_type=jnp.float32) + b_proj_ref[...]
    hp = hp * mask                            # (58, Tp)

    # lower-triangular ones -> prefix-sum over bins as one tiny MXU matmul
    r_i = jax.lax.broadcasted_iota(jnp.int32, (NUM_BINS, NUM_BINS), 0)
    c_i = jax.lax.broadcasted_iota(jnp.int32, (NUM_BINS, NUM_BINS), 1)
    tri = (c_i <= r_i).astype(jnp.float32)

    # ---- spline + masking + logdet, all in-kernel ----
    # Both transformed half-channels share one lane-concatenated spline pass
    # (channel c lives in lanes [c*Tp, (c+1)*Tp)): halves EUP/XLU/MXU issue
    # count for the spline at identical data volume.
    p_both = jnp.concatenate(
        [hp[c * SPLINE_PARAMS:(c + 1) * SPLINE_PARAMS, :]
         for c in range(HALF_CHANNELS)], axis=1)                       # (29, 2*Tp)
    x1_both = jnp.concatenate(
        [x1[c:c + 1, :] for c in range(HALF_CHANNELS)], axis=1)        # (1, 2*Tp)

    x1_new_both, lad_both = _rq_spline_fwd(x1_both, p_both, tri)

    x1_new = jnp.concatenate(
        [x1_new_both[:, c * t_pad:(c + 1) * t_pad]
         for c in range(HALF_CHANNELS)], axis=0)                       # (2, Tp)
    lad_sum = lad_both[:, 0:t_pad]
    for c in range(1, HALF_CHANNELS):
        lad_sum = lad_sum + lad_both[:, c * t_pad:(c + 1) * t_pad]     # (1, Tp)

    # two lane-dense 2-row stores (pass-through half + transformed half)
    xout_ref[0, :HALF_CHANNELS, :] = x0 * mask
    xout_ref[0, HALF_CHANNELS:, :] = x1_new * mask
    logdet_ref[0] = jnp.sum(lad_sum * mask, axis=1, keepdims=True)     # (1, 1)


# ------------------------------- wrapper ------------------------------------
def init_params(key):
    """Random ConvFlow parameters (channels-first layouts, documented below)."""
    ks = jax.random.split(key, 6)
    s = 0.1
    fc = FILTER_CHANNELS
    return dict(
        # pre Linear: w_pre[j] is the (filter, 1) weight column for input channel j.
        w_pre=jax.random.normal(ks[0], (HALF_CHANNELS, fc, 1), jnp.float32) * s,
        b_pre=jax.random.normal(ks[1], (fc, 1), jnp.float32) * s,
        # depthwise conv: conv_w[layer, tap, channel, 0]
        conv_w=jax.random.normal(ks[2], (N_LAYERS, KERNEL_SIZE, fc, 1), jnp.float32) * s,
        conv_b=jax.random.normal(ks[3], (N_LAYERS, fc, 1), jnp.float32) * s,
        # pointwise Linear: lin_w[layer] is (out, in), like torch.nn.Linear.weight
        lin_w=jax.random.normal(ks[4], (N_LAYERS, fc, fc), jnp.float32) * s,
        lin_b=jax.random.normal(ks[5], (N_LAYERS, fc, 1), jnp.float32) * s,
        g1=jnp.ones((N_LAYERS, fc, 1), jnp.float32),
        b1=jnp.zeros((N_LAYERS, fc, 1), jnp.float32),
        g2=jnp.ones((N_LAYERS, fc, 1), jnp.float32),
        b2=jnp.zeros((N_LAYERS, fc, 1), jnp.float32),
        # ConvFlow.__init__ explicitly zero-initializes proj weight & bias.
        w_proj=jnp.zeros((PROJ_OUT, fc), jnp.float32),
        b_proj=jnp.zeros((PROJ_OUT, 1), jnp.float32),
    )


@jax.jit
def conv_flow_forward(x_nct, x_mask_nct, params):
    """ConvFlow forward (reverse=False). x: (B, 4, T) NCT, x_mask: (B, 1, T)."""
    # TODO(synk): optional global conditioning input g is not supported (g=None path).
    B, c_in, T = x_nct.shape
    assert c_in == IN_CHANNELS
    t_pad = ((T + 127) // 128) * 128          # lane-dense time axis
    pad = t_pad - T
    x_p = jnp.pad(x_nct.astype(jnp.float32), ((0, 0), (0, 0), (0, pad)))
    m_p = jnp.pad(x_mask_nct.astype(jnp.float32), ((0, 0), (0, 0), (0, pad)))

    w_keys = ("w_pre", "b_pre", "conv_w", "conv_b", "lin_w", "lin_b",
              "g1", "b1", "g2", "b2", "w_proj", "b_proj")
    weights = [params[k] for k in w_keys]

    def full(a):
        return pl.BlockSpec(a.shape, lambda b, _nd=a.ndim: (0,) * _nd)

    def batched(shape):
        return pl.BlockSpec((1,) + shape, lambda b, _nd=len(shape): (b,) + (0,) * _nd)

    x_out_p, logdet = pl.pallas_call(
        _conv_flow_kernel,
        out_shape=(
            jax.ShapeDtypeStruct((B, IN_CHANNELS, t_pad), jnp.float32),
            jax.ShapeDtypeStruct((B, 1, 1), jnp.float32),
        ),
        grid=(B,),
        in_specs=[batched((IN_CHANNELS, t_pad)), batched((1, t_pad))]
                 + [full(w) for w in weights],
        out_specs=(batched((IN_CHANNELS, t_pad)), batched((1, 1))),
        compiler_params=pltpu.CompilerParams(dimension_semantics=("parallel",)),
    )(x_p, m_p, *weights)

    return x_out_p[:, :, :T], logdet.reshape(B)


if __name__ == "__main__":
    B, T = 2, 16
    key = jax.random.PRNGKey(0)
    k_params, k_x, k_pw, k_pb = jax.random.split(key, 4)
    params = init_params(k_params)

    x = jax.random.normal(k_x, (B, IN_CHANNELS, T), jnp.float32) * 2.0   # PyTorch NCT
    lengths = jnp.array([T, T - 4], jnp.int32)
    t_idx = jnp.arange(T)[None, None, :]
    x_mask = (t_idx < lengths[:, None, None]).astype(jnp.float32)        # (B, 1, T)

    # --- run 1: spec-faithful zero-initialized proj ---
    x_out, logdet = conv_flow_forward(x, x_mask, params)
    jax.block_until_ready((x_out, logdet))

    assert x_out.shape == (B, IN_CHANNELS, T)
    assert logdet.shape == (B,)
    assert bool(jnp.all(jnp.isfinite(x_out))) and bool(jnp.all(jnp.isfinite(logdet)))
    # x0 passes through untouched (up to masking); masked frames are zeroed.
    assert bool(jnp.allclose(x_out[:, :HALF_CHANNELS, :],
                             x[:, :HALF_CHANNELS, :] * x_mask, atol=1e-6))
    assert bool(jnp.all(x_out[1, :, T - 4:] == 0.0))

    # --- run 2: non-zero proj to actually exercise the spline + linear tails ---
    params2 = dict(params,
                   w_proj=jax.random.normal(k_pw, (PROJ_OUT, FILTER_CHANNELS),
                                            jnp.float32) * 0.1,
                   b_proj=jax.random.normal(k_pb, (PROJ_OUT, 1), jnp.float32) * 0.1)
    x2 = x.at[0, HALF_CHANNELS, 0].set(7.5)   # outside tail_bound -> identity tail
    x_out2, logdet2 = conv_flow_forward(x2, x_mask, params2)
    jax.block_until_ready((x_out2, logdet2))

    assert bool(jnp.all(jnp.isfinite(x_out2))) and bool(jnp.all(jnp.isfinite(logdet2)))
    assert bool(jnp.allclose(x_out2[:, :HALF_CHANNELS, :],
                             x2[:, :HALF_CHANNELS, :] * x_mask, atol=1e-6))
    assert bool(jnp.allclose(x_out2[0, HALF_CHANNELS, 0], 7.5, atol=1e-5))
    assert bool(jnp.all(x_out2[1, :, T - 4:] == 0.0))

    print("KERNEL_OK")
</pallas_src>

<mosaic_0001>
module attributes {stable_mosaic.version = 11 : i64} {
  func.func @_conv_flow_kernel(%arg0: i32, %arg1: memref<1x4x128xf32, #tpu.memory_space<vmem>>, %arg2: memref<1x1x128xf32, #tpu.memory_space<vmem>>, %arg3: memref<2x32x1xf32, #tpu.memory_space<vmem>>, %arg4: memref<32x1xf32, #tpu.memory_space<vmem>>, %arg5: memref<3x3x32x1xf32, #tpu.memory_space<vmem>>, %arg6: memref<3x32x1xf32, #tpu.memory_space<vmem>>, %arg7: memref<3x32x32xf32, #tpu.memory_space<vmem>>, %arg8: memref<3x32x1xf32, #tpu.memory_space<vmem>>, %arg9: memref<3x32x1xf32, #tpu.memory_space<vmem>>, %arg10: memref<3x32x1xf32, #tpu.memory_space<vmem>>, %arg11: memref<3x32x1xf32, #tpu.memory_space<vmem>>, %arg12: memref<3x32x1xf32, #tpu.memory_space<vmem>>, %arg13: memref<58x32xf32, #tpu.memory_space<vmem>>, %arg14: memref<58x1xf32, #tpu.memory_space<vmem>>, %arg15: memref<1x4x128xf32, #tpu.memory_space<vmem>>, %arg16: memref<1x1x1xf32, #tpu.memory_space<vmem>>) attributes {dimension_semantics = [#tpu.dimension_semantics<parallel>], iteration_bounds = array<i64: 2>, scalar_prefetch = 0 : i64, scratch_operands = 0 : i64, tpu.core_type = #tpu.core_type<tc>, window_params = [{transform_indices = @transform_0, window_bounds = array<i64: 1, 4, 128>}, {transform_indices = @transform_1, window_bounds = array<i64: 1, 1, 128>}, {pipeline_mode = #tpu.pipeline_mode<synchronous>, transform_indices = @transform_2, window_bounds = array<i64: 2, 32, 1>}, {pipeline_mode = #tpu.pipeline_mode<synchronous>, transform_indices = @transform_3, window_bounds = array<i64: 32, 1>}, {pipeline_mode = #tpu.pipeline_mode<synchronous>, transform_indices = @transform_4, window_bounds = array<i64: 3, 3, 32, 1>}, {pipeline_mode = #tpu.pipeline_mode<synchronous>, transform_indices = @transform_5, window_bounds = array<i64: 3, 32, 1>}, {pipeline_mode = #tpu.pipeline_mode<synchronous>, transform_indices = @transform_6, window_bounds = array<i64: 3, 32, 32>}, {pipeline_mode = #tpu.pipeline_mode<synchronous>, transform_indices = @transform_7, window_bounds = array<i64: 3, 32, 1>}, {pipeline_mode = #tpu.pipeline_mode<synchronous>, transform_indices = @transform_8, window_bounds = array<i64: 3, 32, 1>}, {pipeline_mode = #tpu.pipeline_mode<synchronous>, transform_indices = @transform_9, window_bounds = array<i64: 3, 32, 1>}, {pipeline_mode = #tpu.pipeline_mode<synchronous>, transform_indices = @transform_10, window_bounds = array<i64: 3, 32, 1>}, {pipeline_mode = #tpu.pipeline_mode<synchronous>, transform_indices = @transform_11, window_bounds = array<i64: 3, 32, 1>}, {pipeline_mode = #tpu.pipeline_mode<synchronous>, transform_indices = @transform_12, window_bounds = array<i64: 58, 32>}, {pipeline_mode = #tpu.pipeline_mode<synchronous>, transform_indices = @transform_13, window_bounds = array<i64: 58, 1>}, {transform_indices = @transform_14, window_bounds = array<i64: 1, 4, 128>}, {transform_indices = @transform_15, window_bounds = array<i64: 1, 1, 1>}]} {
    %c0 = arith.constant 0 : index
    %c0_0 = arith.constant 0 : index
    %c0_1 = arith.constant 0 : index
    %0 = vector.load %arg1[%c0, %c0_0, %c0_1] : memref<1x4x128xf32, #tpu.memory_space<vmem>>, vector<1x4x128xf32>
    %1 = vector.shape_cast %0 : vector<1x4x128xf32> to vector<4x128xf32>
    %c0_2 = arith.constant 0 : index
    %c0_3 = arith.constant 0 : index
    %c0_4 = arith.constant 0 : index
    %2 = vector.load %arg2[%c0_2, %c0_3, %c0_4] : memref<1x1x128xf32, #tpu.memory_space<vmem>>, vector<1x1x128xf32>
    %3 = vector.shape_cast %2 : vector<1x1x128xf32> to vector<1x128xf32>
    %4 = vector.extract_strided_slice %1 {offsets = [0, 0], sizes = [2, 128], strides = [1, 1]} : vector<4x128xf32> to vector<2x128xf32>
    %5 = vector.extract_strided_slice %1 {offsets = [2, 0], sizes = [2, 128], strides = [1, 1]} : vector<4x128xf32> to vector<2x128xf32>
    %c0_5 = arith.constant 0 : index
    %c0_6 = arith.constant 0 : index
    %c0_7 = arith.constant 0 : index
    %6 = vector.load %arg3[%c0_5, %c0_6, %c0_7] : memref<2x32x1xf32, #tpu.memory_space<vmem>>, vector<1x32x1xf32>
    %7 = vector.shape_cast %6 : vector<1x32x1xf32> to vector<32x1xf32>
    %8 = vector.extract_strided_slice %4 {offsets = [0, 0], sizes = [1, 128], strides = [1, 1]} : vector<2x128xf32> to vector<1x128xf32>
    %9 = vector.broadcast %7 : vector<32x1xf32> to vector<32x128xf32>
    %10 = vector.broadcast %8 : vector<1x128xf32> to vector<32x128xf32>
    %11 = arith.mulf %9, %10 : vector<32x128xf32>
    %c1 = arith.constant 1 : index
    %c0_8 = arith.constant 0 : index
    %c0_9 = arith.constant 0 : index
    %12 = vector.load %arg3[%c1, %c0_8, %c0_9] : memref<2x32x1xf32, #tpu.memory_space<vmem>>, vector<1x32x1xf32>
    %13 = vector.shape_cast %12 : vector<1x32x1xf32> to vector<32x1xf32>
    %14 = vector.extract_strided_slice %4 {offsets = [1, 0], sizes = [1, 128], strides = [1, 1]} : vector<2x128xf32> to vector<1x128xf32>
    %15 = vector.broadcast %13 : vector<32x1xf32> to vector<32x128xf32>
    %16 = vector.broadcast %14 : vector<1x128xf32> to vector<32x128xf32>
    %17 = arith.mulf %15, %16 : vector<32x128xf32>
    %18 = arith.addf %11, %17 : vector<32x128xf32>
    %c0_10 = arith.constant 0 : index
    %c0_11 = arith.constant 0 : index
    %19 = vector.load %arg4[%c0_10, %c0_11] : memref<32x1xf32, #tpu.memory_space<vmem>>, vector<32x1xf32>
    %20 = vector.broadcast %19 : vector<32x1xf32> to vector<32x128xf32>
    %21 = arith.addf %18, %20 : vector<32x128xf32>
    %22 = tpu.iota {dimensions = array<i32: 1>} : vector<32x128xi32>
    %23 = vector.broadcast %3 : vector<1x128xf32> to vector<32x128xf32>
    %24 = arith.mulf %21, %23 : vector<32x128xf32>
    %c0_12 = arith.constant 0 : index
    %c1_13 = arith.constant 1 : index
    %c0_14 = arith.constant 0 : index
    %c0_15 = arith.constant 0 : index
    %25 = vector.load %arg5[%c0_12, %c1_13, %c0_14, %c0_15] : memref<3x3x32x1xf32, #tpu.memory_space<vmem>>, vector<1x1x32x1xf32>
    %26 = vector.shape_cast %25 : vector<1x1x32x1xf32> to vector<32x1xf32>
    %27 = vector.broadcast %26 : vector<32x1xf32> to vector<32x128xf32>
    %28 = arith.mulf %24, %27 : vector<32x128xf32>
    %c1_i32 = arith.constant 1 : i32
    %29 = tpu.dynamic_rotate %24 by %c1_i32 dim 1 : vector<32x128xf32>, i32 -> vector<32x128xf32>
    %c1_i32_16 = arith.constant 1 : i32
    %30 = vector.broadcast %c1_i32_16 : i32 to vector<32x128xi32>
    %31 = arith.cmpi sge, %22, %30 : vector<32x128xi32>
    %cst = arith.constant 0.000000e+00 : f32
    %32 = vector.broadcast %cst : f32 to vector<32x128xf32>
    %33 = arith.select %31, %29, %32 : vector<32x128xi1>, vector<32x128xf32>
    %c0_17 = arith.constant 0 : index
    %c0_18 = arith.constant 0 : index
    %c0_19 = arith.constant 0 : index
    %c0_20 = arith.constant 0 : index
    %34 = vector.load %arg5[%c0_17, %c0_18, %c0_19, %c0_20] : memref<3x3x32x1xf32, #tpu.memory_space<vmem>>, vector<1x1x32x1xf32>
    %35 = vector.shape_cast %34 : vector<1x1x32x1xf32> to vector<32x1xf32>
    %36 = vector.broadcast %35 : vector<32x1xf32> to vector<32x128xf32>
    %37 = arith.mulf %33, %36 : vector<32x128xf32>
    %38 = arith.addf %28, %37 : vector<32x128xf32>
    %c127_i32 = arith.constant 127 : i32
    %39 = tpu.dynamic_rotate %24 by %c127_i32 dim 1 : vector<32x128xf32>, i32 -> vector<32x128xf32>
    %c127_i32_21 = arith.constant 127 : i32
    %40 = vector.broadcast %c127_i32_21 : i32 to vector<32x128xi32>
    %41 = arith.cmpi slt, %22, %40 : vector<32x128xi32>
    %cst_22 = arith.constant 0.000000e+00 : f32
    %42 = vector.broadcast %cst_22 : f32 to vector<32x128xf32>
    %43 = arith.select %41, %39, %42 : vector<32x128xi1>, vector<32x128xf32>
    %c0_23 = arith.constant 0 : index
    %c2 = arith.constant 2 : index
    %c0_24 = arith.constant 0 : index
    %c0_25 = arith.constant 0 : index
    %44 = vector.load %arg5[%c0_23, %c2, %c0_24, %c0_25] : memref<3x3x32x1xf32, #tpu.memory_space<vmem>>, vector<1x1x32x1xf32>
    %45 = vector.shape_cast %44 : vector<1x1x32x1xf32> to vector<32x1xf32>
    %46 = vector.broadcast %45 : vector<32x1xf32> to vector<32x128xf32>
    %47 = arith.mulf %43, %46 : vector<32x128xf32>
    %48 = arith.addf %38, %47 : vector<32x128xf32>
    %c0_26 = arith.constant 0 : index
    %c0_27 = arith.constant 0 : index
    %c0_28 = arith.constant 0 : index
    %49 = vector.load %arg6[%c0_26, %c0_27, %c0_28] : memref<3x32x1xf32, #tpu.memory_space<vmem>>, vector<1x32x1xf32>
    %50 = vector.shape_cast %49 : vector<1x32x1xf32> to vector<32x1xf32>
    %51 = vector.broadcast %50 : vector<32x1xf32> to vector<32x128xf32>
    %52 = arith.addf %48, %51 : vector<32x128xf32>
    %c0_29 = arith.constant 0 : index
    %c0_30 = arith.constant 0 : index
    %c0_31 = arith.constant 0 : index
    %53 = vector.load %arg9[%c0_29, %c0_30, %c0_31] : memref<3x32x1xf32, #tpu.memory_space<vmem>>, vector<1x32x1xf32>
    %54 = vector.shape_cast %53 : vector<1x32x1xf32> to vector<32x1xf32>
    %c0_32 = arith.constant 0 : index
    %c0_33 = arith.constant 0 : index
    %c0_34 = arith.constant 0 : index
    %55 = vector.load %arg10[%c0_32, %c0_33, %c0_34] : memref<3x32x1xf32, #tpu.memory_space<vmem>>, vector<1x32x1xf32>
    %56 = vector.shape_cast %55 : vector<1x32x1xf32> to vector<32x1xf32>
    %cst_35 = arith.constant dense<0.000000e+00> : vector<128xf32>
    %57 = vector.multi_reduction <add>, %52, %cst_35 [0] : vector<32x128xf32> to vector<128xf32>
    %58 = vector.shape_cast %57 : vector<128xf32> to vector<1x128xf32>
    %cst_36 = arith.constant 3.200000e+01 : f32
    %59 = vector.broadcast %cst_36 : f32 to vector<1x128xf32>
    %60 = arith.divf %58, %59 : vector<1x128xf32>
    %61 = vector.broadcast %60 : vector<1x128xf32> to vector<32x128xf32>
    %62 = arith.subf %52, %61 : vector<32x128xf32>
    %63 = arith.mulf %62, %62 : vector<32x128xf32>
    %cst_37 = arith.constant dense<0.000000e+00> : vector<128xf32>
    %64 = vector.multi_reduction <add>, %63, %cst_37 [0] : vector<32x128xf32> to vector<128xf32>
    %65 = vector.shape_cast %64 : vector<128xf32> to vector<1x128xf32>
    %cst_38 = arith.constant 3.200000e+01 : f32
    %66 = vector.broadcast %cst_38 : f32 to vector<1x128xf32>
    %67 = arith.divf %65, %66 : vector<1x128xf32>
    %68 = vector.broadcast %60 : vector<1x128xf32> to vector<32x128xf32>
    %69 = arith.subf %52, %68 : vector<32x128xf32>
    %cst_39 = arith.constant 9.99999974E-6 : f32
    %70 = vector.broadcast %cst_39 : f32 to vector<1x128xf32>
    %71 = arith.addf %67, %70 : vector<1x128xf32>
    %72 = math.rsqrt %71 : vector<1x128xf32>
    %73 = vector.broadcast %72 : vector<1x128xf32> to vector<32x128xf32>
    %74 = arith.mulf %69, %73 : vector<32x128xf32>
    %75 = vector.broadcast %54 : vector<32x1xf32> to vector<32x128xf32>
    %76 = arith.mulf %74, %75 : vector<32x128xf32>
    %77 = vector.broadcast %56 : vector<32x1xf32> to vector<32x128xf32>
    %78 = arith.addf %76, %77 : vector<32x128xf32>
    %cst_40 = arith.constant 5.000000e-01 : f32
    %79 = vector.broadcast %cst_40 : f32 to vector<32x128xf32>
    %80 = arith.mulf %79, %78 : vector<32x128xf32>
    %cst_41 = arith.constant 4.471500e-02 : f32
    %81 = vector.broadcast %cst_41 : f32 to vector<32x128xf32>
    %82 = arith.mulf %81, %78 : vector<32x128xf32>
    %83 = arith.mulf %82, %78 : vector<32x128xf32>
    %84 = arith.mulf %83, %78 : vector<32x128xf32>
    %85 = arith.addf %78, %84 : vector<32x128xf32>
    %cst_42 = arith.constant 0.797884583 : f32
    %86 = vector.broadcast %cst_42 : f32 to vector<32x128xf32>
    %87 = arith.mulf %86, %85 : vector<32x128xf32>
    %88 = math.tanh %87 : vector<32x128xf32>
    %cst_43 = arith.constant 1.000000e+00 : f32
    %89 = vector.broadcast %cst_43 : f32 to vector<32x128xf32>
    %90 = arith.addf %89, %88 : vector<32x128xf32>
    %91 = arith.mulf %80, %90 : vector<32x128xf32>
    %c0_44 = arith.constant 0 : index
    %c0_45 = arith.constant 0 : index
    %c0_46 = arith.constant 0 : index
    %92 = vector.load %arg7[%c0_44, %c0_45, %c0_46] : memref<3x32x32xf32, #tpu.memory_space<vmem>>, vector<1x32x32xf32>
    %93 = vector.shape_cast %92 : vector<1x32x32xf32> to vector<32x32xf32>
    %cst_47 = arith.constant dense<0.000000e+00> : vector<32x128xf32>
    %94 = tpu.matmul %93, %91, %cst_47 {dimension_numbers = #tpu.dot_dimension_numbers<[1], [0], [0], [1], [0, 0, 1, 1], [], []>} : vector<32x32xf32>, vector<32x128xf32>, vector<32x128xf32> -> vector<32x128xf32>
    %c0_48 = arith.constant 0 : index
    %c0_49 = arith.constant 0 : index
    %c0_50 = arith.constant 0 : index
    %95 = vector.load %arg8[%c0_48, %c0_49, %c0_50] : memref<3x32x1xf32, #tpu.memory_space<vmem>>, vector<1x32x1xf32>
    %96 = vector.shape_cast %95 : vector<1x32x1xf32> to vector<32x1xf32>
    %97 = vector.broadcast %96 : vector<32x1xf32> to vector<32x128xf32>
    %98 = arith.addf %94, %97 : vector<32x128xf32>
    %c0_51 = arith.constant 0 : index
    %c0_52 = arith.constant 0 : index
    %c0_53 = arith.constant 0 : index
    %99 = vector.load %arg11[%c0_51, %c0_52, %c0_53] : memref<3x32x1xf32, #tpu.memory_space<vmem>>, vector<1x32x1xf32>
    %100 = vector.shape_cast %99 : vector<1x32x1xf32> to vector<32x1xf32>
    %c0_54 = arith.constant 0 : index
    %c0_55 = arith.constant 0 : index
    %c0_56 = arith.constant 0 : index
    %101 = vector.load %arg12[%c0_54, %c0_55, %c0_56] : memref<3x32x1xf32, #tpu.memory_space<vmem>>, vector<1x32x1xf32>
    %102 = vector.shape_cast %101 : vector<1x32x1xf32> to vector<32x1xf32>
    %cst_57 = arith.constant dense<0.000000e+00> : vector<128xf32>
    %103 = vector.multi_reduction <add>, %98, %cst_57 [0] : vector<32x128xf32> to vector<128xf32>
    %104 = vector.shape_cast %103 : vector<128xf32> to vector<1x128xf32>
    %cst_58 = arith.constant 3.200000e+01 : f32
    %105 = vector.broadcast %cst_58 : f32 to vector<1x128xf32>
    %106 = arith.divf %104, %105 : vector<1x128xf32>
    %107 = vector.broadcast %106 : vector<1x128xf32> to vector<32x128xf32>
    %108 = arith.subf %98, %107 : vector<32x128xf32>
    %109 = arith.mulf %108, %108 : vector<32x128xf32>
    %cst_59 = arith.constant dense<0.000000e+00> : vector<128xf32>
    %110 = vector.multi_reduction <add>, %109, %cst_59 [0] : vector<32x128xf32> to vector<128xf32>
    %111 = vector.shape_cast %110 : vector<128xf32> to vector<1x128xf32>
    %cst_60 = arith.constant 3.200000e+01 : f32
    %112 = vector.broadcast %cst_60 : f32 to vector<1x128xf32>
    %113 = arith.divf %111, %112 : vector<1x128xf32>
    %114 = vector.broadcast %106 : vector<1x128xf32> to vector<32x128xf32>
    %115 = arith.subf %98, %114 : vector<32x128xf32>
    %cst_61 = arith.constant 9.99999974E-6 : f32
    %116 = vector.broadcast %cst_61 : f32 to vector<1x128xf32>
    %117 = arith.addf %113, %116 : vector<1x128xf32>
    %118 = math.rsqrt %117 : vector<1x128xf32>
    %119 = vector.broadcast %118 : vector<1x128xf32> to vector<32x128xf32>
    %120 = arith.mulf %115, %119 : vector<32x128xf32>
    %121 = vector.broadcast %100 : vector<32x1xf32> to vector<32x128xf32>
    %122 = arith.mulf %120, %121 : vector<32x128xf32>
    %123 = vector.broadcast %102 : vector<32x1xf32> to vector<32x128xf32>
    %124 = arith.addf %122, %123 : vector<32x128xf32>
    %cst_62 = arith.constant 5.000000e-01 : f32
    %125 = vector.broadcast %cst_62 : f32 to vector<32x128xf32>
    %126 = arith.mulf %125, %124 : vector<32x128xf32>
    %cst_63 = arith.constant 4.471500e-02 : f32
    %127 = vector.broadcast %cst_63 : f32 to vector<32x128xf32>
    %128 = arith.mulf %127, %124 : vector<32x128xf32>
    %129 = arith.mulf %128, %124 : vector<32x128xf32>
    %130 = arith.mulf %129, %124 : vector<32x128xf32>
    %131 = arith.addf %124, %130 : vector<32x128xf32>
    %cst_64 = arith.constant 0.797884583 : f32
    %132 = vector.broadcast %cst_64 : f32 to vector<32x128xf32>
    %133 = arith.mulf %132, %131 : vector<32x128xf32>
    %134 = math.tanh %133 : vector<32x128xf32>
    %cst_65 = arith.constant 1.000000e+00 : f32
    %135 = vector.broadcast %cst_65 : f32 to vector<32x128xf32>
    %136 = arith.addf %135, %134 : vector<32x128xf32>
    %137 = arith.mulf %126, %136 : vector<32x128xf32>
    %138 = arith.addf %21, %137 : vector<32x128xf32>
    %139 = vector.broadcast %3 : vector<1x128xf32> to vector<32x128xf32>
    %140 = arith.mulf %138, %139 : vector<32x128xf32>
    %c1_66 = arith.constant 1 : index
    %c1_67 = arith.constant 1 : index
    %c0_68 = arith.constant 0 : index
    %c0_69 = arith.constant 0 : index
    %141 = vector.load %arg5[%c1_66, %c1_67, %c0_68, %c0_69] : memref<3x3x32x1xf32, #tpu.memory_space<vmem>>, vector<1x1x32x1xf32>
    %142 = vector.shape_cast %141 : vector<1x1x32x1xf32> to vector<32x1xf32>
    %143 = vector.broadcast %142 : vector<32x1xf32> to vector<32x128xf32>
    %144 = arith.mulf %140, %143 : vector<32x128xf32>
    %c3_i32 = arith.constant 3 : i32
    %145 = tpu.dynamic_rotate %140 by %c3_i32 dim 1 : vector<32x128xf32>, i32 -> vector<32x128xf32>
    %c3_i32_70 = arith.constant 3 : i32
    %146 = vector.broadcast %c3_i32_70 : i32 to vector<32x128xi32>
    %147 = arith.cmpi sge, %22, %146 : vector<32x128xi32>
    %cst_71 = arith.constant 0.000000e+00 : f32
    %148 = vector.broadcast %cst_71 : f32 to vector<32x128xf32>
    %149 = arith.select %147, %145, %148 : vector<32x128xi1>, vector<32x128xf32>
    %c1_72 = arith.constant 1 : index
    %c0_73 = arith.constant 0 : index
    %c0_74 = arith.constant 0 : index
    %c0_75 = arith.constant 0 : index
    %150 = vector.load %arg5[%c1_72, %c0_73, %c0_74, %c0_75] : memref<3x3x32x1xf32, #tpu.memory_space<vmem>>, vector<1x1x32x1xf32>
    %151 = vector.shape_cast %150 : vector<1x1x32x1xf32> to vector<32x1xf32>
    %152 = vector.broadcast %151 : vector<32x1xf32> to vector<32x128xf32>
    %153 = arith.mulf %149, %152 : vector<32x128xf32>
    %154 = arith.addf %144, %153 : vector<32x128xf32>
    %c125_i32 = arith.constant 125 : i32
    %155 = tpu.dynamic_rotate %140 by %c125_i32 dim 1 : vector<32x128xf32>, i32 -> vector<32x128xf32>
    %c125_i32_76 = arith.constant 125 : i32
    %156 = vector.broadcast %c125_i32_76 : i32 to vector<32x128xi32>
    %157 = arith.cmpi slt, %22, %156 : vector<32x128xi32>
    %cst_77 = arith.constant 0.000000e+00 : f32
    %158 = vector.broadcast %cst_77 : f32 to vector<32x128xf32>
    %159 = arith.select %157, %155, %158 : vector<32x128xi1>, vector<32x128xf32>
    %c1_78 = arith.constant 1 : index
    %c2_79 = arith.constant 2 : index
    %c0_80 = arith.constant 0 : index
    %c0_81 = arith.constant 0 : index
    %160 = vector.load %arg5[%c1_78, %c2_79, %c0_80, %c0_81] : memref<3x3x32x1xf32, #tpu.memory_space<vmem>>, vector<1x1x32x1xf32>
    %161 = vector.shape_cast %160 : vector<1x1x32x1xf32> to vector<32x1xf32>
    %162 = vector.broadcast %161 : vector<32x1xf32> to vector<32x128xf32>
    %163 = arith.mulf %159, %162 : vector<32x128xf32>
    %164 = arith.addf %154, %163 : vector<32x128xf32>
    %c1_82 = arith.constant 1 : index
    %c0_83 = arith.constant 0 : index
    %c0_84 = arith.constant 0 : index
    %165 = vector.load %arg6[%c1_82, %c0_83, %c0_84] : memref<3x32x1xf32, #tpu.memory_space<vmem>>, vector<1x32x1xf32>
    %166 = vector.shape_cast %165 : vector<1x32x1xf32> to vector<32x1xf32>
    %167 = vector.broadcast %166 : vector<32x1xf32> to vector<32x128xf32>
    %168 = arith.addf %164, %167 : vector<32x128xf32>
    %c1_85 = arith.constant 1 : index
    %c0_86 = arith.constant 0 : index
    %c0_87 = arith.constant 0 : index
    %169 = vector.load %arg9[%c1_85, %c0_86, %c0_87] : memref<3x32x1xf32, #tpu.memory_space<vmem>>, vector<1x32x1xf32>
    %170 = vector.shape_cast %169 : vector<1x32x1xf32> to vector<32x1xf32>
    %c1_88 = arith.constant 1 : index
    %c0_89 = arith.constant 0 : index
    %c0_90 = arith.constant 0 : index
    %171 = vector.load %arg10[%c1_88, %c0_89, %c0_90] : memref<3x32x1xf32, #tpu.memory_space<vmem>>, vector<1x32x1xf32>
    %172 = vector.shape_cast %171 : vector<1x32x1xf32> to vector<32x1xf32>
    %cst_91 = arith.constant dense<0.000000e+00> : vector<128xf32>
    %173 = vector.multi_reduction <add>, %168, %cst_91 [0] : vector<32x128xf32> to vector<128xf32>
    %174 = vector.shape_cast %173 : vector<128xf32> to vector<1x128xf32>
    %cst_92 = arith.constant 3.200000e+01 : f32
    %175 = vector.broadcast %cst_92 : f32 to vector<1x128xf32>
    %176 = arith.divf %174, %175 : vector<1x128xf32>
    %177 = vector.broadcast %176 : vector<1x128xf32> to vector<32x128xf32>
    %178 = arith.subf %168, %177 : vector<32x128xf32>
    %179 = arith.mulf %178, %178 : vector<32x128xf32>
    %cst_93 = arith.constant dense<0.000000e+00> : vector<128xf32>
    %180 = vector.multi_reduction <add>, %179, %cst_93 [0] : vector<32x128xf32> to vector<128xf32>
    %181 = vector.shape_cast %180 : vector<128xf32> to vector<1x128xf32>
    %cst_94 = arith.constant 3.200000e+01 : f32
    %182 = vector.broadcast %cst_94 : f32 to vector<1x128xf32>
    %183 = arith.divf %181, %182 : vector<1x128xf32>
    %184 = vector.broadcast %176 : vector<1x128xf32> to vector<32x128xf32>
    %185 = arith.subf %168, %184 : vector<32x128xf32>
    %cst_95 = arith.constant 9.99999974E-6 : f32
    %186 = vector.broadcast %cst_95 : f32 to vector<1x128xf32>
    %187 = arith.addf %183, %186 : vector<1x128xf32>
    %188 = math.rsqrt %187 : vector<1x128xf32>
    %189 = vector.broadcast %188 : vector<1x128xf32> to vector<32x128xf32>
    %190 = arith.mulf %185, %189 : vector<32x128xf32>
    %191 = vector.broadcast %170 : vector<32x1xf32> to vector<32x128xf32>
    %192 = arith.mulf %190, %191 : vector<32x128xf32>
    %193 = vector.broadcast %172 : vector<32x1xf32> to vector<32x128xf32>
    %194 = arith.addf %192, %193 : vector<32x128xf32>
    %cst_96 = arith.constant 5.000000e-01 : f32
    %195 = vector.broadcast %cst_96 : f32 to vector<32x128xf32>
    %196 = arith.mulf %195, %194 : vector<32x128xf32>
    %cst_97 = arith.constant 4.471500e-02 : f32
    %197 = vector.broadcast %cst_97 : f32 to vector<32x128xf32>
    %198 = arith.mulf %197, %194 : vector<32x128xf32>
    %199 = arith.mulf %198, %194 : vector<32x128xf32>
    %200 = arith.mulf %199, %194 : vector<32x128xf32>
    %201 = arith.addf %194, %200 : vector<32x128xf32>
    %cst_98 = arith.constant 0.797884583 : f32
    %202 = vector.broadcast %cst_98 : f32 to vector<32x128xf32>
    %203 = arith.mulf %202, %201 : vector<32x128xf32>
    %204 = math.tanh %203 : vector<32x128xf32>
    %cst_99 = arith.constant 1.000000e+00 : f32
    %205 = vector.broadcast %cst_99 : f32 to vector<32x128xf32>
    %206 = arith.addf %205, %204 : vector<32x128xf32>
    %207 = arith.mulf %196, %206 : vector<32x128xf32>
    %c1_100 = arith.constant 1 : index
    %c0_101 = arith.constant 0 : index
    %c0_102 = arith.constant 0 : index
    %208 = vector.load %arg7[%c1_100, %c0_101, %c0_102] : memref<3x32x32xf32, #tpu.memory_space<vmem>>, vector<1x32x32xf32>
    %209 = vector.shape_cast %208 : vector<1x32x32xf32> to vector<32x32xf32>
    %cst_103 = arith.constant dense<0.000000e+00> : vector<32x128xf32>
    %210 = tpu.matmul %209, %207, %cst_103 {dimension_numbers = #tpu.dot_dimension_numbers<[1], [0], [0], [1], [0, 0, 1, 1], [], []>} : vector<32x32xf32>, vector<32x128xf32>, vector<32x128xf32> -> vector<32x128xf32>
    %c1_104 = arith.constant 1 : index
    %c0_105 = arith.constant 0 : index
    %c0_106 = arith.constant 0 : index
    %211 = vector.load %arg8[%c1_104, %c0_105, %c0_106] : memref<3x32x1xf32, #tpu.memory_space<vmem>>, vector<1x32x1xf32>
    %212 = vector.shape_cast %211 : vector<1x32x1xf32> to vector<32x1xf32>
    %213 = vector.broadcast %212 : vector<32x1xf32> to vector<32x128xf32>
    %214 = arith.addf %210, %213 : vector<32x128xf32>
    %c1_107 = arith.constant 1 : index
    %c0_108 = arith.constant 0 : index
    %c0_109 = arith.constant 0 : index
    %215 = vector.load %arg11[%c1_107, %c0_108, %c0_109] : memref<3x32x1xf32, #tpu.memory_space<vmem>>, vector<1x32x1xf32>
    %216 = vector.shape_cast %215 : vector<1x32x1xf32> to vector<32x1xf32>
    %c1_110 = arith.constant 1 : index
    %c0_111 = arith.constant 0 : index
    %c0_112 = arith.constant 0 : index
    %217 = vector.load %arg12[%c1_110, %c0_111, %c0_112] : memref<3x32x1xf32, #tpu.memory_space<vmem>>, vector<1x32x1xf32>
    %218 = vector.shape_cast %217 : vector<1x32x1xf32> to vector<32x1xf32>
    %cst_113 = arith.constant dense<0.000000e+00> : vector<128xf32>
    %219 = vector.multi_reduction <add>, %214, %cst_113 [0] : vector<32x128xf32> to vector<128xf32>
    %220 = vector.shape_cast %219 : vector<128xf32> to vector<1x128xf32>
    %cst_114 = arith.constant 3.200000e+01 : f32
    %221 = vector.broadcast %cst_114 : f32 to vector<1x128xf32>
    %222 = arith.divf %220, %221 : vector<1x128xf32>
    %223 = vector.broadcast %222 : vector<1x128xf32> to vector<32x128xf32>
    %224 = arith.subf %214, %223 : vector<32x128xf32>
    %225 = arith.mulf %224, %224 : vector<32x128xf32>
    %cst_115 = arith.constant dense<0.000000e+00> : vector<128xf32>
    %226 = vector.multi_reduction <add>, %225, %cst_115 [0] : vector<32x128xf32> to vector<128xf32>
    %227 = vector.shape_cast %226 : vector<128xf32> to vector<1x128xf32>
    %cst_116 = arith.constant 3.200000e+01 : f32
    %228 = vector.broadcast %cst_116 : f32 to vector<1x128xf32>
    %229 = arith.divf %227, %228 : vector<1x128xf32>
    %230 = vector.broadcast %222 : vector<1x128xf32> to vector<32x128xf32>
    %231 = arith.subf %214, %230 : vector<32x128xf32>
    %cst_117 = arith.constant 9.99999974E-6 : f32
    %232 = vector.broadcast %cst_117 : f32 to vector<1x128xf32>
    %233 = arith.addf %229, %232 : vector<1x128xf32>
    %234 = math.rsqrt %233 : vector<1x128xf32>
    %235 = vector.broadcast %234 : vector<1x128xf32> to vector<32x128xf32>
    %236 = arith.mulf %231, %235 : vector<32x128xf32>
    %237 = vector.broadcast %216 : vector<32x1xf32> to vector<32x128xf32>
    %238 = arith.mulf %236, %237 : vector<32x128xf32>
    %239 = vector.broadcast %218 : vector<32x1xf32> to vector<32x128xf32>
    %240 = arith.addf %238, %239 : vector<32x128xf32>
    %cst_118 = arith.constant 5.000000e-01 : f32
    %241 = vector.broadcast %cst_118 : f32 to vector<32x128xf32>
    %242 = arith.mulf %241, %240 : vector<32x128xf32>
    %cst_119 = arith.constant 4.471500e-02 : f32
    %243 = vector.broadcast %cst_119 : f32 to vector<32x128xf32>
    %244 = arith.mulf %243, %240 : vector<32x128xf32>
    %245 = arith.mulf %244, %240 : vector<32x128xf32>
    %246 = arith.mulf %245, %240 : vector<32x128xf32>
    %247 = arith.addf %240, %246 : vector<32x128xf32>
    %cst_120 = arith.constant 0.797884583 : f32
    %248 = vector.broadcast %cst_120 : f32 to vector<32x128xf32>
    %249 = arith.mulf %248, %247 : vector<32x128xf32>
    %250 = math.tanh %249 : vector<32x128xf32>
    %cst_121 = arith.constant 1.000000e+00 : f32
    %251 = vector.broadcast %cst_121 : f32 to vector<32x128xf32>
    %252 = arith.addf %251, %250 : vector<32x128xf32>
    %253 = arith.mulf %242, %252 : vector<32x128xf32>
    %254 = arith.addf %138, %253 : vector<32x128xf32>
    %255 = vector.broadcast %3 : vector<1x128xf32> to vector<32x128xf32>
    %256 = arith.mulf %254, %255 : vector<32x128xf32>
    %c2_122 = arith.constant 2 : index
    %c1_123 = arith.constant 1 : index
    %c0_124 = arith.constant 0 : index
    %c0_125 = arith.constant 0 : index
    %257 = vector.load %arg5[%c2_122, %c1_123, %c0_124, %c0_125] : memref<3x3x32x1xf32, #tpu.memory_space<vmem>>, vector<1x1x32x1xf32>
    %258 = vector.shape_cast %257 : vector<1x1x32x1xf32> to vector<32x1xf32>
    %259 = vector.broadcast %258 : vector<32x1xf32> to vector<32x128xf32>
    %260 = arith.mulf %256, %259 : vector<32x128xf32>
    %c9_i32 = arith.constant 9 : i32
    %261 = tpu.dynamic_rotate %256 by %c9_i32 dim 1 : vector<32x128xf32>, i32 -> vector<32x128xf32>
    %c9_i32_126 = arith.constant 9 : i32
    %262 = vector.broadcast %c9_i32_126 : i32 to vector<32x128xi32>
    %263 = arith.cmpi sge, %22, %262 : vector<32x128xi32>
    %cst_127 = arith.constant 0.000000e+00 : f32
    %264 = vector.broadcast %cst_127 : f32 to vector<32x128xf32>
    %265 = arith.select %263, %261, %264 : vector<32x128xi1>, vector<32x128xf32>
    %c2_128 = arith.constant 2 : index
    %c0_129 = arith.constant 0 : index
    %c0_130 = arith.constant 0 : index
    %c0_131 = arith.constant 0 : index
    %266 = vector.load %arg5[%c2_128, %c0_129, %c0_130, %c0_131] : memref<3x3x32x1xf32, #tpu.memory_space<vmem>>, vector<1x1x32x1xf32>
    %267 = vector.shape_cast %266 : vector<1x1x32x1xf32> to vector<32x1xf32>
    %268 = vector.broadcast %267 : vector<32x1xf32> to vector<32x128xf32>
    %269 = arith.mulf %265, %268 : vector<32x128xf32>
    %270 = arith.addf %260, %269 : vector<32x128xf32>
    %c119_i32 = arith.constant 119 : i32
    %271 = tpu.dynamic_rotate %256 by %c119_i32 dim 1 : vector<32x128xf32>, i32 -> vector<32x128xf32>
    %c119_i32_132 = arith.constant 119 : i32
    %272 = vector.broadcast %c119_i32_132 : i32 to vector<32x128xi32>
    %273 = arith.cmpi slt, %22, %272 : vector<32x128xi32>
    %cst_133 = arith.constant 0.000000e+00 : f32
    %274 = vector.broadcast %cst_133 : f32 to vector<32x128xf32>
    %275 = arith.select %273, %271, %274 : vector<32x128xi1>, vector<32x128xf32>
    %c2_134 = arith.constant 2 : index
    %c2_135 = arith.constant 2 : index
    %c0_136 = arith.constant 0 : index
    %c0_137 = arith.constant 0 : index
    %276 = vector.load %arg5[%c2_134, %c2_135, %c0_136, %c0_137] : memref<3x3x32x1xf32, #tpu.memory_space<vmem>>, vector<1x1x32x1xf32>
    %277 = vector.shape_cast %276 : vector<1x1x32x1xf32> to vector<32x1xf32>
    %278 = vector.broadcast %277 : vector<32x1xf32> to vector<32x128xf32>
    %279 = arith.mulf %275, %278 : vector<32x128xf32>
    %280 = arith.addf %270, %279 : vector<32x128xf32>
    %c2_138 = arith.constant 2 : index
    %c0_139 = arith.constant 0 : index
    %c0_140 = arith.constant 0 : index
    %281 = vector.load %arg6[%c2_138, %c0_139, %c0_140] : memref<3x32x1xf32, #tpu.memory_space<vmem>>, vector<1x32x1xf32>
    %282 = vector.shape_cast %281 : vector<1x32x1xf32> to vector<32x1xf32>
    %283 = vector.broadcast %282 : vector<32x1xf32> to vector<32x128xf32>
    %284 = arith.addf %280, %283 : vector<32x128xf32>
    %c2_141 = arith.constant 2 : index
    %c0_142 = arith.constant 0 : index
    %c0_143 = arith.constant 0 : index
    %285 = vector.load %arg9[%c2_141, %c0_142, %c0_143] : memref<3x32x1xf32, #tpu.memory_space<vmem>>, vector<1x32x1xf32>
    %286 = vector.shape_cast %285 : vector<1x32x1xf32> to vector<32x1xf32>
    %c2_144 = arith.constant 2 : index
    %c0_145 = arith.constant 0 : index
    %c0_146 = arith.constant 0 : index
    %287 = vector.load %arg10[%c2_144, %c0_145, %c0_146] : memref<3x32x1xf32, #tpu.memory_space<vmem>>, vector<1x32x1xf32>
    %288 = vector.shape_cast %287 : vector<1x32x1xf32> to vector<32x1xf32>
    %cst_147 = arith.constant dense<0.000000e+00> : vector<128xf32>
    %289 = vector.multi_reduction <add>, %284, %cst_147 [0] : vector<32x128xf32> to vector<128xf32>
    %290 = vector.shape_cast %289 : vector<128xf32> to vector<1x128xf32>
    %cst_148 = arith.constant 3.200000e+01 : f32
    %291 = vector.broadcast %cst_148 : f32 to vector<1x128xf32>
    %292 = arith.divf %290, %291 : vector<1x128xf32>
    %293 = vector.broadcast %292 : vector<1x128xf32> to vector<32x128xf32>
    %294 = arith.subf %284, %293 : vector<32x128xf32>
    %295 = arith.mulf %294, %294 : vector<32x128xf32>
    %cst_149 = arith.constant dense<0.000000e+00> : vector<128xf32>
    %296 = vector.multi_reduction <add>, %295, %cst_149 [0] : vector<32x128xf32> to vector<128xf32>
    %297 = vector.shape_cast %296 : vector<128xf32> to vector<1x128xf32>
    %cst_150 = arith.constant 3.200000e+01 : f32
    %298 = vector.broadcast %cst_150 : f32 to vector<1x128xf32>
    %299 = arith.divf %297, %298 : vector<1x128xf32>
    %300 = vector.broadcast %292 : vector<1x128xf32> to vector<32x128xf32>
    %301 = arith.subf %284, %300 : vector<32x128xf32>
    %cst_151 = arith.constant 9.99999974E-6 : f32
    %302 = vector.broadcast %cst_151 : f32 to vector<1x128xf32>
    %303 = arith.addf %299, %302 : vector<1x128xf32>
    %304 = math.rsqrt %303 : vector<1x128xf32>
    %305 = vector.broadcast %304 : vector<1x128xf32> to vector<32x128xf32>
    %306 = arith.mulf %301, %305 : vector<32x128xf32>
    %307 = vector.broadcast %286 : vector<32x1xf32> to vector<32x128xf32>
    %308 = arith.mulf %306, %307 : vector<32x128xf32>
    %309 = vector.broadcast %288 : vector<32x1xf32> to vector<32x128xf32>
    %310 = arith.addf %308, %309 : vector<32x128xf32>
    %cst_152 = arith.constant 5.000000e-01 : f32
    %311 = vector.broadcast %cst_152 : f32 to vector<32x128xf32>
    %312 = arith.mulf %311, %310 : vector<32x128xf32>
    %cst_153 = arith.constant 4.471500e-02 : f32
    %313 = vector.broadcast %cst_153 : f32 to vector<32x128xf32>
    %314 = arith.mulf %313, %310 : vector<32x128xf32>
    %315 = arith.mulf %314, %310 : vector<32x128xf32>
    %316 = arith.mulf %315, %310 : vector<32x128xf32>
    %317 = arith.addf %310, %316 : vector<32x128xf32>
    %cst_154 = arith.constant 0.797884583 : f32
    %318 = vector.broadcast %cst_154 : f32 to vector<32x128xf32>
    %319 = arith.mulf %318, %317 : vector<32x128xf32>
    %320 = math.tanh %319 : vector<32x128xf32>
    %cst_155 = arith.constant 1.000000e+00 : f32
    %321 = vector.broadcast %cst_155 : f32 to vector<32x128xf32>
    %322 = arith.addf %321, %320 : vector<32x128xf32>
    %323 = arith.mulf %312, %322 : vector<32x128xf32>
    %c2_156 = arith.constant 2 : index
    %c0_157 = arith.constant 0 : index
    %c0_158 = arith.constant 0 : index
    %324 = vector.load %arg7[%c2_156, %c0_157, %c0_158] : memref<3x32x32xf32, #tpu.memory_space<vmem>>, vector<1x32x32xf32>
    %325 = vector.shape_cast %324 : vector<1x32x32xf32> to vector<32x32xf32>
    %cst_159 = arith.constant dense<0.000000e+00> : vector<32x128xf32>
    %326 = tpu.matmul %325, %323, %cst_159 {dimension_numbers = #tpu.dot_dimension_numbers<[1], [0], [0], [1], [0, 0, 1, 1], [], []>} : vector<32x32xf32>, vector<32x128xf32>, vector<32x128xf32> -> vector<32x128xf32>
    %c2_160 = arith.constant 2 : index
    %c0_161 = arith.constant 0 : index
    %c0_162 = arith.constant 0 : index
    %327 = vector.load %arg8[%c2_160, %c0_161, %c0_162] : memref<3x32x1xf32, #tpu.memory_space<vmem>>, vector<1x32x1xf32>
    %328 = vector.shape_cast %327 : vector<1x32x1xf32> to vector<32x1xf32>
    %329 = vector.broadcast %328 : vector<32x1xf32> to vector<32x128xf32>
    %330 = arith.addf %326, %329 : vector<32x128xf32>
    %c2_163 = arith.constant 2 : index
    %c0_164 = arith.constant 0 : index
    %c0_165 = arith.constant 0 : index
    %331 = vector.load %arg11[%c2_163, %c0_164, %c0_165] : memref<3x32x1xf32, #tpu.memory_space<vmem>>, vector<1x32x1xf32>
    %332 = vector.shape_cast %331 : vector<1x32x1xf32> to vector<32x1xf32>
    %c2_166 = arith.constant 2 : index
    %c0_167 = arith.constant 0 : index
    %c0_168 = arith.constant 0 : index
    %333 = vector.load %arg12[%c2_166, %c0_167, %c0_168] : memref<3x32x1xf32, #tpu.memory_space<vmem>>, vector<1x32x1xf32>
    %334 = vector.shape_cast %333 : vector<1x32x1xf32> to vector<32x1xf32>
    %cst_169 = arith.constant dense<0.000000e+00> : vector<128xf32>
    %335 = vector.multi_reduction <add>, %330, %cst_169 [0] : vector<32x128xf32> to vector<128xf32>
    %336 = vector.shape_cast %335 : vector<128xf32> to vector<1x128xf32>
    %cst_170 = arith.constant 3.200000e+01 : f32
    %337 = vector.broadcast %cst_170 : f32 to vector<1x128xf32>
    %338 = arith.divf %336, %337 : vector<1x128xf32>
    %339 = vector.broadcast %338 : vector<1x128xf32> to vector<32x128xf32>
    %340 = arith.subf %330, %339 : vector<32x128xf32>
    %341 = arith.mulf %340, %340 : vector<32x128xf32>
    %cst_171 = arith.constant dense<0.000000e+00> : vector<128xf32>
    %342 = vector.multi_reduction <add>, %341, %cst_171 [0] : vector<32x128xf32> to vector<128xf32>
    %343 = vector.shape_cast %342 : vector<128xf32> to vector<1x128xf32>
    %cst_172 = arith.constant 3.200000e+01 : f32
    %344 = vector.broadcast %cst_172 : f32 to vector<1x128xf32>
    %345 = arith.divf %343, %344 : vector<1x128xf32>
    %346 = vector.broadcast %338 : vector<1x128xf32> to vector<32x128xf32>
    %347 = arith.subf %330, %346 : vector<32x128xf32>
    %cst_173 = arith.constant 9.99999974E-6 : f32
    %348 = vector.broadcast %cst_173 : f32 to vector<1x128xf32>
    %349 = arith.addf %345, %348 : vector<1x128xf32>
    %350 = math.rsqrt %349 : vector<1x128xf32>
    %351 = vector.broadcast %350 : vector<1x128xf32> to vector<32x128xf32>
    %352 = arith.mulf %347, %351 : vector<32x128xf32>
    %353 = vector.broadcast %332 : vector<32x1xf32> to vector<32x128xf32>
    %354 = arith.mulf %352, %353 : vector<32x128xf32>
    %355 = vector.broadcast %334 : vector<32x1xf32> to vector<32x128xf32>
    %356 = arith.addf %354, %355 : vector<32x128xf32>
    %cst_174 = arith.constant 5.000000e-01 : f32
    %357 = vector.broadcast %cst_174 : f32 to vector<32x128xf32>
    %358 = arith.mulf %357, %356 : vector<32x128xf32>
    %cst_175 = arith.constant 4.471500e-02 : f32
    %359 = vector.broadcast %cst_175 : f32 to vector<32x128xf32>
    %360 = arith.mulf %359, %356 : vector<32x128xf32>
    %361 = arith.mulf %360, %356 : vector<32x128xf32>
    %362 = arith.mulf %361, %356 : vector<32x128xf32>
    %363 = arith.addf %356, %362 : vector<32x128xf32>
    %cst_176 = arith.constant 0.797884583 : f32
    %364 = vector.broadcast %cst_176 : f32 to vector<32x128xf32>
    %365 = arith.mulf %364, %363 : vector<32x128xf32>
    %366 = math.tanh %365 : vector<32x128xf32>
    %cst_177 = arith.constant 1.000000e+00 : f32
    %367 = vector.broadcast %cst_177 : f32 to vector<32x128xf32>
    %368 = arith.addf %367, %366 : vector<32x128xf32>
    %369 = arith.mulf %358, %368 : vector<32x128xf32>
    %370 = arith.addf %254, %369 : vector<32x128xf32>
    %371 = vector.broadcast %3 : vector<1x128xf32> to vector<32x128xf32>
    %372 = arith.mulf %370, %371 : vector<32x128xf32>
    %c0_178 = arith.constant 0 : index
    %c0_179 = arith.constant 0 : index
    %373 = vector.load %arg13[%c0_178, %c0_179] : memref<58x32xf32, #tpu.memory_space<vmem>>, vector<58x32xf32>
    %cst_180 = arith.constant dense<0.000000e+00> : vector<58x128xf32>
    %374 = tpu.matmul %373, %372, %cst_180 {dimension_numbers = #tpu.dot_dimension_numbers<[1], [0], [0], [1], [0, 0, 1, 1], [], []>} : vector<58x32xf32>, vector<32x128xf32>, vector<58x128xf32> -> vector<58x128xf32>
    %c0_181 = arith.constant 0 : index
    %c0_182 = arith.constant 0 : index
    %375 = vector.load %arg14[%c0_181, %c0_182] : memref<58x1xf32, #tpu.memory_space<vmem>>, vector<58x1xf32>
    %376 = vector.broadcast %375 : vector<58x1xf32> to vector<58x128xf32>
    %377 = arith.addf %374, %376 : vector<58x128xf32>
    %378 = vector.broadcast %3 : vector<1x128xf32> to vector<58x128xf32>
    %379 = arith.mulf %377, %378 : vector<58x128xf32>
    %380 = tpu.iota {dimensions = array<i32: 0>} : vector<10x10xi32>
    %381 = tpu.iota {dimensions = array<i32: 1>} : vector<10x10xi32>
    %382 = arith.cmpi sle, %381, %380 : vector<10x10xi32>
    %383 = arith.extui %382 : vector<10x10xi1> to vector<10x10xi32>
    %384 = arith.sitofp %383 : vector<10x10xi32> to vector<10x10xf32>
    %385 = vector.extract_strided_slice %379 {offsets = [0, 0], sizes = [29, 128], strides = [1, 1]} : vector<58x128xf32> to vector<29x128xf32>
    %386 = vector.extract_strided_slice %379 {offsets = [29, 0], sizes = [29, 128], strides = [1, 1]} : vector<58x128xf32> to vector<29x128xf32>
    %387 = tpu.concatenate %385, %386 in 1 : vector<29x128xf32>, vector<29x128xf32> -> vector<29x256xf32>
    %388 = vector.extract_strided_slice %5 {offsets = [0, 0], sizes = [1, 128], strides = [1, 1]} : vector<2x128xf32> to vector<1x128xf32>
    %389 = vector.extract_strided_slice %5 {offsets = [1, 0], sizes = [1, 128], strides = [1, 1]} : vector<2x128xf32> to vector<1x128xf32>
    %390 = tpu.concatenate %388, %389 in 1 : vector<1x128xf32>, vector<1x128xf32> -> vector<1x256xf32>
    %391 = vector.extract_strided_slice %387 {offsets = [0, 0], sizes = [20, 256], strides = [1, 1]} : vector<29x256xf32> to vector<20x256xf32>
    %cst_183 = arith.constant 0.176776692 : f32
    %392 = vector.broadcast %cst_183 : f32 to vector<20x256xf32>
    %393 = arith.mulf %391, %392 : vector<20x256xf32>
    %394 = vector.extract_strided_slice %393 {offsets = [0, 0], sizes = [10, 256], strides = [1, 1]} : vector<20x256xf32> to vector<10x256xf32>
    %395 = vector.extract_strided_slice %393 {offsets = [10, 0], sizes = [10, 256], strides = [1, 1]} : vector<20x256xf32> to vector<10x256xf32>
    %396 = vector.extract_strided_slice %387 {offsets = [20, 0], sizes = [9, 256], strides = [1, 1]} : vector<29x256xf32> to vector<9x256xf32>
    %cst_184 = arith.constant -5.000000e+00 : f32
    %397 = vector.broadcast %cst_184 : f32 to vector<1x256xf32>
    %398 = arith.cmpf oge, %390, %397 : vector<1x256xf32>
    %cst_185 = arith.constant 5.000000e+00 : f32
    %399 = vector.broadcast %cst_185 : f32 to vector<1x256xf32>
    %400 = arith.cmpf ole, %390, %399 : vector<1x256xf32>
    %401 = arith.andi %398, %400 : vector<1x256xi1>
    %cst_186 = arith.constant -5.000000e+00 : f32
    %cst_187 = arith.constant 5.000000e+00 : f32
    %402 = vector.broadcast %cst_186 : f32 to vector<1x256xf32>
    %403 = arith.maximumf %402, %390 : vector<1x256xf32>
    %404 = vector.broadcast %cst_187 : f32 to vector<1x256xf32>
    %405 = arith.minimumf %404, %403 : vector<1x256xf32>
    %406 = tpu.iota {dimensions = array<i32: 0>} : vector<10x256xi32>
    %cst_188 = arith.constant dense<0xFF800000> : vector<256xf32>
    %407 = vector.multi_reduction <maximumf>, %394, %cst_188 [0] : vector<10x256xf32> to vector<256xf32>
    %408 = vector.shape_cast %407 : vector<256xf32> to vector<1x256xf32>
    %409 = vector.broadcast %408 : vector<1x256xf32> to vector<10x256xf32>
    %410 = arith.subf %394, %409 : vector<10x256xf32>
    %411 = math.exp %410 : vector<10x256xf32>
    %cst_189 = arith.constant dense<0.000000e+00> : vector<256xf32>
    %412 = vector.multi_reduction <add>, %411, %cst_189 [0] : vector<10x256xf32> to vector<256xf32>
    %413 = vector.shape_cast %412 : vector<256xf32> to vector<1x256xf32>
    %414 = vector.broadcast %413 : vector<1x256xf32> to vector<10x256xf32>
    %415 = arith.divf %411, %414 : vector<10x256xf32>
    %cst_190 = arith.constant 9.900000e-01 : f32
    %416 = vector.broadcast %cst_190 : f32 to vector<10x256xf32>
    %417 = arith.mulf %416, %415 : vector<10x256xf32>
    %cst_191 = arith.constant 1.000000e-03 : f32
    %418 = vector.broadcast %cst_191 : f32 to vector<10x256xf32>
    %419 = arith.addf %418, %417 : vector<10x256xf32>
    %cst_192 = arith.constant dense<0.000000e+00> : vector<10x256xf32>
    %420 = tpu.matmul %384, %419, %cst_192 {dimension_numbers = #tpu.dot_dimension_numbers<[1], [0], [0], [1], [0, 0, 1, 1], [], []>} : vector<10x10xf32>, vector<10x256xf32>, vector<10x256xf32> -> vector<10x256xf32>
    %421 = arith.subf %420, %419 : vector<10x256xf32>
    %cst_193 = arith.constant 1.000000e+01 : f32
    %422 = vector.broadcast %cst_193 : f32 to vector<10x256xf32>
    %423 = arith.mulf %422, %421 : vector<10x256xf32>
    %cst_194 = arith.constant 5.000000e+00 : f32
    %424 = vector.broadcast %cst_194 : f32 to vector<10x256xf32>
    %425 = arith.subf %423, %424 : vector<10x256xf32>
    %c9_i32_195 = arith.constant 9 : i32
    %426 = vector.broadcast %c9_i32_195 : i32 to vector<10x256xi32>
    %427 = arith.cmpi eq, %406, %426 : vector<10x256xi32>
    %cst_196 = arith.constant 1.000000e+01 : f32
    %428 = vector.broadcast %cst_196 : f32 to vector<10x256xf32>
    %429 = arith.mulf %428, %420 : vector<10x256xf32>
    %cst_197 = arith.constant 5.000000e+00 : f32
    %430 = vector.broadcast %cst_197 : f32 to vector<10x256xf32>
    %431 = arith.subf %429, %430 : vector<10x256xf32>
    %cst_198 = arith.constant 5.000000e+00 : f32
    %432 = vector.broadcast %cst_198 : f32 to vector<10x256xf32>
    %433 = arith.select %427, %432, %431 : vector<10x256xi1>, vector<10x256xf32>
    %434 = arith.subf %433, %425 : vector<10x256xf32>
    %cst_199 = arith.constant dense<0xFF800000> : vector<256xf32>
    %435 = vector.multi_reduction <maximumf>, %395, %cst_199 [0] : vector<10x256xf32> to vector<256xf32>
    %436 = vector.shape_cast %435 : vector<256xf32> to vector<1x256xf32>
    %437 = vector.broadcast %436 : vector<1x256xf32> to vector<10x256xf32>
    %438 = arith.subf %395, %437 : vector<10x256xf32>
    %439 = math.exp %438 : vector<10x256xf32>
    %cst_200 = arith.constant dense<0.000000e+00> : vector<256xf32>
    %440 = vector.multi_reduction <add>, %439, %cst_200 [0] : vector<10x256xf32> to vector<256xf32>
    %441 = vector.shape_cast %440 : vector<256xf32> to vector<1x256xf32>
    %442 = vector.broadcast %441 : vector<1x256xf32> to vector<10x256xf32>
    %443 = arith.divf %439, %442 : vector<10x256xf32>
    %cst_201 = arith.constant 9.900000e-01 : f32
    %444 = vector.broadcast %cst_201 : f32 to vector<10x256xf32>
    %445 = arith.mulf %444, %443 : vector<10x256xf32>
    %cst_202 = arith.constant 1.000000e-03 : f32
    %446 = vector.broadcast %cst_202 : f32 to vector<10x256xf32>
    %447 = arith.addf %446, %445 : vector<10x256xf32>
    %cst_203 = arith.constant dense<0.000000e+00> : vector<10x256xf32>
    %448 = tpu.matmul %384, %447, %cst_203 {dimension_numbers = #tpu.dot_dimension_numbers<[1], [0], [0], [1], [0, 0, 1, 1], [], []>} : vector<10x10xf32>, vector<10x256xf32>, vector<10x256xf32> -> vector<10x256xf32>
    %449 = arith.subf %448, %447 : vector<10x256xf32>
    %cst_204 = arith.constant 1.000000e+01 : f32
    %450 = vector.broadcast %cst_204 : f32 to vector<10x256xf32>
    %451 = arith.mulf %450, %449 : vector<10x256xf32>
    %cst_205 = arith.constant 5.000000e+00 : f32
    %452 = vector.broadcast %cst_205 : f32 to vector<10x256xf32>
    %453 = arith.subf %451, %452 : vector<10x256xf32>
    %c9_i32_206 = arith.constant 9 : i32
    %454 = vector.broadcast %c9_i32_206 : i32 to vector<10x256xi32>
    %455 = arith.cmpi eq, %406, %454 : vector<10x256xi32>
    %cst_207 = arith.constant 1.000000e+01 : f32
    %456 = vector.broadcast %cst_207 : f32 to vector<10x256xf32>
    %457 = arith.mulf %456, %448 : vector<10x256xf32>
    %cst_208 = arith.constant 5.000000e+00 : f32
    %458 = vector.broadcast %cst_208 : f32 to vector<10x256xf32>
    %459 = arith.subf %457, %458 : vector<10x256xf32>
    %cst_209 = arith.constant 5.000000e+00 : f32
    %460 = vector.broadcast %cst_209 : f32 to vector<10x256xf32>
    %461 = arith.select %455, %460, %459 : vector<10x256xi1>, vector<10x256xf32>
    %462 = arith.subf %461, %453 : vector<10x256xf32>
    %463 = vector.broadcast %405 : vector<1x256xf32> to vector<10x256xf32>
    %464 = arith.cmpf oge, %463, %425 : vector<10x256xf32>
    %465 = arith.extui %464 : vector<10x256xi1> to vector<10x256xi32>
    %cst_210 = arith.constant dense<0> : vector<256xi32>
    %466 = vector.multi_reduction <add>, %465, %cst_210 [0] : vector<10x256xi32> to vector<256xi32>
    %467 = vector.shape_cast %466 : vector<256xi32> to vector<1x256xi32>
    %c1_i32_211 = arith.constant 1 : i32
    %468 = vector.broadcast %c1_i32_211 : i32 to vector<1x256xi32>
    %469 = arith.subi %467, %468 : vector<1x256xi32>
    %c0_i32 = arith.constant 0 : i32
    %c9_i32_212 = arith.constant 9 : i32
    %470 = vector.broadcast %c0_i32 : i32 to vector<1x256xi32>
    %471 = arith.maxsi %470, %469 : vector<1x256xi32>
    %472 = vector.broadcast %c9_i32_212 : i32 to vector<1x256xi32>
    %473 = arith.minsi %472, %471 : vector<1x256xi32>
    %474 = vector.broadcast %473 : vector<1x256xi32> to vector<10x256xi32>
    %475 = arith.cmpi eq, %406, %474 : vector<10x256xi32>
    %cst_213 = arith.constant 0.000000e+00 : f32
    %476 = vector.broadcast %cst_213 : f32 to vector<10x256xf32>
    %477 = arith.select %475, %425, %476 : vector<10x256xi1>, vector<10x256xf32>
    %cst_214 = arith.constant dense<0.000000e+00> : vector<256xf32>
    %478 = vector.multi_reduction <add>, %477, %cst_214 [0] : vector<10x256xf32> to vector<256xf32>
    %479 = vector.shape_cast %478 : vector<256xf32> to vector<1x256xf32>
    %cst_215 = arith.constant 0.000000e+00 : f32
    %480 = vector.broadcast %cst_215 : f32 to vector<10x256xf32>
    %481 = arith.select %475, %434, %480 : vector<10x256xi1>, vector<10x256xf32>
    %cst_216 = arith.constant dense<0.000000e+00> : vector<256xf32>
    %482 = vector.multi_reduction <add>, %481, %cst_216 [0] : vector<10x256xf32> to vector<256xf32>
    %483 = vector.shape_cast %482 : vector<256xf32> to vector<1x256xf32>
    %cst_217 = arith.constant 0.000000e+00 : f32
    %484 = vector.broadcast %cst_217 : f32 to vector<10x256xf32>
    %485 = arith.select %475, %453, %484 : vector<10x256xi1>, vector<10x256xf32>
    %cst_218 = arith.constant dense<0.000000e+00> : vector<256xf32>
    %486 = vector.multi_reduction <add>, %485, %cst_218 [0] : vector<10x256xf32> to vector<256xf32>
    %487 = vector.shape_cast %486 : vector<256xf32> to vector<1x256xf32>
    %cst_219 = arith.constant 0.000000e+00 : f32
    %488 = vector.broadcast %cst_219 : f32 to vector<10x256xf32>
    %489 = arith.select %475, %462, %488 : vector<10x256xi1>, vector<10x256xf32>
    %cst_220 = arith.constant dense<0.000000e+00> : vector<256xf32>
    %490 = vector.multi_reduction <add>, %489, %cst_220 [0] : vector<10x256xf32> to vector<256xf32>
    %491 = vector.shape_cast %490 : vector<256xf32> to vector<1x256xf32>
    %492 = arith.divf %491, %483 : vector<1x256xf32>
    %cst_221 = arith.constant 2.000000e+01 : f32
    %493 = vector.broadcast %cst_221 : f32 to vector<9x256xf32>
    %494 = arith.cmpf ogt, %396, %493 : vector<9x256xf32>
    %cst_222 = arith.constant 2.000000e+01 : f32
    %495 = vector.broadcast %cst_222 : f32 to vector<9x256xf32>
    %496 = arith.minimumf %396, %495 : vector<9x256xf32>
    %497 = math.exp %496 : vector<9x256xf32>
    %cst_223 = arith.constant 1.000000e+00 : f32
    %498 = vector.broadcast %cst_223 : f32 to vector<9x256xf32>
    %499 = arith.addf %498, %497 : vector<9x256xf32>
    %500 = math.log %499 : vector<9x256xf32>
    %501 = arith.select %494, %396, %500 : vector<9x256xi1>, vector<9x256xf32>
    %cst_224 = arith.constant 1.000000e-03 : f32
    %502 = vector.broadcast %cst_224 : f32 to vector<9x256xf32>
    %503 = arith.addf %502, %501 : vector<9x256xf32>
    %504 = tpu.iota {dimensions = array<i32: 0>} : vector<9x256xi32>
    %c0_i32_225 = arith.constant 0 : i32
    %505 = vector.broadcast %c0_i32_225 : i32 to vector<1x256xi32>
    %506 = arith.cmpi eq, %473, %505 : vector<1x256xi32>
    %c1_i32_226 = arith.constant 1 : i32
    %507 = vector.broadcast %c1_i32_226 : i32 to vector<1x256xi32>
    %508 = arith.subi %473, %507 : vector<1x256xi32>
    %509 = vector.broadcast %508 : vector<1x256xi32> to vector<9x256xi32>
    %510 = arith.cmpi eq, %504, %509 : vector<9x256xi32>
    %cst_227 = arith.constant 0.000000e+00 : f32
    %511 = vector.broadcast %cst_227 : f32 to vector<9x256xf32>
    %512 = arith.select %510, %503, %511 : vector<9x256xi1>, vector<9x256xf32>
    %cst_228 = arith.constant dense<0.000000e+00> : vector<256xf32>
    %513 = vector.multi_reduction <add>, %512, %cst_228 [0] : vector<9x256xf32> to vector<256xf32>
    %514 = vector.shape_cast %513 : vector<256xf32> to vector<1x256xf32>
    %cst_229 = arith.constant 1.000000e+00 : f32
    %515 = vector.broadcast %cst_229 : f32 to vector<1x256xf32>
    %516 = arith.select %506, %515, %514 : vector<1x256xi1>, vector<1x256xf32>
    %c9_i32_230 = arith.constant 9 : i32
    %517 = vector.broadcast %c9_i32_230 : i32 to vector<1x256xi32>
    %518 = arith.cmpi eq, %473, %517 : vector<1x256xi32>
    %519 = vector.broadcast %473 : vector<1x256xi32> to vector<9x256xi32>
    %520 = arith.cmpi eq, %504, %519 : vector<9x256xi32>
    %cst_231 = arith.constant 0.000000e+00 : f32
    %521 = vector.broadcast %cst_231 : f32 to vector<9x256xf32>
    %522 = arith.select %520, %503, %521 : vector<9x256xi1>, vector<9x256xf32>
    %cst_232 = arith.constant dense<0.000000e+00> : vector<256xf32>
    %523 = vector.multi_reduction <add>, %522, %cst_232 [0] : vector<9x256xf32> to vector<256xf32>
    %524 = vector.shape_cast %523 : vector<256xf32> to vector<1x256xf32>
    %cst_233 = arith.constant 1.000000e+00 : f32
    %525 = vector.broadcast %cst_233 : f32 to vector<1x256xf32>
    %526 = arith.select %518, %525, %524 : vector<1x256xi1>, vector<1x256xf32>
    %527 = arith.subf %405, %479 : vector<1x256xf32>
    %528 = arith.divf %527, %483 : vector<1x256xf32>
    %cst_234 = arith.constant 1.000000e+00 : f32
    %529 = vector.broadcast %cst_234 : f32 to vector<1x256xf32>
    %530 = arith.subf %529, %528 : vector<1x256xf32>
    %531 = arith.mulf %528, %530 : vector<1x256xf32>
    %532 = arith.mulf %492, %528 : vector<1x256xf32>
    %533 = arith.mulf %532, %528 : vector<1x256xf32>
    %534 = arith.mulf %516, %531 : vector<1x256xf32>
    %535 = arith.addf %533, %534 : vector<1x256xf32>
    %536 = arith.mulf %491, %535 : vector<1x256xf32>
    %537 = arith.addf %516, %526 : vector<1x256xf32>
    %cst_235 = arith.constant 2.000000e+00 : f32
    %538 = vector.broadcast %cst_235 : f32 to vector<1x256xf32>
    %539 = arith.mulf %538, %492 : vector<1x256xf32>
    %540 = arith.subf %537, %539 : vector<1x256xf32>
    %541 = arith.mulf %540, %531 : vector<1x256xf32>
    %542 = arith.addf %492, %541 : vector<1x256xf32>
    %543 = arith.divf %536, %542 : vector<1x256xf32>
    %544 = arith.addf %487, %543 : vector<1x256xf32>
    %545 = arith.mulf %492, %492 : vector<1x256xf32>
    %546 = arith.mulf %526, %528 : vector<1x256xf32>
    %547 = arith.mulf %546, %528 : vector<1x256xf32>
    %cst_236 = arith.constant 2.000000e+00 : f32
    %548 = vector.broadcast %cst_236 : f32 to vector<1x256xf32>
    %549 = arith.mulf %548, %492 : vector<1x256xf32>
    %550 = arith.mulf %549, %531 : vector<1x256xf32>
    %551 = arith.addf %547, %550 : vector<1x256xf32>
    %cst_237 = arith.constant 1.000000e+00 : f32
    %552 = vector.broadcast %cst_237 : f32 to vector<1x256xf32>
    %553 = arith.subf %552, %528 : vector<1x256xf32>
    %554 = arith.mulf %516, %553 : vector<1x256xf32>
    %cst_238 = arith.constant 1.000000e+00 : f32
    %555 = vector.broadcast %cst_238 : f32 to vector<1x256xf32>
    %556 = arith.subf %555, %528 : vector<1x256xf32>
    %557 = arith.mulf %554, %556 : vector<1x256xf32>
    %558 = arith.addf %551, %557 : vector<1x256xf32>
    %559 = arith.mulf %545, %558 : vector<1x256xf32>
    %cst_239 = arith.constant 1.000000e+00 : f32
    %560 = vector.broadcast %cst_239 : f32 to vector<1x256xf32>
    %561 = arith.divf %560, %542 : vector<1x256xf32>
    %562 = arith.mulf %559, %561 : vector<1x256xf32>
    %563 = arith.mulf %562, %561 : vector<1x256xf32>
    %564 = math.log %563 : vector<1x256xf32>
    %565 = arith.select %401, %544, %390 : vector<1x256xi1>, vector<1x256xf32>
    %cst_240 = arith.constant 0.000000e+00 : f32
    %566 = vector.broadcast %cst_240 : f32 to vector<1x256xf32>
    %567 = arith.select %401, %564, %566 : vector<1x256xi1>, vector<1x256xf32>
    %568 = vector.extract_strided_slice %565 {offsets = [0, 0], sizes = [1, 128], strides = [1, 1]} : vector<1x256xf32> to vector<1x128xf32>
    %569 = vector.extract_strided_slice %565 {offsets = [0, 128], sizes = [1, 128], strides = [1, 1]} : vector<1x256xf32> to vector<1x128xf32>
    %570 = tpu.concatenate %568, %569 in 0 : vector<1x128xf32>, vector<1x128xf32> -> vector<2x128xf32>
    %571 = vector.extract_strided_slice %567 {offsets = [0, 0], sizes = [1, 128], strides = [1, 1]} : vector<1x256xf32> to vector<1x128xf32>
    %572 = vector.extract_strided_slice %567 {offsets = [0, 128], sizes = [1, 128], strides = [1, 1]} : vector<1x256xf32> to vector<1x128xf32>
    %573 = arith.addf %571, %572 : vector<1x128xf32>
    %574 = vector.broadcast %3 : vector<1x128xf32> to vector<2x128xf32>
    %575 = arith.mulf %4, %574 : vector<2x128xf32>
    %c0_241 = arith.constant 0 : index
    %c0_242 = arith.constant 0 : index
    %c0_243 = arith.constant 0 : index
    %576 = vector.load %arg15[%c0_241, %c0_242, %c0_243] : memref<1x4x128xf32, #tpu.memory_space<vmem>>, vector<1x2x128xf32>
    %577 = vector.shape_cast %576 : vector<1x2x128xf32> to vector<2x128xf32>
    %578 = vector.shape_cast %575 : vector<2x128xf32> to vector<1x2x128xf32>
    tpu.vector_store %arg15[%c0_241, %c0_242, %c0_243], %578 {strides = array<i32>} : memref<1x4x128xf32, #tpu.memory_space<vmem>>, vector<1x2x128xf32>,
    %579 = vector.broadcast %3 : vector<1x128xf32> to vector<2x128xf32>
    %580 = arith.mulf %570, %579 : vector<2x128xf32>
    %c0_244 = arith.constant 0 : index
    %c2_245 = arith.constant 2 : index
    %c0_246 = arith.constant 0 : index
    %581 = vector.load %arg15[%c0_244, %c2_245, %c0_246] : memref<1x4x128xf32, #tpu.memory_space<vmem>>, vector<1x2x128xf32>
    %582 = vector.shape_cast %581 : vector<1x2x128xf32> to vector<2x128xf32>
    %583 = vector.shape_cast %580 : vector<2x128xf32> to vector<1x2x128xf32>
    tpu.vector_store %arg15[%c0_244, %c2_245, %c0_246], %583 {strides = array<i32>} : memref<1x4x128xf32, #tpu.memory_space<vmem>>, vector<1x2x128xf32>,
    %584 = arith.mulf %573, %3 : vector<1x128xf32>
    %cst_247 = arith.constant dense<0.000000e+00> : vector<1xf32>
    %585 = vector.multi_reduction <add>, %584, %cst_247 [1] : vector<1x128xf32> to vector<1xf32>
    %586 = vector.shape_cast %585 : vector<1xf32> to vector<1x1xf32>
    %c0_248 = arith.constant 0 : index
    %c0_249 = arith.constant 0 : index
    %c0_250 = arith.constant 0 : index
    %587 = vector.load %arg16[%c0_248, %c0_249, %c0_250] : memref<1x1x1xf32, #tpu.memory_space<vmem>>, vector<1x1x1xf32>
    %588 = vector.shape_cast %587 : vector<1x1x1xf32> to vector<1x1xf32>
    %589 = vector.shape_cast %586 : vector<1x1xf32> to vector<1x1x1xf32>
    tpu.vector_store %arg16[%c0_248, %c0_249, %c0_250], %589 {strides = array<i32>} : memref<1x1x1xf32, #tpu.memory_space<vmem>>, vector<1x1x1xf32>,
    return
  }
  func.func @transform_0(%arg0: i32) -> (i32, i32, i32) {
    %c0_i32 = arith.constant 0 : i32
    %c0_i32_0 = arith.constant 0 : i32
    %c0_i32_1 = arith.constant 0 : i32
    return %arg0, %c0_i32, %c0_i32_0 : i32, i32, i32
  }
  func.func @transform_1(%arg0: i32) -> (i32, i32, i32) {
    %c0_i32 = arith.constant 0 : i32
    %c0_i32_0 = arith.constant 0 : i32
    %c0_i32_1 = arith.constant 0 : i32
    return %arg0, %c0_i32, %c0_i32_0 : i32, i32, i32
  }
  func.func @transform_2(%arg0: i32) -> (i32, i32, i32) {
    %c0_i32 = arith.constant 0 : i32
    %c0_i32_0 = arith.constant 0 : i32
    %c0_i32_1 = arith.constant 0 : i32
    %c0_i32_2 = arith.constant 0 : i32
    return %c0_i32, %c0_i32_0, %c0_i32_1 : i32, i32, i32
  }
  func.func @transform_3(%arg0: i32) -> (i32, i32) {
    %c0_i32 = arith.constant 0 : i32
    %c0_i32_0 = arith.constant 0 : i32
    %c0_i32_1 = arith.constant 0 : i32
    return %c0_i32, %c0_i32_0 : i32, i32
  }
  func.func @transform_4(%arg0: i32) -> (i32, i32, i32, i32) {
    %c0_i32 = arith.constant 0 : i32
    %c0_i32_0 = arith.constant 0 : i32
    %c0_i32_1 = arith.constant 0 : i32
    %c0_i32_2 = arith.constant 0 : i32
    %c0_i32_3 = arith.constant 0 : i32
    return %c0_i32, %c0_i32_0, %c0_i32_1, %c0_i32_2 : i32, i32, i32, i32
  }
  func.func @transform_5(%arg0: i32) -> (i32, i32, i32) {
    %c0_i32 = arith.constant 0 : i32
    %c0_i32_0 = arith.constant 0 : i32
    %c0_i32_1 = arith.constant 0 : i32
    %c0_i32_2 = arith.constant 0 : i32
    return %c0_i32, %c0_i32_0, %c0_i32_1 : i32, i32, i32
  }
  func.func @transform_6(%arg0: i32) -> (i32, i32, i32) {
    %c0_i32 = arith.constant 0 : i32
    %c0_i32_0 = arith.constant 0 : i32
    %c0_i32_1 = arith.constant 0 : i32
    %c0_i32_2 = arith.constant 0 : i32
    return %c0_i32, %c0_i32_0, %c0_i32_1 : i32, i32, i32
  }
  func.func @transform_7(%arg0: i32) -> (i32, i32, i32) {
    %c0_i32 = arith.constant 0 : i32
    %c0_i32_0 = arith.constant 0 : i32
    %c0_i32_1 = arith.constant 0 : i32
    %c0_i32_2 = arith.constant 0 : i32
    return %c0_i32, %c0_i32_0, %c0_i32_1 : i32, i32, i32
  }
  func.func @transform_8(%arg0: i32) -> (i32, i32, i32) {
    %c0_i32 = arith.constant 0 : i32
    %c0_i32_0 = arith.constant 0 : i32
    %c0_i32_1 = arith.constant 0 : i32
    %c0_i32_2 = arith.constant 0 : i32
    return %c0_i32, %c0_i32_0, %c0_i32_1 : i32, i32, i32
  }
  func.func @transform_9(%arg0: i32) -> (i32, i32, i32) {
    %c0_i32 = arith.constant 0 : i32
    %c0_i32_0 = arith.constant 0 : i32
    %c0_i32_1 = arith.constant 0 : i32
    %c0_i32_2 = arith.constant 0 : i32
    return %c0_i32, %c0_i32_0, %c0_i32_1 : i32, i32, i32
  }
  func.func @transform_10(%arg0: i32) -> (i32, i32, i32) {
    %c0_i32 = arith.constant 0 : i32
    %c0_i32_0 = arith.constant 0 : i32
    %c0_i32_1 = arith.constant 0 : i32
    %c0_i32_2 = arith.constant 0 : i32
    return %c0_i32, %c0_i32_0, %c0_i32_1 : i32, i32, i32
  }
  func.func @transform_11(%arg0: i32) -> (i32, i32, i32) {
    %c0_i32 = arith.constant 0 : i32
    %c0_i32_0 = arith.constant 0 : i32
    %c0_i32_1 = arith.constant 0 : i32
    %c0_i32_2 = arith.constant 0 : i32
    return %c0_i32, %c0_i32_0, %c0_i32_1 : i32, i32, i32
  }
  func.func @transform_12(%arg0: i32) -> (i32, i32) {
    %c0_i32 = arith.constant 0 : i32
    %c0_i32_0 = arith.constant 0 : i32
    %c0_i32_1 = arith.constant 0 : i32
    return %c0_i32, %c0_i32_0 : i32, i32
  }
  func.func @transform_13(%arg0: i32) -> (i32, i32) {
    %c0_i32 = arith.constant 0 : i32
    %c0_i32_0 = arith.constant 0 : i32
    %c0_i32_1 = arith.constant 0 : i32
    return %c0_i32, %c0_i32_0 : i32, i32
  }
  func.func @transform_14(%arg0: i32) -> (i32, i32, i32) {
    %c0_i32 = arith.constant 0 : i32
    %c0_i32_0 = arith.constant 0 : i32
    %c0_i32_1 = arith.constant 0 : i32
    return %arg0, %c0_i32, %c0_i32_0 : i32, i32, i32
  }
  func.func @transform_15(%arg0: i32) -> (i32, i32, i32) {
    %c0_i32 = arith.constant 0 : i32
    %c0_i32_0 = arith.constant 0 : i32
    %c0_i32_1 = arith.constant 0 : i32
    return %arg0, %c0_i32, %c0_i32_0 : i32, i32, i32
  }
}

</mosaic_0001>

<bundles_post_ra>
// kernel: conv_flow_forward.1
= control target key start
LH: loop header
LB: loop body
LE: loop exit
PB: predicated region body
PF: predicated region fallthrough
CT: control target
= control target key end

     0   :  { %s5043_s0 = inlined_call_operand.vmem [shape: f32[2,4,128], index: 0, kind: input, shape index: {}]   ;;  %s5044_s1 = inlined_call_operand.vmem [shape: f32[2,1,128], index: 1, kind: input, shape index: {}]   ;;  %s5045_s2 = inlined_call_operand.vmem [shape: f32[2,32,1], index: 2, kind: input, shape index: {}]   ;;  %s5046_s3 = inlined_call_operand.vmem [shape: f32[32,1], index: 3, kind: input, shape index: {}]   ;;  %s5047_s4 = inlined_call_operand.vmem [shape: f32[3,3,32,1], index: 4, kind: input, shape index: {}]   ;;  %s5048_s5 = inlined_call_operand.vmem [shape: f32[3,32,1], index: 5, kind: input, shape index: {}]   ;;  %s5049_s6 = inlined_call_operand.vmem [shape: f32[3,32,32], index: 6, kind: input, shape index: {}]   ;;  %s5050_s7 = inlined_call_operand.vmem [shape: f32[3,32,1], index: 7, kind: input, shape index: {}]   ;;  %s5051_s8 = inlined_call_operand.vmem [shape: f32[3,32,1], index: 8, kind: input, shape index: {}]   ;;  %s5052_s9 = inlined_call_operand.vmem [shape: f32[3,32,1], index: 9, kind: input, shape index: {}]   ;;  %s5053_s10 = inlined_call_operand.vmem [shape: f32[3,32,1], index: 10, kind: input, shape index: {}]   ;;  %s5054_s11 = inlined_call_operand.vmem [shape: f32[3,32,1], index: 11, kind: input, shape index: {}]   ;;  %s5055_s12 = inlined_call_operand.vmem [shape: f32[58,32], index: 12, kind: input, shape index: {}]   ;;  %s5056_s13 = inlined_call_operand.vmem [shape: f32[58,1], index: 13, kind: input, shape index: {}]   ;;  %s5057_s14 = inlined_call_operand.hbm [shape: f32[2,4,128], index: 14, kind: output, shape index: {0}]   ;;  %s5058_s15 = inlined_call_operand.vmem [shape: f32[2,1,1], index: 15, kind: output, shape index: {1}]  }
   0x1   :  { %5063 = sst [smem:[#allocation9_spill]] %s5043_s0 }
   0x2   :  { %5064 = sst [smem:[#allocation10_spill]] %s5044_s1 }
   0x3   :  { %5065 = sst [smem:[#allocation11_spill]] %s5045_s2 }
   0x4   :  { %21 = vsyncpa [#allocation3], 0 }
   0x5   :  { %23 = vsyncpa [#allocation3 + $0x1], 0  ;;  %s3905_s18 = smov 0   ;;  %s3907_s19 = smov 0  }
   0x6   :  { %s3909_s20 = smov 0   ;;  %s3911_s21 = smov 0  }
   0x7 LB: > { %5066 = sst [smem:[#allocation5_spill]] %s3809_s20  ;;  %s3926_s22 = sadd.s32 4294967295, %s3813_s21   ;;  %s3813_s21 = sphi %s3911_s21, %s5090_s21   ;;  %s3809_s20 = sphi %s3909_s20, %s5092_s20   ;;  %s3805_s19 = sphi %s3907_s19, %s5094_s19   ;;  %s3801_s18 = sphi %s3905_s18, %s5093_s18  }
   0x8   : > { %s3287_s23 = sadd.s32 4294967294, %s3813_s21   ;;  %s3930_s24 = sadd.s32 1, %s3813_s21  }
   0x9   : > { %5067 = sst [smem:[#allocation6_spill]] %s3930_s24  ;;  %s340_s25 = sadd.s32 1, %s3809_s20 }
   0xa   : > { %s337_s26 = ssub.s32 %s3813_s21, %s3930_s24  ;;  %p350_p0 = scmp.ne.s32.totalorder %s3809_s20, %s3805_s19 }
   0xb   : > { %p338_p1 = scmp.eq.s32.totalorder %s337_s26, 0  ;;  %p351_p2 = scmp.eq.s32.totalorder %s3926_s22, 1 }
   0xc   : > { %p356_p3 = scmp.ne.s32.totalorder %s3805_s19, %s3801_s18  ;;  %p357_p4 = scmp.eq.s32.totalorder %s3287_s23, 1 }
   0xd   : > { %s3941_s27 = scalar_select %p338_p1, %s3809_s20, %s340_s25  }
   0xe   : > { %p3943_p5 = por %p351_p2, %p350_p0  ;;  %p3947_p6 = por %p357_p4, %p356_p3 }
   0xf   : > { %5068 = sst [smem:[#allocation7_spill]] %s3941_s27  ;;  %p3290_p7 = scmp.ge.s32.totalorder %s3813_s21, 1 }
  0x10   : > { %s5070_s29 = scalar_select %p3947_p6, 1, 0 }
  0x11   : > { %p450_p8 = scmp.lt.s32.totalorder %s3813_s21, 3 }
  0x12   : > { %5071 = sst [smem:[#allocation8_spill]] %s5070_s29 }
  0x13   : > { %p451_p9 = pnand %p3290_p7, %p450_p8 }
  0x14   : > { %s5072_s2 = sld [smem:[#allocation11_spill]] (!%p451_p9)  ;;  %v3815_v2 = vmov (!%p451_p9), 0   ;;  %v585_v9 = vld [vmem:[%s5046_s3 + $0x8] sm:$0xff] (!%p451_p9)  ;;  %v584_v10 = vld [vmem:[%s5046_s3] sm:$0xff] (!%p451_p9)  ;;  %v587_v11 = vld [vmem:[%s5046_s3 + $0x18] sm:$0xff] (!%p451_p9)  ;;  %p503_p10 = scmp.lt.s32.totalorder (!%p451_p9), %s3926_s22, 1  ;;  %v539_v28 = vlaneseq (!%p451_p9) }
  0x15   : > { %454 = sbr.rel (%p451_p9) target bundleno = 2604 (0xa2c), region = 76  ;;  %3635 = vset.pattern.permute.xlu1 (!%p451_p9), %v3815_v2  ;;  %3634 = vset.pattern.permute.xlu0 (!%p451_p9), %v3815_v2  ;;  %v586_v12 = vld [vmem:[%s5046_s3 + $0x10] sm:$0xff] (!%p451_p9)  ;;  %v3299_v13 = vld [vmem:[%s5047_s4 + $0x28] sm:$0xff] (!%p451_p9)  ;;  %v3298_v14 = vld [vmem:[%s5047_s4 + $0x20] sm:$0xff] (!%p451_p9)  ;;  %s5073_s0 = sld [smem:[#allocation9_spill]] (!%p451_p9)  ;;  %vm927_vm0 = vcmask (!%p451_p9), 261120  }
  0x16   : > { %v667_v15 = vld [vmem:[%s5047_s4 + $0x8] sm:$0xff] (!%p451_p9)  ;;  %v666_v16 = vld [vmem:[%s5047_s4] sm:$0xff] (!%p451_p9)  ;;  %v668_v17 = vld [vmem:[%s5047_s4 + $0x10] sm:$0xff] (!%p451_p9)  ;;  %v4042_v29 = vshrl.u32 (!%p451_p9), %v539_v28, 7  ;;  %s5074_s1 = sld [smem:[#allocation10_spill]] (!%p451_p9)  ;;  %s3816_s24 = smov (!%p451_p9), 1  }
  0x17   : > { %v3300_v18 = vld [vmem:[%s5047_s4 + $0x30] sm:$0xff] (!%p451_p9)  ;;  %v3303_v19 = vld [vmem:[%s5047_s4 + $0x48] sm:$0xff] (!%p451_p9)  ;;  %v3302_v20 = vld [vmem:[%s5047_s4 + $0x40] sm:$0xff] (!%p451_p9)  ;;  %s3817_s29 = smov (!%p451_p9), 127   ;;  %s3819_s20 = smov (!%p451_p9), 125   ;;  %vm2481_vm7 = vcmask (!%p451_p9), 1041408  }
  0x18   : > { %v669_v21 = vld [vmem:[%s5047_s4 + $0x18] sm:$0xff] (!%p451_p9)  ;;  %v3304_v24 = vld [vmem:[%s5047_s4 + $0x50] sm:$0xff] (!%p451_p9)  ;;  %v745_v25 = vld [vmem:[%s5048_s5 + $0x8] sm:$0xff] (!%p451_p9)  ;;  %v574_v32 = vsub.s32 (!%p451_p9), 1, %v4042_v29  ;;  %v541_v33 = vsub.s32 (!%p451_p9), 0, %v4042_v29  ;;  %s3820_s27 = smov (!%p451_p9), 9  }
  0x19   : > { %v3301_v22 = vld [vmem:[%s5047_s4 + $0x38] sm:$0xff] (!%p451_p9)  ;;  %v744_v26 = vld [vmem:[%s5048_s5] sm:$0xff] (!%p451_p9)  ;;  %v746_v27 = vld [vmem:[%s5048_s5 + $0x10] sm:$0xff] (!%p451_p9)  ;;  %s3821_s16 = smov (!%p451_p9), 119   ;;  %vm2660_vm8 = vcmask (!%p451_p9), 1047554   ;;  %vm2662_vm9 = vcmask (!%p451_p9), 1043456  }
  0x1a   : > { %v3293_v0 = vld [vmem:[%s5072_s2 + $0x20] sm:$0xff] (!%p451_p9)  ;;  %v3294_v3 = vld [vmem:[%s5072_s2 + $0x28] sm:$0xff] (!%p451_p9)  ;;  %v3295_v5 = vld [vmem:[%s5072_s2 + $0x30] sm:$0xff] (!%p451_p9)  ;;  %vm2448_vm10 = vcmask (!%p451_p9), 1042432   ;;  %vm2696_vm11 = vcmask (!%p451_p9), 1045504  }
  0x1b   : > { %v515_v1 = vld [vmem:[%s5072_s2] sm:$0xff] (!%p451_p9)  ;;  %554 = vperm.xlu1 (!%p451_p9), %3635, %v3293_v0   ;;  %v516_v4 = vld [vmem:[%s5072_s2 + $0x8] sm:$0xff] (!%p451_p9)  ;;  %v517_v6 = vld [vmem:[%s5072_s2 + $0x10] sm:$0xff] (!%p451_p9) }
  0x1c   : > { %521 = vperm.xlu0 %3634, %v515_v1   ;;  %v3296_v7 = vld [vmem:[%s5072_s2 + $0x38] sm:$0xff]  ;;  %s4038_s25 = scalar_select %p503_p10, %s3926_s22, 1 }
  0x1d   : > { %v518_v8 = vld [vmem:[%s5072_s2 + $0x18] sm:$0xff] }
  0x1e   : > { %v3305_v23 = vld [vmem:[%s5047_s4 + $0x58] sm:$0xff]  ;;  %s3292_s26 = sshll.u32 %s4038_s25, 2  ;;  %s4056_s23 = scalar_lea.vmem %s5074_s1, %s4038_s25 }
  0x1f   : > { %559 = vperm.xlu1 %3635, %v3294_v3   ;;  %s4047_s30 = scalar_lea.vmem %s5073_s0, %s3292_s26  ;;  %v4059_v51 = vld [vmem:[%s4056_s23] ss:$0 sm:$0xff]  ;;  %s3818_s26 = smov 3  }
  0x20   : > { %526 = vperm.xlu0 %3634, %v516_v4   ;;  %v513_v34 = vld [vmem:[%s4047_s30] sm:$0xf]  ;;  %s3824_s0 = smov [#allocation2]  }
  0x21   : > { %v575_v37 = vrot.slane %v513_v34, %v574_v32  ;;  %v542_v38 = vrot.slane %v513_v34, %v541_v33  ;;  %v3316_v32 = vld [vmem:[%s5047_s4 + $0x70] sm:$0xff]  ;;  %v3319_v34 = vld [vmem:[%s5047_s4 + $0xa8] sm:$0xff]  ;;  %s3755_s17 = sshll.u32 %s3824_s0, 4  ;;  %s3756_s17 = int_to_ptr.vmem [resolvable:$false] %s3755_s17 }
  0x22   : > { %v3312_v33 = vld [vmem:[%s5047_s4 + $0x90] sm:$0xff] }
  0x23   : > { %564 = vperm.xlu1 %3635, %v3295_v5   ;;  %v747_v5 = vld [vmem:[%s5048_s5 + $0x18] sm:$0xff] }
  0x24   : > { %531 = vperm.xlu0 %3634, %v517_v6   ;;  %v773_v6 = vld [vmem:[%s5051_s8 + $0x8] sm:$0xff] }
  0x27   : > { %569 = vperm.xlu1 %3635, %v3296_v7   ;;  %v772_v7 = vld [vmem:[%s5051_s8] sm:$0xff] }
  0x28   : > { %536 = vperm.xlu0 %3634, %v518_v8   ;;  %v777_v8 = vld [vmem:[%s5052_s9 + $0x8] sm:$0xff] }
  0x2b   : > { %595 = vperm.xlu1 %3635, %v585_v9   ;;  %v776_v9 = vld [vmem:[%s5052_s9] sm:$0xff] }
  0x2c   : > { %590 = vperm.xlu0 %3634, %v584_v10   ;;  %v775_v10 = vld [vmem:[%s5051_s8 + $0x18] sm:$0xff] }
  0x2f   : > { %605 = vperm.xlu1 %3635, %v587_v11   ;;  %v774_v11 = vld [vmem:[%s5051_s8 + $0x10] sm:$0xff] }
  0x30   : > { %600 = vperm.xlu0 %3634, %v586_v12   ;;  %v779_v12 = vld [vmem:[%s5052_s9 + $0x18] sm:$0xff] }
  0x33   : > { %636 = vperm.xlu1 %3635, %v3299_v13   ;;  %v778_v13 = vld [vmem:[%s5052_s9 + $0x10] sm:$0xff] }
  0x34   : > { %631 = vperm.xlu0 %3634, %v3298_v14   ;;  %v904_v14 = vld [vmem:[%s5050_s7 + $0x8] sm:$0xff] }
  0x37   : > { %677 = vperm.xlu1 %3635, %v667_v15   ;;  %v903_v15 = vld [vmem:[%s5050_s7] sm:$0xff] }
  0x38   : > { %672 = vperm.xlu0 %3634, %v666_v16   ;;  %v906_v16 = vld [vmem:[%s5050_s7 + $0x18] sm:$0xff] }
  0x3b   : > { %682 = vperm.xlu1 %3635, %v668_v17   ;;  %v905_v17 = vld [vmem:[%s5050_s7 + $0x10] sm:$0xff] }
  0x3c   : > { %641 = vperm.xlu0 %3634, %v3300_v18   ;;  %v1026_v18 = vld [vmem:[%s5053_s10 + $0x8] sm:$0xff] }
  0x3f   : > { %723 = vperm.xlu1 %3635, %v3303_v19   ;;  %v1025_v19 = vld [vmem:[%s5053_s10] sm:$0xff] }
  0x40   : > { %718 = vperm.xlu0 %3634, %v3302_v20   ;;  %v1029_v20 = vld [vmem:[%s5054_s11] sm:$0xff] }
  0x43   : > { %687 = vperm.xlu1 %3635, %v669_v21   ;;  %v1027_v21 = vld [vmem:[%s5053_s10 + $0x10] sm:$0xff] }
  0x44   : > { %646 = vperm.xlu0 %3634, %v3301_v22   ;;  %v1028_v22 = vld [vmem:[%s5053_s10 + $0x18] sm:$0xff] }
  0x47   : > { %733 = vperm.xlu1 %3635, %v3305_v23   ;;  %v1030_v23 = vld [vmem:[%s5054_s11 + $0x8] sm:$0xff] }
  0x48   : > { %728 = vperm.xlu0 %3634, %v3304_v24   ;;  %v1032_v24 = vld [vmem:[%s5054_s11 + $0x18] sm:$0xff] }
  0x4b   : > { %755 = vperm.xlu1 %3635, %v745_v25   ;;  %v1031_v25 = vld [vmem:[%s5054_s11 + $0x10] sm:$0xff] }
  0x4c   : > { %750 = vperm.xlu0 %3634, %v744_v26   ;;  %v3311_v26 = vld [vmem:[%s5047_s4 + $0x88] sm:$0xff] }
  0x4f   : > { %760 = vperm.xlu1 %3635, %v746_v27   ;;  %v3310_v27 = vld [vmem:[%s5047_s4 + $0x80] sm:$0xff] }
  0x9a   : > { %v555_v30 = vpop.permute.xlu1 %554 }
  0x9b   : > { %v522_v31 = vpop.permute.xlu0 %521  ;;  %v576_v41 = vmul.f32 %v575_v37, %v555_v30  ;;  %v3315_v30 = vld [vmem:[%s5047_s4 + $0x68] sm:$0xff] }
  0x9c   : > { %v543_v42 = vmul.f32 %v542_v38, %v522_v31  ;;  %v3314_v31 = vld [vmem:[%s5047_s4 + $0x60] sm:$0xff] }
  0x9e   : > { %v560_v35 = vpop.permute.xlu1 %559  ;;  %v580_v50 = vadd.f32 %v576_v41, %v543_v42  ;;  %v3320_v42 = vld [vmem:[%s5047_s4 + $0xb0] sm:$0xff] }
  0x9f   : > { %v527_v36 = vpop.permute.xlu0 %526  ;;  %v577_v43 = vmul.f32 %v575_v37, %v560_v35 }
  0xa0   : > { %v544_v44 = vmul.f32 %v542_v38, %v527_v36  ;;  %v3318_v36 = vld [vmem:[%s5047_s4 + $0xa0] sm:$0xff] }
  0xa2   : > { %v565_v39 = vpop.permute.xlu1 %564  ;;  %v581_v49 = vadd.f32 %v577_v43, %v544_v44  ;;  %v3323_v43 = vld [vmem:[%s5048_s5 + $0x28] sm:$0xff] }
  0xa3   : > { %v532_v40 = vpop.permute.xlu0 %531  ;;  %v578_v47 = vmul.f32 %v575_v37, %v565_v39  ;;  %v3321_v39 = vld [vmem:[%s5047_s4 + $0xb8] sm:$0xff] }
  0xa4   : > { %v545_v48 = vmul.f32 %v542_v38, %v532_v40 }
  0xa6   : > { %v570_v45 = vpop.permute.xlu1 %569  ;;  %v582_v58 = vadd.f32 %v578_v47, %v545_v48  ;;  %v3324_v47 = vld [vmem:[%s5048_s5 + $0x30] sm:$0xff] }
  0xa7   : > { %v537_v46 = vpop.permute.xlu0 %536  ;;  %v579_v60 = vmul.f32 %v575_v37, %v570_v45  ;;  %v3317_v37 = vld [vmem:[%s5047_s4 + $0x78] sm:$0xff] }
  0xa8   : > { %v546_v61 = vmul.f32 %v542_v38, %v537_v46  ;;  %v3313_v38 = vld [vmem:[%s5047_s4 + $0x98] sm:$0xff]  ;;  %v3322_v46 = vld [vmem:[%s5048_s5 + $0x20] sm:$0xff] }
  0xaa   : > { %v596_v52 = vpop.permute.xlu1 %595  ;;  %v583_v1 = vadd.f32 %v579_v60, %v546_v61  ;;  %v4202_v61 = vand.u32 127, %v539_v28 }
  0xab   : > { %v591_v53 = vpop.permute.xlu0 %590  ;;  %v4061_v54 = vadd.f32 %v596_v52, %v581_v49 }
  0xac   : > { %v4063_v55 = vadd.f32 %v591_v53, %v580_v50  ;;  %vm661_vm1 = vcmp.ge.s32.totalorder %v4202_v61, 1  ;;  %vm706_vm2 = vcmp.lt.s32.totalorder %v4202_v61, 127  ;;  %vm1196_vm3 = vcmp.ge.s32.totalorder %v4202_v61, 3 }
  0xad   : > { %v4067_v56 = vmul.f32 %v4059_v51, %v4061_v54  ;;  %vm1242_vm4 = vcmp.lt.s32.totalorder %v4202_v61, 125  ;;  %vm1737_vm5 = vcmp.ge.s32.totalorder %v4202_v61, 9  ;;  %vm1783_vm6 = vcmp.lt.s32.totalorder %v4202_v61, 119 }
  0xae   : > { %v4071_v57 = vmul.f32 %v4059_v51, %v4063_v55  ;;  %v606_v0 = vpop.permute.xlu1 %605 }
  0xaf   : > { %v601_v59 = vpop.permute.xlu0 %600  ;;  %655 = vrot.lane.b32.xlu0 %v4067_v56, %s3816_s24  ;;  %v4083_v3 = vadd.f32 %v606_v0, %v583_v1 }
  0xb0   : > { %v4073_v62 = vadd.f32 %v601_v59, %v582_v58  ;;  %653 = vrot.lane.b32.xlu1 %v4071_v57, %s3816_s24 }
  0xb1   : > { %v4089_v4 = vmul.f32 %v4059_v51, %v4083_v3 }
  0xb2   : > { %v4079_v63 = vmul.f32 %v4059_v51, %v4073_v62  ;;  %v637_v35 = vpop.permute.xlu1 %636 }
  0xb3   : > { %v632_v40 = vpop.permute.xlu0 %631 }
  0xb4   : > { %657 = vrot.lane.b32.xlu0 %v4079_v63, %s3816_s24  ;;  %698 = vrot.lane.b32.xlu1 %v4071_v57, %s3817_s29 }
  0xb6   : > { %v678_v41 = vpop.permute.xlu1 %677 }
  0xb7   : > { %v673_v44 = vpop.permute.xlu0 %672 }
  0xb8   : > { %700 = vrot.lane.b32.xlu0 %v4067_v56, %s3817_s29  ;;  %702 = vrot.lane.b32.xlu1 %v4079_v63, %s3817_s29 }
  0xba   : > { %v683_v45 = vpop.permute.xlu1 %682 }
  0xbb   : > { %v642_v48 = vpop.permute.xlu0 %641 }
  0xbc   : > { %659 = vrot.lane.b32.xlu0 %v4089_v4, %s3816_s24  ;;  %704 = vrot.lane.b32.xlu1 %v4089_v4, %s3817_s29 }
  0xbe   : > { %v724_v49 = vpop.permute.xlu1 %723 }
  0xbf   : > { %v719_v50 = vpop.permute.xlu0 %718 }
  0xc0   : > { %765 = vperm.xlu0 %3634, %v747_v5   ;;  %822 = vperm.xlu1 %3635, %v773_v6   ;;  %v899_v5 = vld [vmem:[%s5049_s6] sm:$0xff] }
  0xc1   : > { %3486 = vmatprep.mubr.msk.f32.mxu0 %vm927_vm0, %v899_v5 }
  0xc2   : > { %v688_v52 = vpop.permute.xlu1 %687 }
  0xc3   : > { %v647_v53 = vpop.permute.xlu0 %646 }
  0xc4   : > { %817 = vperm.xlu0 %3634, %v772_v7   ;;  %846 = vperm.xlu1 %3635, %v777_v8  }
  0xc6   : > { %v734_v58 = vpop.permute.xlu1 %733 }
  0xc7   : > { %v729_v59 = vpop.permute.xlu0 %728 }
  0xc8   : > { %841 = vperm.xlu0 %3634, %v776_v9   ;;  %832 = vperm.xlu1 %3635, %v775_v10  }
  0xca   : > { %v756_v60 = vpop.permute.xlu1 %755 }
  0xcb   : > { %v751_v0 = vpop.permute.xlu0 %750 }
  0xcc   : > { %827 = vperm.xlu0 %3634, %v774_v11   ;;  %856 = vperm.xlu1 %3635, %v779_v12  }
  0xce   : > { %v761_v1 = vpop.permute.xlu1 %760 }
  0xd0   : > { %851 = vperm.xlu0 %3634, %v778_v13   ;;  %914 = vperm.xlu1 %3635, %v904_v14  }
  0xd4   : > { %909 = vperm.xlu0 %3634, %v903_v15   ;;  %924 = vperm.xlu1 %3635, %v906_v16   ;;  %v649_v15 = vmul.f32 %v632_v40, %v4071_v57  ;;  %v652_v40 = vmul.f32 %v647_v53, %v4089_v4 }
  0xd8   : > { %919 = vperm.xlu0 %3634, %v905_v17   ;;  %1074 = vperm.xlu1 %3635, %v1026_v18   ;;  %v650_v18 = vmul.f32 %v637_v35, %v4067_v56 }
  0xdc   : > { %1069 = vperm.xlu0 %3634, %v1025_v19   ;;  %1093 = vperm.xlu1 %3635, %v1029_v20   ;;  %v651_v19 = vmul.f32 %v642_v48, %v4079_v63 }
  0xe0   : > { %1079 = vperm.xlu0 %3634, %v1027_v21   ;;  %1084 = vperm.xlu1 %3635, %v1028_v22  }
  0xe4   : > { %1098 = vperm.xlu0 %3634, %v1030_v23   ;;  %1108 = vperm.xlu1 %3635, %v1032_v24  }
  0xe8   : > { %1103 = vperm.xlu0 %3634, %v1031_v25   ;;  %1171 = vperm.xlu1 %3635, %v3311_v26  }
  0xec   : > { %1166 = vperm.xlu0 %3634, %v3310_v27   ;;  %1213 = vperm.xlu1 %3635, %v3315_v30  }
  0xf0   : > { %1208 = vperm.xlu0 %3634, %v3314_v31   ;;  %1218 = vperm.xlu1 %3635, %v3316_v32  }
  0xf4   : > { %1176 = vperm.xlu0 %3634, %v3312_v33   ;;  %1259 = vperm.xlu1 %3635, %v3319_v34  }
  0xf8   : > { %1254 = vperm.xlu0 %3634, %v3318_v36   ;;  %1223 = vperm.xlu1 %3635, %v3317_v37  }
  0xfc   : > { %1181 = vperm.xlu0 %3634, %v3313_v38   ;;  %1269 = vperm.xlu1 %3635, %v3321_v39  }
 0x100   : > { %1264 = vperm.xlu0 %3634, %v3320_v42   ;;  %1292 = vperm.xlu1 %3635, %v3323_v43  }
 0x104   : > { %1287 = vperm.xlu0 %3634, %v3322_v46   ;;  %1297 = vperm.xlu1 %3635, %v3324_v47  }
 0x121   : > { %v656_v6 = vpop.permute.xlu0 %655 }
 0x122   : > { %v654_v7 = vpop.permute.xlu1 %653  ;;  %v663_v28 = vsel %vm661_vm1, %v656_v6, 0.0 }
 0x123   : > { %v662_v8 = vsel %vm661_vm1, %v654_v7, 0.0  ;;  %v691_v12 = vmul.f32 %v678_v41, %v663_v28 }
 0x124   : > { %v690_v9 = vmul.f32 %v673_v44, %v662_v8 }
 0x125   : > { %v695_v23 = vadd.f32 %v691_v12, %v650_v18 }
 0x126   : > { %v658_v10 = vpop.permute.xlu0 %657  ;;  %v699_v11 = vpop.permute.xlu1 %698  ;;  %v694_v20 = vadd.f32 %v690_v9, %v649_v15 }
 0x127   : > { %v664_v13 = vsel %vm661_vm1, %v658_v10, 0.0  ;;  %v707_v14 = vsel %vm706_vm2, %v699_v11, 0.0 }
 0x128   : > { %v692_v16 = vmul.f32 %v683_v45, %v664_v13  ;;  %v736_v17 = vmul.f32 %v719_v50, %v707_v14 }
 0x12a   : > { %v701_v21 = vpop.permute.xlu0 %700  ;;  %v703_v22 = vpop.permute.xlu1 %702  ;;  %v696_v26 = vadd.f32 %v692_v16, %v651_v19  ;;  %v740_v27 = vadd.f32 %v736_v17, %v694_v20 }
 0x12b   : > { %v708_v24 = vsel %vm706_vm2, %v701_v21, 0.0  ;;  %v709_v25 = vsel %vm706_vm2, %v703_v22, 0.0 }
 0x12c   : > { %v737_v30 = vmul.f32 %v724_v49, %v708_v24  ;;  %v738_v57 = vmul.f32 %v729_v59, %v709_v25  ;;  %v768_v33 = vadd.f32 %v751_v0, %v740_v27 }
 0x12e   : > { %v741_v31 = vadd.f32 %v737_v30, %v695_v23  ;;  %v742_v32 = vadd.f32 %v738_v57, %v696_v26  ;;  %v660_v34 = vpop.permute.xlu0 %659  ;;  %v705_v39 = vpop.permute.xlu1 %704 }
 0x12f   : > { %v665_v36 = vsel %vm661_vm1, %v660_v34, 0.0  ;;  %v710_v41 = vsel %vm706_vm2, %v705_v39, 0.0  ;;  %vm2437_vm2 = vcmp.le.s32.totalorder %v4202_v61, %v4042_v29 }
 0x130   : > { %v769_v56 = vadd.f32 %v756_v60, %v741_v31  ;;  %v770_v63 = vadd.f32 %v761_v1, %v742_v32  ;;  %v693_v38 = vmul.f32 %v688_v52, %v665_v36  ;;  %v739_v43 = vmul.f32 %v734_v58, %v710_v41 }
 0x132   : > { %v780_v35 = vadd.f32 %v769_v56, %v768_v33  ;;  %v697_v42 = vadd.f32 %v693_v38, %v652_v40 }
 0x134   : > { %v781_v37 = vadd.f32 %v780_v35, %v770_v63  ;;  %v743_v44 = vadd.f32 %v739_v43, %v697_v42 }
 0x13f   : > { %v766_v45 = vpop.permute.xlu0 %765  ;;  %v823_v17 = vpop.permute.xlu1 %822 }
 0x140   : > { %v771_v46 = vadd.f32 %v766_v45, %v743_v44 }
 0x142   : > { %v782_v47 = vadd.f32 %v781_v37, %v771_v46 }
 0x143   : > { %v818_v19 = vpop.permute.xlu0 %817  ;;  %v847_v21 = vpop.permute.xlu1 %846 }
 0x144   : > { %v783_v48 = vrot.slane %v782_v47, 4 }
 0x146   : > { %v784_v49 = vadd.f32 %v783_v48, %v782_v47 }
 0x147   : > { %v842_v22 = vpop.permute.xlu0 %841  ;;  %v833_v23 = vpop.permute.xlu1 %832 }
 0x148   : > { %v785_v50 = vrot.slane %v784_v49, 2 }
 0x14a   : > { %v786_v59 = vadd.f32 %v785_v50, %v784_v49 }
 0x14b   : > { %v828_v24 = vpop.permute.xlu0 %827  ;;  %v857_v34 = vpop.permute.xlu1 %856 }
 0x14c   : > { %v787_v60 = vrot.slane %v786_v59, 1 }
 0x14e   : > { %v788_v0 = vadd.f32 %v787_v60, %v786_v59 }
 0x150   : > { %v790_v1 = vmul.f32 0.03125, %v788_v0 }
 0x152   : > { %v794_v52 = vsub.f32 %v771_v46, %v790_v1  ;;  %v791_v5 = vsub.f32 %v768_v33, %v790_v1  ;;  %v792_v6 = vsub.f32 %v769_v56, %v790_v1  ;;  %v793_v4 = vsub.f32 %v770_v63, %v790_v1  ;;  %v852_v63 = vpop.permute.xlu0 %851 }
 0x154   : > { %v795_v53 = vmul.f32 %v791_v5, %v791_v5  ;;  %v796_v7 = vmul.f32 %v792_v6, %v792_v6  ;;  %v797_v8 = vmul.f32 %v793_v4, %v793_v4  ;;  %v798_v58 = vmul.f32 %v794_v52, %v794_v52 }
 0x156   : > { %v799_v28 = vadd.f32 %v796_v7, %v795_v53 }
 0x158   : > { %v800_v9 = vadd.f32 %v799_v28, %v797_v8 }
 0x15a   : > { %v801_v10 = vadd.f32 %v800_v9, %v798_v58 }
 0x15c   : > { %v802_v11 = vrot.slane %v801_v10, 4 }
 0x15e   : > { %v803_v12 = vadd.f32 %v802_v11, %v801_v10 }
 0x160   : > { %v804_v13 = vrot.slane %v803_v12, 2 }
 0x162   : > { %v805_v14 = vadd.f32 %v804_v13, %v803_v12 }
 0x164   : > { %v806_v15 = vrot.slane %v805_v14, 1 }
 0x166   : > { %v807_v16 = vadd.f32 %v806_v15, %v805_v14 }
 0x168   : > { %v808_v18 = vmul.f32 0.03125, %v807_v16 }
 0x16a   : > { %v809_v20 = vadd.f32 1e-05, %v808_v18 }
 0x16c   : > { %3636 = vrsqrt.f32 %v809_v20 }
 0x176   : > { %v3637_v25 = vpop.eup %3636 }
 0x177   : > { %v812_v26 = vmul.f32 %v3637_v25, %v792_v6  ;;  %v811_v27 = vmul.f32 %v3637_v25, %v791_v5  ;;  %v814_v30 = vmul.f32 %v3637_v25, %v794_v52  ;;  %v813_v57 = vmul.f32 %v3637_v25, %v793_v4  ;;  %v910_v25 = vpop.permute.xlu0 %909 }
 0x179   : > { %v836_v31 = vmul.f32 %v823_v17, %v812_v26  ;;  %v835_v32 = vmul.f32 %v818_v19, %v811_v27  ;;  %v838_v33 = vmul.f32 %v833_v23, %v814_v30  ;;  %v837_v56 = vmul.f32 %v828_v24, %v813_v57  ;;  %v901_v23 = vld [vmem:[%s5049_s6 + $0x10] sm:$0xff]  ;;  %v902_v24 = vld [vmem:[%s5049_s6 + $0x18] sm:$0xff]  ;;  %v915_v26 = vpop.permute.xlu1 %914 }
 0x17b   : > { %v860_v35 = vadd.f32 %v847_v21, %v836_v31  ;;  %v859_v36 = vadd.f32 %v842_v22, %v835_v32  ;;  %v862_v37 = vadd.f32 %v857_v34, %v838_v33  ;;  %v861_v38 = vadd.f32 %v852_v63, %v837_v56  ;;  %v900_v22 = vld [vmem:[%s5049_s6 + $0x8] sm:$0xff]  ;;  %v920_v56 = vpop.permute.xlu0 %919 }
 0x17d   : > { %v868_v39 = vmul.f32 0.044715, %v860_v35  ;;  %v867_v40 = vmul.f32 0.044715, %v859_v36  ;;  %v870_v41 = vmul.f32 0.044715, %v862_v37 }
 0x17e   : > { %v869_v42 = vmul.f32 0.044715, %v861_v38  ;;  %v863_v8 = vmul.f32 0.5, %v859_v36  ;;  %v864_v9 = vmul.f32 0.5, %v860_v35  ;;  %v865_v13 = vmul.f32 0.5, %v861_v38 }
 0x17f   : > { %v874_v43 = vmul.f32 %v870_v41, %v862_v37  ;;  %v871_v44 = vmul.f32 %v867_v40, %v859_v36  ;;  %v872_v45 = vmul.f32 %v868_v39, %v860_v35  ;;  %v866_v16 = vmul.f32 0.5, %v862_v37 }
 0x180   : > { %v873_v46 = vmul.f32 %v869_v42, %v861_v38 }
 0x181   : > { %v875_v47 = vmul.f32 %v871_v44, %v859_v36  ;;  %v876_v48 = vmul.f32 %v872_v45, %v860_v35  ;;  %v878_v49 = vmul.f32 %v874_v43, %v862_v37 }
 0x182   : > { %v877_v50 = vmul.f32 %v873_v46, %v861_v38 }
 0x183   : > { %v879_v59 = vadd.f32 %v875_v47, %v859_v36  ;;  %v880_v60 = vadd.f32 %v876_v48, %v860_v35  ;;  %v882_v0 = vadd.f32 %v878_v49, %v862_v37  ;;  %v925_v35 = vpop.permute.xlu1 %924 }
 0x184   : > { %v881_v1 = vadd.f32 %v877_v50, %v861_v38 }
 0x185   : > { %v883_v52 = vmul.f32 0.7978846, %v879_v59  ;;  %v884_v5 = vmul.f32 0.7978846, %v880_v60  ;;  %v886_v4 = vmul.f32 0.7978846, %v882_v0 }
 0x186   : > { %v885_v6 = vmul.f32 0.7978846, %v881_v1 }
 0x187   : > { %3638 = vtanh.f32 %v883_v52 }
 0x188   : > { %3640 = vtanh.f32 %v884_v5 }
 0x189   : > { %3642 = vtanh.f32 %v885_v6 }
 0x18a   : > { %3644 = vtanh.f32 %v886_v4 }
 0x191   : > { %v3639_v53 = vpop.eup %3638 }
 0x192   : > { %v3641_v7 = vpop.eup %3640  ;;  %v891_v28 = vadd.f32 1.0, %v3639_v53 }
 0x193   : > { %v3643_v58 = vpop.eup %3642  ;;  %v892_v10 = vadd.f32 1.0, %v3641_v7 }
 0x194   : > { %v3645_v11 = vpop.eup %3644  ;;  %v895_v12 = vmul.f32 %v891_v28, %v863_v8  ;;  %v893_v14 = vadd.f32 1.0, %v3643_v58  ;;  %v1075_v58 = vpop.permute.xlu1 %1074 }
 0x195   : > { %v896_v15 = vmul.f32 %v892_v10, %v864_v9  ;;  %v894_v17 = vadd.f32 1.0, %v3645_v11  ;;  %v1070_v9 = vpop.permute.xlu0 %1069 }
 0x196   : > { %v897_v18 = vmul.f32 %v893_v14, %v865_v13 }
 0x197   : > { %v3540_v19 = vpack.c.bf16 %v896_v15, %v895_v12  ;;  %v898_v20 = vmul.f32 %v894_v17, %v866_v16 }
 0x198   : > { %v1094_v12 = vpop.permute.xlu1 %1093 }
 0x199   : > { %3541 = vmatprep.subr.bf16.mxu0 %v3540_v19  ;;  %v3544_v21 = vpack.c.bf16 %v898_v20, %v897_v18  ;;  %v1080_v13 = vpop.permute.xlu0 %1079 }
 0x19a   : > { %3543 = vmatpush3.bf16.msra.mxu0 %v3540_v19 }
 0x19b   : > { %3545 = vmatprep.subr.bf16.mxu0 %v3544_v21 }
 0x19c   : > { %v1085_v14 = vpop.permute.xlu1 %1084 }
 0x19d   : > { %v1099_v15 = vpop.permute.xlu0 %1098 }
 0x19e   : > { %3547 = vmatpush3.bf16.msra.mxu0 %v3544_v21 }
 0x1a1   : > { %3487 = vmatmul.mubr.msk.f32.vlgmr.msra.gmra.mrb[0].mxu0 %vm927_vm0, %v900_v22 }
 0x1a2   : > { %3489 = vmatprep.mubr.msk.f32.mxu0 %vm927_vm0, %v901_v23 }
 0x1a5   : > { %3490 = vmatmul.mubr.msk.f32.gmra.mrb[2].mxu0 %vm927_vm0, %v902_v24 }
 0x274   : > { %v3488_v27 = vpop.f32.mrb[0].mxu0 }
 0x275   : > { %v1012_v30 = vadd.f32 %v3488_v27, %v915_v26  ;;  %v1006_v57 = vpop.f32.mrb[1].mxu0  ;;  %v1104_v26 = vpop.permute.xlu0 %1103 }
 0x276   : > { %v1007_v31 = vadd.f32 %v1006_v57, %v910_v25  ;;  %v1109_v25 = vpop.permute.xlu1 %1108 }
 0x278   : > { %v1033_v32 = vadd.f32 %v1012_v30, %v1007_v31  ;;  %v3491_v33 = vpop.f32.mrb[2].mxu0 }
 0x279   : > { %v1016_v34 = vpop.f32.mrb[3].mxu0  ;;  %v1022_v36 = vadd.f32 %v3491_v33, %v925_v35 }
 0x27a   : > { %v1017_v63 = vadd.f32 %v1016_v34, %v920_v56 }
 0x27c   : > { %v1034_v37 = vadd.f32 %v1033_v32, %v1017_v63 }
 0x27e   : > { %v1035_v38 = vadd.f32 %v1034_v37, %v1022_v36 }
 0x280   : > { %v1036_v39 = vrot.slane %v1035_v38, 4 }
 0x282   : > { %v1037_v40 = vadd.f32 %v1036_v39, %v1035_v38 }
 0x284   : > { %v1038_v41 = vrot.slane %v1037_v40, 2 }
 0x286   : > { %v1039_v42 = vadd.f32 %v1038_v41, %v1037_v40 }
 0x288   : > { %v1040_v43 = vrot.slane %v1039_v42, 1 }
 0x28a   : > { %v1041_v44 = vadd.f32 %v1040_v43, %v1039_v42 }
 0x28c   : > { %v1042_v45 = vmul.f32 0.03125, %v1041_v44 }
 0x28e   : > { %v1043_v46 = vsub.f32 %v1007_v31, %v1042_v45  ;;  %v1044_v47 = vsub.f32 %v1012_v30, %v1042_v45  ;;  %v1045_v48 = vsub.f32 %v1017_v63, %v1042_v45  ;;  %v1046_v49 = vsub.f32 %v1022_v36, %v1042_v45 }
 0x290   : > { %v1047_v50 = vmul.f32 %v1043_v46, %v1043_v46  ;;  %v1048_v59 = vmul.f32 %v1044_v47, %v1044_v47  ;;  %v1049_v60 = vmul.f32 %v1045_v48, %v1045_v48  ;;  %v1050_v1 = vmul.f32 %v1046_v49, %v1046_v49 }
 0x292   : > { %v1051_v0 = vadd.f32 %v1048_v59, %v1047_v50 }
 0x294   : > { %v1052_v52 = vadd.f32 %v1051_v0, %v1049_v60 }
 0x296   : > { %v1053_v5 = vadd.f32 %v1052_v52, %v1050_v1 }
 0x298   : > { %v1054_v6 = vrot.slane %v1053_v5, 4 }
 0x29a   : > { %v1055_v4 = vadd.f32 %v1054_v6, %v1053_v5 }
 0x29c   : > { %v1056_v53 = vrot.slane %v1055_v4, 2 }
 0x29e   : > { %v1057_v7 = vadd.f32 %v1056_v53, %v1055_v4 }
 0x2a0   : > { %v1058_v8 = vrot.slane %v1057_v7, 1 }
 0x2a2   : > { %v1059_v28 = vadd.f32 %v1058_v8, %v1057_v7 }
 0x2a4   : > { %v1060_v10 = vmul.f32 0.03125, %v1059_v28 }
 0x2a6   : > { %v1061_v11 = vadd.f32 1e-05, %v1060_v10 }
 0x2a8   : > { %3646 = vrsqrt.f32 %v1061_v11 }
 0x2b2   : > { %v3647_v16 = vpop.eup %3646 }
 0x2b3   : > { %v1063_v17 = vmul.f32 %v3647_v16, %v1043_v46  ;;  %v1064_v18 = vmul.f32 %v3647_v16, %v1044_v47  ;;  %v1065_v19 = vmul.f32 %v3647_v16, %v1045_v48  ;;  %v1066_v20 = vmul.f32 %v3647_v16, %v1046_v49  ;;  %v3325_v16 = vld [vmem:[%s5048_s5 + $0x38] sm:$0xff] }
 0x2b5   : > { %v1087_v21 = vmul.f32 %v1070_v9, %v1063_v17  ;;  %v1088_v22 = vmul.f32 %v1075_v58, %v1064_v18  ;;  %v1089_v23 = vmul.f32 %v1080_v13, %v1065_v19  ;;  %v1090_v24 = vmul.f32 %v1085_v14, %v1066_v20  ;;  %v3326_v17 = vld [vmem:[%s5051_s8 + $0x20] sm:$0xff]  ;;  %v3329_v19 = vld [vmem:[%s5051_s8 + $0x38] sm:$0xff]  ;;  %v3328_v20 = vld [vmem:[%s5051_s8 + $0x30] sm:$0xff] }
 0x2b6   : > { %v3330_v18 = vld [vmem:[%s5052_s9 + $0x20] sm:$0xff] }
 0x2b7   : > { %v1111_v27 = vadd.f32 %v1094_v12, %v1087_v21  ;;  %v1112_v30 = vadd.f32 %v1099_v15, %v1088_v22  ;;  %v1113_v57 = vadd.f32 %v1104_v26, %v1089_v23  ;;  %v1114_v31 = vadd.f32 %v1109_v25, %v1090_v24  ;;  %v3333_v21 = vld [vmem:[%s5052_s9 + $0x38] sm:$0xff]  ;;  %v3332_v22 = vld [vmem:[%s5052_s9 + $0x30] sm:$0xff]  ;;  %v3339_v23 = vld [vmem:[%s5050_s7 + $0x28] sm:$0xff] }
 0x2b8   : > { %v3338_v24 = vld [vmem:[%s5050_s7 + $0x20] sm:$0xff]  ;;  %v3341_v25 = vld [vmem:[%s5050_s7 + $0x38] sm:$0xff]  ;;  %v3340_v26 = vld [vmem:[%s5050_s7 + $0x30] sm:$0xff] }
 0x2b9   : > { %v1120_v32 = vmul.f32 0.044715, %v1112_v30  ;;  %v1119_v33 = vmul.f32 0.044715, %v1111_v27  ;;  %v1121_v56 = vmul.f32 0.044715, %v1113_v57 }
 0x2ba   : > { %v1122_v34 = vmul.f32 0.044715, %v1114_v31  ;;  %v1116_v60 = vmul.f32 0.5, %v1112_v30  ;;  %v1115_v52 = vmul.f32 0.5, %v1111_v27  ;;  %v1117_v4 = vmul.f32 0.5, %v1113_v57 }
 0x2bb   : > { %v1124_v63 = vmul.f32 %v1120_v32, %v1112_v30  ;;  %v1123_v35 = vmul.f32 %v1119_v33, %v1111_v27  ;;  %v1125_v36 = vmul.f32 %v1121_v56, %v1113_v57  ;;  %v3349_v32 = vld [vmem:[%s5053_s10 + $0x38] sm:$0xff]  ;;  %v3351_v33 = vld [vmem:[%s5054_s11 + $0x28] sm:$0xff] }
 0x2bc   : > { %v1126_v37 = vmul.f32 %v1122_v34, %v1114_v31  ;;  %v3353_v56 = vld [vmem:[%s5054_s11 + $0x38] sm:$0xff]  ;;  %v3352_v34 = vld [vmem:[%s5054_s11 + $0x30] sm:$0xff] }
 0x2bd   : > { %v1128_v38 = vmul.f32 %v1124_v63, %v1112_v30  ;;  %v1127_v39 = vmul.f32 %v1123_v35, %v1111_v27  ;;  %v1129_v40 = vmul.f32 %v1125_v36, %v1113_v57  ;;  %v3355_v63 = vld [vmem:[%s5047_s4 + $0xe8] sm:$0xff]  ;;  %v3354_v35 = vld [vmem:[%s5047_s4 + $0xe0] sm:$0xff] }
 0x2be   : > { %v1130_v41 = vmul.f32 %v1126_v37, %v1114_v31  ;;  %v3359_v36 = vld [vmem:[%s5047_s4 + $0xc8] sm:$0xff]  ;;  %v3358_v37 = vld [vmem:[%s5047_s4 + $0xc0] sm:$0xff] }
 0x2bf   : > { %v1132_v42 = vadd.f32 %v1128_v38, %v1112_v30  ;;  %v1131_v43 = vadd.f32 %v1127_v39, %v1111_v27  ;;  %v1133_v44 = vadd.f32 %v1129_v40, %v1113_v57  ;;  %v3347_v27 = vld [vmem:[%s5053_s10 + $0x28] sm:$0xff]  ;;  %v3346_v30 = vld [vmem:[%s5053_s10 + $0x20] sm:$0xff]  ;;  %v3360_v38 = vld [vmem:[%s5047_s4 + $0xd0] sm:$0xff] }
 0x2c0   : > { %v1134_v45 = vadd.f32 %v1130_v41, %v1114_v31  ;;  %v3350_v57 = vld [vmem:[%s5054_s11 + $0x20] sm:$0xff]  ;;  %v3356_v39 = vld [vmem:[%s5047_s4 + $0xf0] sm:$0xff]  ;;  %v3363_v40 = vld [vmem:[%s5047_s4 + $0x108] sm:$0xff]  ;;  %v1172_v41 = vpop.permute.xlu1 %1171 }
 0x2c1   : > { %v1136_v46 = vmul.f32 0.7978846, %v1132_v42  ;;  %v1135_v47 = vmul.f32 0.7978846, %v1131_v43  ;;  %v1137_v48 = vmul.f32 0.7978846, %v1133_v44 }
 0x2c2   : > { %v1138_v49 = vmul.f32 0.7978846, %v1134_v45  ;;  %v3362_v42 = vld [vmem:[%s5047_s4 + $0x100] sm:$0xff]  ;;  %v3361_v43 = vld [vmem:[%s5047_s4 + $0xd8] sm:$0xff]  ;;  %v1167_v45 = vpop.permute.xlu0 %1166 }
 0x2c3   : > { %3648 = vtanh.f32 %v1136_v46  ;;  %v3357_v44 = vld [vmem:[%s5047_s4 + $0xf8] sm:$0xff] }
 0x2c4   : > { %3650 = vtanh.f32 %v1135_v47  ;;  %v3365_v46 = vld [vmem:[%s5047_s4 + $0x118] sm:$0xff]  ;;  %v1214_v47 = vpop.permute.xlu1 %1213 }
 0x2c5   : > { %3652 = vtanh.f32 %v1137_v48  ;;  %v3364_v48 = vld [vmem:[%s5047_s4 + $0x110] sm:$0xff] }
 0x2c6   : > { %3654 = vtanh.f32 %v1138_v49  ;;  %v3367_v49 = vld [vmem:[%s5048_s5 + $0x48] sm:$0xff] }
 0x2cd   : > { %v3649_v50 = vpop.eup %3648 }
 0x2ce   : > { %v3651_v59 = vpop.eup %3650  ;;  %v1144_v0 = vadd.f32 1.0, %v3649_v50  ;;  %v1209_v50 = vpop.permute.xlu0 %1208 }
 0x2cf   : > { %v3653_v1 = vpop.eup %3652  ;;  %v1143_v5 = vadd.f32 1.0, %v3651_v59  ;;  %v1219_v59 = vpop.permute.xlu1 %1218 }
 0x2d0   : > { %v1148_v6 = vmul.f32 %v1144_v0, %v1116_v60  ;;  %v1145_v53 = vadd.f32 1.0, %v3653_v1  ;;  %v3655_v7 = vpop.eup %3654  ;;  %v3366_v60 = vld [vmem:[%s5048_s5 + $0x40] sm:$0xff]  ;;  %v3368_v0 = vld [vmem:[%s5048_s5 + $0x50] sm:$0xff] }
 0x2d1   : > { %v1147_v8 = vmul.f32 %v1143_v5, %v1115_v52  ;;  %v1146_v12 = vadd.f32 1.0, %v3655_v7 }
 0x2d2   : > { %v4243_v28 = vadd.f32 %v1148_v6, %v4061_v54  ;;  %v1149_v58 = vmul.f32 %v1145_v53, %v1117_v4  ;;  %v1118_v54 = vmul.f32 0.5, %v1114_v31  ;;  %v3348_v31 = vld [vmem:[%s5053_s10 + $0x30] sm:$0xff]  ;;  %v1177_v1 = vpop.permute.xlu0 %1176 }
 0x2d3   : > { %v4246_v9 = vadd.f32 %v1147_v8, %v4063_v55  ;;  %v1260_v52 = vpop.permute.xlu1 %1259 }
 0x2d4   : > { %v4250_v10 = vmul.f32 %v4059_v51, %v4243_v28  ;;  %v4253_v11 = vadd.f32 %v1149_v58, %v4073_v62  ;;  %v1150_v14 = vmul.f32 %v1146_v12, %v1118_v54  ;;  %v3334_v12 = vld [vmem:[%s5049_s6 + $0x20] sm:$0xff] }
 0x2d5   : > { %v4257_v13 = vmul.f32 %v4059_v51, %v4246_v9  ;;  %3500 = vmatprep.mubr.msk.f32.mxu1 %vm927_vm0, %v3334_v12 }
 0x2d6   : > { %1190 = vrot.lane.b32.xlu0 %v4250_v10, %s3818_s26  ;;  %v4263_v55 = vmul.f32 %v4059_v51, %v4253_v11  ;;  %v4268_v62 = vadd.f32 %v1150_v14, %v4083_v3  ;;  %v3327_v3 = vld [vmem:[%s5051_s8 + $0x28] sm:$0xff]  ;;  %v1255_v5 = vpop.permute.xlu0 %1254 }
 0x2d7   : > { %1188 = vrot.lane.b32.xlu1 %v4257_v13, %s3818_s26  ;;  %v1224_v6 = vpop.permute.xlu1 %1223 }
 0x2d8   : > { %v4274_v15 = vmul.f32 %v4059_v51, %v4268_v62  ;;  %v3331_v51 = vld [vmem:[%s5052_s9 + $0x28] sm:$0xff] }
 0x2da   : > { %1192 = vrot.lane.b32.xlu0 %v4263_v55, %s3818_s26  ;;  %v1182_v4 = vpop.permute.xlu0 %1181 }
 0x2db   : > { %1234 = vrot.lane.b32.xlu1 %v4257_v13, %s3819_s20  ;;  %v1270_v53 = vpop.permute.xlu1 %1269 }
 0x2de   : > { %1236 = vrot.lane.b32.xlu0 %v4250_v10, %s3819_s20  ;;  %v1265_v7 = vpop.permute.xlu0 %1264 }
 0x2df   : > { %1238 = vrot.lane.b32.xlu1 %v4263_v55, %s3819_s20  ;;  %v1293_v8 = vpop.permute.xlu1 %1292 }
 0x2e2   : > { %1194 = vrot.lane.b32.xlu0 %v4274_v15, %s3818_s26  ;;  %v1288_v58 = vpop.permute.xlu0 %1287 }
 0x2e3   : > { %1240 = vrot.lane.b32.xlu1 %v4274_v15, %s3819_s20  ;;  %v1298_v54 = vpop.permute.xlu1 %1297 }
 0x2e6   : > { %1302 = vperm.xlu0 %3634, %v3325_v16  }
 0x2e7   : > { %1360 = vperm.xlu1 %3635, %v3327_v3  }
 0x2ea   : > { %1355 = vperm.xlu0 %3634, %v3326_v17  }
 0x2eb   : > { %1384 = vperm.xlu1 %3635, %v3331_v51  }
 0x2ee   : > { %1379 = vperm.xlu0 %3634, %v3330_v18  }
 0x2ef   : > { %1370 = vperm.xlu1 %3635, %v3329_v19  }
 0x2f2   : > { %1365 = vperm.xlu0 %3634, %v3328_v20  }
 0x2f3   : > { %1394 = vperm.xlu1 %3635, %v3333_v21  }
 0x2f6   : > { %1389 = vperm.xlu0 %3634, %v3332_v22   ;;  %v1184_v22 = vmul.f32 %v1167_v45, %v4257_v13  ;;  %v1187_v45 = vmul.f32 %v1182_v4, %v4274_v15 }
 0x2f7   : > { %1454 = vperm.xlu1 %3635, %v3339_v23  }
 0x2fa   : > { %1449 = vperm.xlu0 %3634, %v3338_v24  }
 0x2fb   : > { %1464 = vperm.xlu1 %3635, %v3341_v25  }
 0x2fe   : > { %1459 = vperm.xlu0 %3634, %v3340_v26   ;;  %v1185_v26 = vmul.f32 %v1172_v41, %v4250_v10 }
 0x2ff   : > { %1615 = vperm.xlu1 %3635, %v3347_v27  }
 0x302   : > { %1610 = vperm.xlu0 %3634, %v3346_v30  }
 0x303   : > { %1634 = vperm.xlu1 %3635, %v3350_v57   ;;  %v1186_v57 = vmul.f32 %v1177_v1, %v4263_v55 }
 0x306   : > { %1620 = vperm.xlu0 %3634, %v3348_v31  }
 0x307   : > { %1625 = vperm.xlu1 %3635, %v3349_v32  }
 0x30a   : > { %1639 = vperm.xlu0 %3634, %v3351_v33  }
 0x30b   : > { %1649 = vperm.xlu1 %3635, %v3353_v56  }
 0x30e   : > { %1644 = vperm.xlu0 %3634, %v3352_v34  }
 0x30f   : > { %1712 = vperm.xlu1 %3635, %v3355_v63  }
 0x312   : > { %1707 = vperm.xlu0 %3634, %v3354_v35  }
 0x313   : > { %1754 = vperm.xlu1 %3635, %v3359_v36  }
 0x316   : > { %1749 = vperm.xlu0 %3634, %v3358_v37  }
 0x317   : > { %1759 = vperm.xlu1 %3635, %v3360_v38  }
 0x31a   : > { %1717 = vperm.xlu0 %3634, %v3356_v39  }
 0x31b   : > { %1800 = vperm.xlu1 %3635, %v3363_v40  }
 0x31e   : > { %1795 = vperm.xlu0 %3634, %v3362_v42  }
 0x31f   : > { %1764 = vperm.xlu1 %3635, %v3361_v43  }
 0x322   : > { %1722 = vperm.xlu0 %3634, %v3357_v44  }
 0x323   : > { %1810 = vperm.xlu1 %3635, %v3365_v46  }
 0x326   : > { %1805 = vperm.xlu0 %3634, %v3364_v48  }
 0x327   : > { %1833 = vperm.xlu1 %3635, %v3367_v49  }
 0x32a   : > { %1828 = vperm.xlu0 %3634, %v3366_v60  }
 0x32b   : > { %1838 = vperm.xlu1 %3635, %v3368_v0  }
 0x348   : > { %v1191_v14 = vpop.permute.xlu0 %1190 }
 0x349   : > { %v1189_v16 = vpop.permute.xlu1 %1188  ;;  %v1198_v17 = vsel %vm1196_vm3, %v1191_v14, 0.0 }
 0x34a   : > { %v1197_v3 = vsel %vm1196_vm3, %v1189_v16, 0.0  ;;  %v1227_v21 = vmul.f32 %v1214_v47, %v1198_v17 }
 0x34b   : > { %v1226_v51 = vmul.f32 %v1209_v50, %v1197_v3 }
 0x34c   : > { %v1193_v18 = vpop.permute.xlu0 %1192  ;;  %v1231_v33 = vadd.f32 %v1227_v21, %v1185_v26 }
 0x34d   : > { %v1199_v19 = vsel %vm1196_vm3, %v1193_v18, 0.0  ;;  %v1235_v20 = vpop.permute.xlu1 %1234  ;;  %v1230_v27 = vadd.f32 %v1226_v51, %v1184_v22 }
 0x34e   : > { %v1243_v23 = vsel %vm1242_vm4, %v1235_v20, 0.0  ;;  %v1228_v24 = vmul.f32 %v1219_v59, %v1199_v19 }
 0x34f   : > { %v1272_v25 = vmul.f32 %v1255_v5, %v1243_v23 }
 0x350   : > { %v1237_v30 = vpop.permute.xlu0 %1236  ;;  %v1232_v63 = vadd.f32 %v1228_v24, %v1186_v57 }
 0x351   : > { %v1244_v31 = vsel %vm1242_vm4, %v1237_v30, 0.0  ;;  %v1239_v32 = vpop.permute.xlu1 %1238  ;;  %v1276_v56 = vadd.f32 %v1272_v25, %v1230_v27 }
 0x352   : > { %v1273_v34 = vmul.f32 %v1260_v52, %v1244_v31  ;;  %v1245_v13 = vsel %vm1242_vm4, %v1239_v32, 0.0 }
 0x353   : > { %v1274_v35 = vmul.f32 %v1265_v7, %v1245_v13  ;;  %v1305_v38 = vadd.f32 %v1288_v58, %v1276_v56 }
 0x354   : > { %v1277_v36 = vadd.f32 %v1273_v34, %v1231_v33  ;;  %v1195_v39 = vpop.permute.xlu0 %1194 }
 0x355   : > { %v1278_v37 = vadd.f32 %v1274_v35, %v1232_v63  ;;  %v1200_v55 = vsel %vm1196_vm3, %v1195_v39, 0.0  ;;  %v1241_v44 = vpop.permute.xlu1 %1240 }
 0x356   : > { %v1306_v10 = vadd.f32 %v1293_v8, %v1277_v36  ;;  %v1229_v43 = vmul.f32 %v1224_v6, %v1200_v55  ;;  %v1246_v46 = vsel %vm1242_vm4, %v1241_v44, 0.0  ;;  %vm2540_vm4 = vcmask 80896  }
 0x357   : > { %v1307_v40 = vadd.f32 %v1298_v54, %v1278_v37  ;;  %v1275_v48 = vmul.f32 %v1270_v53, %v1246_v46 }
 0x358   : > { %v1319_v41 = vadd.f32 %v1306_v10, %v1305_v38  ;;  %v1233_v47 = vadd.f32 %v1229_v43, %v1187_v45 }
 0x35a   : > { %v1320_v42 = vadd.f32 %v1319_v41, %v1307_v40  ;;  %v1279_v49 = vadd.f32 %v1275_v48, %v1233_v47 }
 0x365   : > { %v1303_v50 = vpop.permute.xlu0 %1302 }
 0x366   : > { %v1308_v59 = vadd.f32 %v1303_v50, %v1279_v49  ;;  %v1361_v24 = vpop.permute.xlu1 %1360 }
 0x368   : > { %v1321_v60 = vadd.f32 %v1320_v42, %v1308_v59 }
 0x369   : > { %v1356_v26 = vpop.permute.xlu0 %1355 }
 0x36a   : > { %v1322_v0 = vrot.slane %v1321_v60, 4  ;;  %v1385_v30 = vpop.permute.xlu1 %1384 }
 0x36c   : > { %v1323_v1 = vadd.f32 %v1322_v0, %v1321_v60 }
 0x36d   : > { %v1380_v57 = vpop.permute.xlu0 %1379 }
 0x36e   : > { %v1324_v52 = vrot.slane %v1323_v1, 2  ;;  %v1371_v31 = vpop.permute.xlu1 %1370 }
 0x370   : > { %v1325_v5 = vadd.f32 %v1324_v52, %v1323_v1 }
 0x371   : > { %v1366_v32 = vpop.permute.xlu0 %1365 }
 0x372   : > { %v1326_v7 = vrot.slane %v1325_v5, 1 }
 0x374   : > { %v1327_v8 = vadd.f32 %v1326_v7, %v1325_v5 }
 0x375   : > { %v1390_v39 = vpop.permute.xlu0 %1389 }
 0x376   : > { %v1328_v58 = vmul.f32 0.03125, %v1327_v8 }
 0x378   : > { %v1332_v6 = vsub.f32 %v1308_v59, %v1328_v58  ;;  %v1329_v12 = vsub.f32 %v1305_v38, %v1328_v58  ;;  %v1330_v54 = vsub.f32 %v1306_v10, %v1328_v58  ;;  %v1331_v15 = vsub.f32 %v1307_v40, %v1328_v58  ;;  %v1395_v10 = vpop.permute.xlu1 %1394 }
 0x37a   : > { %v1333_v4 = vmul.f32 %v1329_v12, %v1329_v12  ;;  %v1334_v14 = vmul.f32 %v1330_v54, %v1330_v54  ;;  %v1335_v16 = vmul.f32 %v1331_v15, %v1331_v15  ;;  %v1336_v53 = vmul.f32 %v1332_v6, %v1332_v6 }
 0x37c   : > { %v1337_v3 = vadd.f32 %v1334_v14, %v1333_v4 }
 0x37e   : > { %v1338_v17 = vadd.f32 %v1337_v3, %v1335_v16 }
 0x380   : > { %v1339_v51 = vadd.f32 %v1338_v17, %v1336_v53 }
 0x382   : > { %v1340_v18 = vrot.slane %v1339_v51, 4 }
 0x384   : > { %v1341_v19 = vadd.f32 %v1340_v18, %v1339_v51 }
 0x386   : > { %v1342_v20 = vrot.slane %v1341_v19, 2 }
 0x388   : > { %v1343_v21 = vadd.f32 %v1342_v20, %v1341_v19 }
 0x38a   : > { %v1344_v22 = vrot.slane %v1343_v21, 1 }
 0x38c   : > { %v1345_v23 = vadd.f32 %v1344_v22, %v1343_v21 }
 0x38e   : > { %v1346_v25 = vmul.f32 0.03125, %v1345_v23 }
 0x390   : > { %v1347_v27 = vadd.f32 1e-05, %v1346_v25 }
 0x392   : > { %3656 = vrsqrt.f32 %v1347_v27 }
 0x39c   : > { %v3657_v33 = vpop.eup %3656 }
 0x39d   : > { %v1350_v56 = vmul.f32 %v3657_v33, %v1330_v54  ;;  %v1349_v34 = vmul.f32 %v3657_v33, %v1329_v12  ;;  %v1352_v13 = vmul.f32 %v3657_v33, %v1332_v6  ;;  %v1351_v63 = vmul.f32 %v3657_v33, %v1331_v15  ;;  %v1455_v33 = vpop.permute.xlu1 %1454 }
 0x39f   : > { %v1374_v35 = vmul.f32 %v1361_v24, %v1350_v56  ;;  %v1373_v36 = vmul.f32 %v1356_v26, %v1349_v34  ;;  %v1376_v37 = vmul.f32 %v1371_v31, %v1352_v13  ;;  %v1375_v38 = vmul.f32 %v1366_v32, %v1351_v63  ;;  %v3337_v31 = vld [vmem:[%s5049_s6 + $0x38] sm:$0xff]  ;;  %v1450_v32 = vpop.permute.xlu0 %1449 }
 0x3a1   : > { %v1398_v40 = vadd.f32 %v1385_v30, %v1374_v35  ;;  %v1397_v41 = vadd.f32 %v1380_v57, %v1373_v36  ;;  %v1400_v55 = vadd.f32 %v1395_v10, %v1376_v37  ;;  %v1399_v42 = vadd.f32 %v1390_v39, %v1375_v38  ;;  %v3335_v30 = vld [vmem:[%s5049_s6 + $0x28] sm:$0xff]  ;;  %v3336_v57 = vld [vmem:[%s5049_s6 + $0x30] sm:$0xff]  ;;  %v1465_v39 = vpop.permute.xlu1 %1464 }
 0x3a3   : > { %v1406_v43 = vmul.f32 0.044715, %v1398_v40  ;;  %v1405_v44 = vmul.f32 0.044715, %v1397_v41  ;;  %v1408_v45 = vmul.f32 0.044715, %v1400_v55  ;;  %v1460_v37 = vpop.permute.xlu0 %1459 }
 0x3a4   : > { %v1407_v46 = vmul.f32 0.044715, %v1399_v42  ;;  %v1401_v14 = vmul.f32 0.5, %v1397_v41  ;;  %v1402_v53 = vmul.f32 0.5, %v1398_v40  ;;  %v1403_v19 = vmul.f32 0.5, %v1399_v42 }
 0x3a5   : > { %v1410_v47 = vmul.f32 %v1406_v43, %v1398_v40  ;;  %v1409_v48 = vmul.f32 %v1405_v44, %v1397_v41  ;;  %v1412_v49 = vmul.f32 %v1408_v45, %v1400_v55  ;;  %v1404_v22 = vmul.f32 0.5, %v1400_v55 }
 0x3a6   : > { %v1411_v50 = vmul.f32 %v1407_v46, %v1399_v42 }
 0x3a7   : > { %v1416_v59 = vmul.f32 %v1412_v49, %v1400_v55  ;;  %v1413_v60 = vmul.f32 %v1409_v48, %v1397_v41  ;;  %v1414_v0 = vmul.f32 %v1410_v47, %v1398_v40 }
 0x3a8   : > { %v1415_v1 = vmul.f32 %v1411_v50, %v1399_v42 }
 0x3a9   : > { %v1417_v52 = vadd.f32 %v1413_v60, %v1397_v41  ;;  %v1418_v5 = vadd.f32 %v1414_v0, %v1398_v40  ;;  %v1420_v7 = vadd.f32 %v1416_v59, %v1400_v55 }
 0x3aa   : > { %v1419_v8 = vadd.f32 %v1415_v1, %v1399_v42 }
 0x3ab   : > { %v1421_v58 = vmul.f32 0.7978846, %v1417_v52  ;;  %v1422_v6 = vmul.f32 0.7978846, %v1418_v5  ;;  %v1424_v54 = vmul.f32 0.7978846, %v1420_v7 }
 0x3ac   : > { %v1423_v12 = vmul.f32 0.7978846, %v1419_v8 }
 0x3ad   : > { %3658 = vtanh.f32 %v1421_v58 }
 0x3ae   : > { %3660 = vtanh.f32 %v1422_v6 }
 0x3af   : > { %3662 = vtanh.f32 %v1423_v12 }
 0x3b0   : > { %3664 = vtanh.f32 %v1424_v54 }
 0x3b7   : > { %v3659_v15 = vpop.eup %3658 }
 0x3b8   : > { %v3661_v4 = vpop.eup %3660  ;;  %v1429_v16 = vadd.f32 1.0, %v3659_v15 }
 0x3b9   : > { %v3663_v3 = vpop.eup %3662  ;;  %v1430_v17 = vadd.f32 1.0, %v3661_v4 }
 0x3ba   : > { %v3665_v51 = vpop.eup %3664  ;;  %v1433_v18 = vmul.f32 %v1429_v16, %v1401_v14  ;;  %v1431_v20 = vadd.f32 1.0, %v3663_v3  ;;  %v1616_v16 = vpop.permute.xlu1 %1615 }
 0x3bb   : > { %v1434_v21 = vmul.f32 %v1430_v17, %v1402_v53  ;;  %v1432_v23 = vadd.f32 1.0, %v3665_v51  ;;  %v1611_v3 = vpop.permute.xlu0 %1610 }
 0x3bc   : > { %v1435_v24 = vmul.f32 %v1431_v20, %v1403_v19 }
 0x3bd   : > { %v3548_v25 = vpack.c.bf16 %v1434_v21, %v1433_v18  ;;  %v1436_v26 = vmul.f32 %v1432_v23, %v1404_v22 }
 0x3be   : > { %v1635_v51 = vpop.permute.xlu1 %1634 }
 0x3bf   : > { %3549 = vmatprep.subr.bf16.mxu1 %v3548_v25  ;;  %v3552_v27 = vpack.c.bf16 %v1436_v26, %v1435_v24  ;;  %v1621_v18 = vpop.permute.xlu0 %1620 }
 0x3c0   : > { %3551 = vmatpush3.bf16.msra.mxu1 %v3548_v25 }
 0x3c1   : > { %3553 = vmatprep.subr.bf16.mxu1 %v3552_v27 }
 0x3c2   : > { %v1626_v19 = vpop.permute.xlu1 %1625 }
 0x3c3   : > { %v1640_v20 = vpop.permute.xlu0 %1639 }
 0x3c4   : > { %3555 = vmatpush3.bf16.msra.mxu1 %v3552_v27 }
 0x3c7   : > { %3501 = vmatmul.mubr.msk.f32.vlgmr.msra.gmra.mrb[0].mxu1 %vm927_vm0, %v3335_v30 }
 0x3c8   : > { %3503 = vmatprep.mubr.msk.f32.mxu1 %vm927_vm0, %v3336_v57 }
 0x3cb   : > { %3504 = vmatmul.mubr.msk.f32.gmra.mrb[2].mxu1 %vm927_vm0, %v3337_v31  ;;  %v1650_v31 = vpop.permute.xlu1 %1649 }
 0x49a   : > { %v3502_v56 = vpop.f32.mrb[0].mxu1 }
 0x49b   : > { %v1551_v34 = vadd.f32 %v3502_v56, %v1455_v33  ;;  %v1545_v13 = vpop.f32.mrb[1].mxu1 }
 0x49c   : > { %v1546_v63 = vadd.f32 %v1545_v13, %v1450_v32  ;;  %v1645_v32 = vpop.permute.xlu0 %1644 }
 0x49e   : > { %v1574_v35 = vadd.f32 %v1551_v34, %v1546_v63  ;;  %v3505_v36 = vpop.f32.mrb[2].mxu1 }
 0x49f   : > { %v1555_v38 = vpop.f32.mrb[3].mxu1  ;;  %v1561_v40 = vadd.f32 %v3505_v36, %v1465_v39 }
 0x4a0   : > { %v1556_v10 = vadd.f32 %v1555_v38, %v1460_v37 }
 0x4a2   : > { %v1575_v41 = vadd.f32 %v1574_v35, %v1556_v10 }
 0x4a4   : > { %v1576_v55 = vadd.f32 %v1575_v41, %v1561_v40 }
 0x4a6   : > { %v1577_v42 = vrot.slane %v1576_v55, 4 }
 0x4a8   : > { %v1578_v43 = vadd.f32 %v1577_v42, %v1576_v55 }
 0x4aa   : > { %v1579_v44 = vrot.slane %v1578_v43, 2 }
 0x4ac   : > { %v1580_v45 = vadd.f32 %v1579_v44, %v1578_v43 }
 0x4ae   : > { %v1581_v46 = vrot.slane %v1580_v45, 1 }
 0x4b0   : > { %v1582_v47 = vadd.f32 %v1581_v46, %v1580_v45 }
 0x4b2   : > { %v1583_v48 = vmul.f32 0.03125, %v1582_v47 }
 0x4b4   : > { %v1584_v49 = vsub.f32 %v1546_v63, %v1583_v48  ;;  %v1585_v50 = vsub.f32 %v1551_v34, %v1583_v48  ;;  %v1586_v59 = vsub.f32 %v1556_v10, %v1583_v48  ;;  %v1587_v60 = vsub.f32 %v1561_v40, %v1583_v48 }
 0x4b6   : > { %v1588_v0 = vmul.f32 %v1584_v49, %v1584_v49  ;;  %v1589_v1 = vmul.f32 %v1585_v50, %v1585_v50  ;;  %v1590_v52 = vmul.f32 %v1586_v59, %v1586_v59  ;;  %v1591_v7 = vmul.f32 %v1587_v60, %v1587_v60 }
 0x4b8   : > { %v1592_v5 = vadd.f32 %v1589_v1, %v1588_v0 }
 0x4ba   : > { %v1593_v8 = vadd.f32 %v1592_v5, %v1590_v52 }
 0x4bc   : > { %v1594_v58 = vadd.f32 %v1593_v8, %v1591_v7 }
 0x4be   : > { %v1595_v6 = vrot.slane %v1594_v58, 4 }
 0x4c0   : > { %v1596_v12 = vadd.f32 %v1595_v6, %v1594_v58 }
 0x4c2   : > { %v1597_v54 = vrot.slane %v1596_v12, 2 }
 0x4c4   : > { %v1598_v15 = vadd.f32 %v1597_v54, %v1596_v12 }
 0x4c6   : > { %v1599_v4 = vrot.slane %v1598_v15, 1 }
 0x4c8   : > { %v1600_v14 = vadd.f32 %v1599_v4, %v1598_v15 }
 0x4ca   : > { %v1601_v53 = vmul.f32 0.03125, %v1600_v14 }
 0x4cc   : > { %v1602_v17 = vadd.f32 1e-05, %v1601_v53 }
 0x4ce   : > { %3666 = vrsqrt.f32 %v1602_v17 }
 0x4d8   : > { %v3667_v21 = vpop.eup %3666 }
 0x4d9   : > { %v1604_v22 = vmul.f32 %v3667_v21, %v1584_v49  ;;  %v1605_v23 = vmul.f32 %v3667_v21, %v1585_v50  ;;  %v1606_v24 = vmul.f32 %v3667_v21, %v1586_v59  ;;  %v1607_v25 = vmul.f32 %v3667_v21, %v1587_v60  ;;  %v3369_v21 = vld [vmem:[%s5048_s5 + $0x58] sm:$0xff] }
 0x4db   : > { %v1628_v26 = vmul.f32 %v1611_v3, %v1604_v22  ;;  %v1629_v27 = vmul.f32 %v1616_v16, %v1605_v23  ;;  %v1630_v30 = vmul.f32 %v1621_v18, %v1606_v24  ;;  %v1631_v57 = vmul.f32 %v1626_v19, %v1607_v25  ;;  %v4431_v3 = vld [vmem:[%s4056_s23] ss:$0 sm:$0xff]  ;;  %v3375_v23 = vld [vmem:[%s5052_s9 + $0x48] sm:$0xff]  ;;  %v3373_v25 = vld [vmem:[%s5051_s8 + $0x58] sm:$0xff] }
 0x4dc   : > { %v3370_v22 = vld [vmem:[%s5051_s8 + $0x40] sm:$0xff] }
 0x4dd   : > { %v1652_v33 = vadd.f32 %v1635_v51, %v1628_v26  ;;  %v1653_v56 = vadd.f32 %v1640_v20, %v1629_v27  ;;  %v1654_v34 = vadd.f32 %v1645_v32, %v1630_v30  ;;  %v1655_v13 = vadd.f32 %v1650_v31, %v1631_v57  ;;  %v3374_v24 = vld [vmem:[%s5052_s9 + $0x40] sm:$0xff]  ;;  %v3372_v26 = vld [vmem:[%s5051_s8 + $0x50] sm:$0xff]  ;;  %v3377_v27 = vld [vmem:[%s5052_s9 + $0x58] sm:$0xff] }
 0x4de   : > { %v3376_v30 = vld [vmem:[%s5052_s9 + $0x50] sm:$0xff]  ;;  %v3383_v57 = vld [vmem:[%s5050_s7 + $0x48] sm:$0xff]  ;;  %v3382_v31 = vld [vmem:[%s5050_s7 + $0x40] sm:$0xff] }
 0x4df   : > { %v1662_v63 = vmul.f32 0.044715, %v1654_v34  ;;  %v1661_v35 = vmul.f32 0.044715, %v1653_v56  ;;  %v1660_v36 = vmul.f32 0.044715, %v1652_v33 }
 0x4e0   : > { %v1663_v37 = vmul.f32 0.044715, %v1655_v13  ;;  %v1657_v1 = vmul.f32 0.5, %v1653_v56  ;;  %v1656_v7 = vmul.f32 0.5, %v1652_v33  ;;  %v1658_v6 = vmul.f32 0.5, %v1654_v34  ;;  %v3385_v32 = vld [vmem:[%s5050_s7 + $0x58] sm:$0xff] }
 0x4e1   : > { %v1666_v38 = vmul.f32 %v1662_v63, %v1654_v34  ;;  %v1665_v10 = vmul.f32 %v1661_v35, %v1653_v56  ;;  %v1664_v39 = vmul.f32 %v1660_v36, %v1652_v33  ;;  %v3394_v63 = vld [vmem:[%s5054_s11 + $0x40] sm:$0xff]  ;;  %v3393_v35 = vld [vmem:[%s5053_s10 + $0x58] sm:$0xff]  ;;  %v3392_v36 = vld [vmem:[%s5053_s10 + $0x50] sm:$0xff] }
 0x4e2   : > { %v1667_v40 = vmul.f32 %v1663_v37, %v1655_v13  ;;  %v3397_v37 = vld [vmem:[%s5054_s11 + $0x58] sm:$0xff] }
 0x4e3   : > { %v1669_v41 = vmul.f32 %v1665_v10, %v1653_v56  ;;  %v1670_v55 = vmul.f32 %v1666_v38, %v1654_v34  ;;  %v1668_v42 = vmul.f32 %v1664_v39, %v1652_v33  ;;  %v3396_v38 = vld [vmem:[%s5054_s11 + $0x50] sm:$0xff]  ;;  %v2254_v10 = vld [vmem:[%s5056_s13 + $0x28] sm:$0xff]  ;;  %v2253_v39 = vld [vmem:[%s5056_s13 + $0x20] sm:$0xff] }
 0x4e4   : > { %v1671_v43 = vmul.f32 %v1667_v40, %v1655_v13  ;;  %v2250_v40 = vld [vmem:[%s5056_s13 + $0x8] sm:$0xff] }
 0x4e5   : > { %v1673_v44 = vadd.f32 %v1669_v41, %v1653_v56  ;;  %v1674_v45 = vadd.f32 %v1670_v55, %v1654_v34  ;;  %v1672_v46 = vadd.f32 %v1668_v42, %v1652_v33  ;;  %v3384_v33 = vld [vmem:[%s5050_s7 + $0x50] sm:$0xff]  ;;  %v3391_v56 = vld [vmem:[%s5053_s10 + $0x48] sm:$0xff]  ;;  %v3390_v34 = vld [vmem:[%s5053_s10 + $0x40] sm:$0xff] }
 0x4e6   : > { %v1675_v47 = vadd.f32 %v1671_v43, %v1655_v13  ;;  %v2252_v41 = vld [vmem:[%s5056_s13 + $0x18] sm:$0xff]  ;;  %v2255_v55 = vld [vmem:[%s5056_s13 + $0x30] sm:$0xff]  ;;  %v2249_v42 = vld [vmem:[%s5056_s13] sm:$0xff] }
 0x4e7   : > { %v1677_v48 = vmul.f32 0.7978846, %v1673_v44  ;;  %v1678_v49 = vmul.f32 0.7978846, %v1674_v45  ;;  %v1676_v50 = vmul.f32 0.7978846, %v1672_v46  ;;  %v1713_v44 = vpop.permute.xlu1 %1712  ;;  %v1708_v46 = vpop.permute.xlu0 %1707 }
 0x4e8   : > { %v1679_v59 = vmul.f32 0.7978846, %v1675_v47  ;;  %v2256_v43 = vld [vmem:[%s5056_s13 + $0x38] sm:$0x3]  ;;  %v2251_v45 = vld [vmem:[%s5056_s13 + $0x10] sm:$0xff] }
 0x4e9   : > { %3668 = vtanh.f32 %v1677_v48 }
 0x4ea   : > { %3670 = vtanh.f32 %v1676_v50 }
 0x4eb   : > { %3672 = vtanh.f32 %v1678_v49  ;;  %v1755_v47 = vpop.permute.xlu1 %1754  ;;  %v1750_v48 = vpop.permute.xlu0 %1749 }
 0x4ec   : > { %3674 = vtanh.f32 %v1679_v59 }
 0x4ef   : > { %v1760_v49 = vpop.permute.xlu1 %1759  ;;  %v1718_v50 = vpop.permute.xlu0 %1717 }
 0x4f3   : > { %v3669_v60 = vpop.eup %3668  ;;  %v1801_v59 = vpop.permute.xlu1 %1800 }
 0x4f4   : > { %v3671_v0 = vpop.eup %3670  ;;  %v1685_v52 = vadd.f32 1.0, %v3669_v60  ;;  %v1796_v60 = vpop.permute.xlu0 %1795 }
 0x4f5   : > { %v3673_v5 = vpop.eup %3672  ;;  %v1684_v8 = vadd.f32 1.0, %v3671_v0 }
 0x4f6   : > { %v1689_v58 = vmul.f32 %v1685_v52, %v1657_v1  ;;  %v1686_v12 = vadd.f32 1.0, %v3673_v5  ;;  %v3675_v54 = vpop.eup %3674 }
 0x4f7   : > { %v1688_v15 = vmul.f32 %v1684_v8, %v1656_v7  ;;  %v1687_v51 = vadd.f32 1.0, %v3675_v54  ;;  %v1765_v0 = vpop.permute.xlu1 %1764 }
 0x4f8   : > { %v4425_v4 = vadd.f32 %v1689_v58, %v4243_v28  ;;  %v1690_v14 = vmul.f32 %v1686_v12, %v1658_v6  ;;  %v1659_v28 = vmul.f32 0.5, %v1655_v13  ;;  %v3395_v13 = vld [vmem:[%s5054_s11 + $0x48] sm:$0xff]  ;;  %v1723_v1 = vpop.permute.xlu0 %1722  ;;  %v3378_v58 = vld [vmem:[%s5049_s6 + $0x40] sm:$0xff] }
 0x4f9   : > { %v4428_v16 = vadd.f32 %v1688_v15, %v4246_v9  ;;  %3514 = vmatprep.mubr.msk.f32.mxu0 %vm927_vm0, %v3378_v58 }
 0x4fa   : > { %v4435_v53 = vmul.f32 %v4431_v3, %v4425_v4  ;;  %v4438_v17 = vadd.f32 %v1690_v14, %v4253_v11  ;;  %v1691_v19 = vmul.f32 %v1687_v51, %v1659_v28 }
 0x4fb   : > { %v4442_v18 = vmul.f32 %v4431_v3, %v4428_v16  ;;  %v1811_v52 = vpop.permute.xlu1 %1810 }
 0x4fc   : > { %1731 = vrot.lane.b32.xlu0 %v4435_v53, %s3820_s27  ;;  %v4448_v9 = vmul.f32 %v4431_v3, %v4438_v17  ;;  %v4453_v11 = vadd.f32 %v1691_v19, %v4268_v62  ;;  %v3371_v62 = vld [vmem:[%s5051_s8 + $0x48] sm:$0xff]  ;;  %v1806_v5 = vpop.permute.xlu0 %1805 }
 0x4fd   : > { %1729 = vrot.lane.b32.xlu1 %v4442_v18, %s3820_s27 }
 0x4fe   : > { %v4459_v20 = vmul.f32 %v4431_v3, %v4453_v11 }
 0x4ff   : > { %v1834_v7 = vpop.permute.xlu1 %1833 }
 0x500   : > { %1733 = vrot.lane.b32.xlu0 %v4448_v9, %s3820_s27  ;;  %v1829_v8 = vpop.permute.xlu0 %1828 }
 0x501   : > { %1775 = vrot.lane.b32.xlu1 %v4442_v18, %s3821_s16 }
 0x503   : > { %v1839_v6 = vpop.permute.xlu1 %1838 }
 0x504   : > { %1777 = vrot.lane.b32.xlu0 %v4435_v53, %s3821_s16 }
 0x505   : > { %1779 = vrot.lane.b32.xlu1 %v4448_v9, %s3821_s16 }
 0x508   : > { %1735 = vrot.lane.b32.xlu0 %v4459_v20, %s3820_s27 }
 0x509   : > { %1781 = vrot.lane.b32.xlu1 %v4459_v20, %s3821_s16 }
 0x50c   : > { %1843 = vperm.xlu0 %3634, %v3369_v21  }
 0x50d   : > { %1901 = vperm.xlu1 %3635, %v3371_v62  }
 0x510   : > { %1896 = vperm.xlu0 %3634, %v3370_v22   ;;  %v1725_v22 = vmul.f32 %v1708_v46, %v4442_v18 }
 0x511   : > { %1925 = vperm.xlu1 %3635, %v3375_v23  }
 0x514   : > { %1920 = vperm.xlu0 %3634, %v3374_v24  }
 0x515   : > { %1911 = vperm.xlu1 %3635, %v3373_v25  }
 0x518   : > { %1906 = vperm.xlu0 %3634, %v3372_v26   ;;  %v1726_v26 = vmul.f32 %v1713_v44, %v4435_v53 }
 0x519   : > { %1935 = vperm.xlu1 %3635, %v3377_v27  }
 0x51c   : > { %1930 = vperm.xlu0 %3634, %v3376_v30  }
 0x51d   : > { %1995 = vperm.xlu1 %3635, %v3383_v57   ;;  %v1727_v57 = vmul.f32 %v1718_v50, %v4448_v9 }
 0x520   : > { %1990 = vperm.xlu0 %3634, %v3382_v31  }
 0x521   : > { %2005 = vperm.xlu1 %3635, %v3385_v32  }
 0x524   : > { %2000 = vperm.xlu0 %3634, %v3384_v33  }
 0x525   : > { %2156 = vperm.xlu1 %3635, %v3391_v56  }
 0x528   : > { %2151 = vperm.xlu0 %3634, %v3390_v34  }
 0x529   : > { %2180 = vperm.xlu1 %3635, %v3395_v13  }
 0x52c   : > { %2175 = vperm.xlu0 %3634, %v3394_v63  }
 0x52d   : > { %2166 = vperm.xlu1 %3635, %v3393_v35  }
 0x530   : > { %2161 = vperm.xlu0 %3634, %v3392_v36  }
 0x531   : > { %2190 = vperm.xlu1 %3635, %v3397_v37  }
 0x534   : > { %2185 = vperm.xlu0 %3634, %v3396_v38  }
 0x535   : > { %2284 = vperm.xlu1 %3635, %v2254_v10  }
 0x538   : > { %2279 = vperm.xlu0 %3634, %v2253_v39  }
 0x539   : > { %2264 = vperm.xlu1 %3635, %v2250_v40  }
 0x53c   : > { %2274 = vperm.xlu0 %3634, %v2252_v41  }
 0x53d   : > { %2289 = vperm.xlu1 %3635, %v2255_v55  }
 0x540   : > { %2259 = vperm.xlu0 %3634, %v2249_v42   ;;  %v1728_v42 = vmul.f32 %v1723_v1, %v4459_v20 }
 0x541   : > { %2294 = vperm.xlu1 %3635, %v2256_v43  }
 0x544   : > { %2269 = vperm.xlu0 %3634, %v2251_v45  }
 0x56e   : > { %v1732_v12 = vpop.permute.xlu0 %1731 }
 0x56f   : > { %v1730_v54 = vpop.permute.xlu1 %1729  ;;  %v1739_v14 = vsel %vm1737_vm5, %v1732_v12, 0.0 }
 0x570   : > { %v1738_v15 = vsel %vm1737_vm5, %v1730_v54, 0.0  ;;  %v1768_v62 = vmul.f32 %v1755_v47, %v1739_v14 }
 0x571   : > { %v1767_v51 = vmul.f32 %v1750_v48, %v1738_v15 }
 0x572   : > { %v1734_v28 = vpop.permute.xlu0 %1733  ;;  %v1772_v33 = vadd.f32 %v1768_v62, %v1726_v26 }
 0x573   : > { %v1740_v19 = vsel %vm1737_vm5, %v1734_v28, 0.0  ;;  %v1776_v21 = vpop.permute.xlu1 %1775  ;;  %v1771_v27 = vadd.f32 %v1767_v51, %v1725_v22 }
 0x574   : > { %v1784_v23 = vsel %vm1783_vm6, %v1776_v21, 0.0  ;;  %v1769_v24 = vmul.f32 %v1760_v49, %v1740_v19 }
 0x575   : > { %v1813_v25 = vmul.f32 %v1796_v60, %v1784_v23 }
 0x576   : > { %v1778_v30 = vpop.permute.xlu0 %1777  ;;  %v1773_v13 = vadd.f32 %v1769_v24, %v1727_v57 }
 0x577   : > { %v1785_v31 = vsel %vm1783_vm6, %v1778_v30, 0.0  ;;  %v1780_v32 = vpop.permute.xlu1 %1779  ;;  %v1817_v56 = vadd.f32 %v1813_v25, %v1771_v27 }
 0x578   : > { %v1814_v34 = vmul.f32 %v1801_v59, %v1785_v31  ;;  %v1786_v18 = vsel %vm1783_vm6, %v1780_v32, 0.0 }
 0x579   : > { %v1815_v63 = vmul.f32 %v1806_v5, %v1786_v18  ;;  %v1846_v37 = vadd.f32 %v1829_v8, %v1817_v56 }
 0x57a   : > { %v1818_v35 = vadd.f32 %v1814_v34, %v1772_v33  ;;  %v1736_v38 = vpop.permute.xlu0 %1735 }
 0x57b   : > { %v1819_v36 = vadd.f32 %v1815_v63, %v1773_v13  ;;  %v1741_v9 = vsel %vm1737_vm5, %v1736_v38, 0.0  ;;  %v1782_v55 = vpop.permute.xlu1 %1781 }
 0x57c   : > { %v1847_v53 = vadd.f32 %v1834_v7, %v1818_v35  ;;  %v1770_v41 = vmul.f32 %v1765_v0, %v1741_v9  ;;  %v1787_v43 = vsel %vm1783_vm6, %v1782_v55, 0.0 }
 0x57d   : > { %v1848_v10 = vadd.f32 %v1839_v6, %v1819_v36  ;;  %v1816_v45 = vmul.f32 %v1811_v52, %v1787_v43 }
 0x57e   : > { %v1860_v39 = vadd.f32 %v1847_v53, %v1846_v37  ;;  %v1774_v44 = vadd.f32 %v1770_v41, %v1728_v42 }
 0x580   : > { %v1861_v40 = vadd.f32 %v1860_v39, %v1848_v10  ;;  %v1820_v46 = vadd.f32 %v1816_v45, %v1774_v44 }
 0x58b   : > { %v1844_v47 = vpop.permute.xlu0 %1843 }
 0x58c   : > { %v1849_v48 = vadd.f32 %v1844_v47, %v1820_v46  ;;  %v1902_v25 = vpop.permute.xlu1 %1901 }
 0x58e   : > { %v1862_v49 = vadd.f32 %v1861_v40, %v1849_v48 }
 0x58f   : > { %v1897_v27 = vpop.permute.xlu0 %1896 }
 0x590   : > { %v1863_v50 = vrot.slane %v1862_v49, 4  ;;  %v1926_v57 = vpop.permute.xlu1 %1925 }
 0x592   : > { %v1864_v59 = vadd.f32 %v1863_v50, %v1862_v49 }
 0x593   : > { %v1921_v31 = vpop.permute.xlu0 %1920 }
 0x594   : > { %v1865_v60 = vrot.slane %v1864_v59, 2  ;;  %v1912_v32 = vpop.permute.xlu1 %1911 }
 0x596   : > { %v1866_v5 = vadd.f32 %v1865_v60, %v1864_v59 }
 0x597   : > { %v1907_v33 = vpop.permute.xlu0 %1906 }
 0x598   : > { %v1867_v7 = vrot.slane %v1866_v5, 1  ;;  %v1936_v38 = vpop.permute.xlu1 %1935 }
 0x59a   : > { %v1868_v8 = vadd.f32 %v1867_v7, %v1866_v5 }
 0x59c   : > { %v1869_v58 = vmul.f32 0.03125, %v1868_v8 }
 0x59e   : > { %v1873_v0 = vsub.f32 %v1849_v48, %v1869_v58  ;;  %v1870_v6 = vsub.f32 %v1846_v37, %v1869_v58  ;;  %v1871_v12 = vsub.f32 %v1847_v53, %v1869_v58  ;;  %v1872_v20 = vsub.f32 %v1848_v10, %v1869_v58  ;;  %v1931_v10 = vpop.permute.xlu0 %1930 }
 0x5a0   : > { %v1874_v1 = vmul.f32 %v1870_v6, %v1870_v6  ;;  %v1875_v54 = vmul.f32 %v1871_v12, %v1871_v12  ;;  %v1876_v15 = vmul.f32 %v1872_v20, %v1872_v20  ;;  %v1877_v52 = vmul.f32 %v1873_v0, %v1873_v0 }
 0x5a2   : > { %v1878_v14 = vadd.f32 %v1875_v54, %v1874_v1 }
 0x5a4   : > { %v1879_v51 = vadd.f32 %v1878_v14, %v1876_v15 }
 0x5a6   : > { %v1880_v28 = vadd.f32 %v1879_v51, %v1877_v52 }
 0x5a8   : > { %v1881_v19 = vrot.slane %v1880_v28, 4 }
 0x5aa   : > { %v1882_v21 = vadd.f32 %v1881_v19, %v1880_v28 }
 0x5ac   : > { %v1883_v62 = vrot.slane %v1882_v21, 2 }
 0x5ae   : > { %v1884_v22 = vadd.f32 %v1883_v62, %v1882_v21 }
 0x5b0   : > { %v1885_v23 = vrot.slane %v1884_v22, 1 }
 0x5b2   : > { %v1886_v24 = vadd.f32 %v1885_v23, %v1884_v22 }
 0x5b4   : > { %v1887_v26 = vmul.f32 0.03125, %v1886_v24 }
 0x5b6   : > { %v1888_v30 = vadd.f32 1e-05, %v1887_v26 }
 0x5b8   : > { %3676 = vrsqrt.f32 %v1888_v30 }
 0x5c2   : > { %v3677_v56 = vpop.eup %3676 }
 0x5c3   : > { %v1891_v34 = vmul.f32 %v3677_v56, %v1871_v12  ;;  %v1890_v18 = vmul.f32 %v3677_v56, %v1870_v6  ;;  %v1893_v13 = vmul.f32 %v3677_v56, %v1873_v0  ;;  %v1892_v63 = vmul.f32 %v3677_v56, %v1872_v20  ;;  %v2241_v56 = vld [vmem:[%s5055_s12] sm:$0xff] }
 0x5c4   : > { %3528 = vmatprep.mubr.msk.f32.mxu1 %vm927_vm0, %v2241_v56 }
 0x5c5   : > { %v1915_v35 = vmul.f32 %v1902_v25, %v1891_v34  ;;  %v1914_v36 = vmul.f32 %v1897_v27, %v1890_v18  ;;  %v1917_v37 = vmul.f32 %v1912_v32, %v1893_v13  ;;  %v1916_v53 = vmul.f32 %v1907_v33, %v1892_v63  ;;  %v3380_v32 = vld [vmem:[%s5049_s6 + $0x50] sm:$0xff]  ;;  %v3381_v33 = vld [vmem:[%s5049_s6 + $0x58] sm:$0xff]  ;;  %v1991_v34 = vpop.permute.xlu0 %1990  ;;  %v1996_v18 = vpop.permute.xlu1 %1995 }
 0x5c7   : > { %v1939_v39 = vadd.f32 %v1926_v57, %v1915_v35  ;;  %v1938_v9 = vadd.f32 %v1921_v31, %v1914_v36  ;;  %v1941_v40 = vadd.f32 %v1936_v38, %v1917_v37  ;;  %v1940_v41 = vadd.f32 %v1931_v10, %v1916_v53  ;;  %v3379_v31 = vld [vmem:[%s5049_s6 + $0x48] sm:$0xff] }
 0x5c9   : > { %v1947_v55 = vmul.f32 0.044715, %v1939_v39  ;;  %v1946_v42 = vmul.f32 0.044715, %v1938_v9  ;;  %v1949_v43 = vmul.f32 0.044715, %v1941_v40  ;;  %v2001_v38 = vpop.permute.xlu0 %2000 }
 0x5ca   : > { %v1948_v44 = vmul.f32 0.044715, %v1940_v41  ;;  %v1942_v15 = vmul.f32 0.5, %v1938_v9  ;;  %v1943_v51 = vmul.f32 0.5, %v1939_v39  ;;  %v1944_v62 = vmul.f32 0.5, %v1940_v41 }
 0x5cb   : > { %v1951_v45 = vmul.f32 %v1947_v55, %v1939_v39  ;;  %v1950_v46 = vmul.f32 %v1946_v42, %v1938_v9  ;;  %v1953_v47 = vmul.f32 %v1949_v43, %v1941_v40  ;;  %v1945_v24 = vmul.f32 0.5, %v1941_v40 }
 0x5cc   : > { %v1952_v48 = vmul.f32 %v1948_v44, %v1940_v41 }
 0x5cd   : > { %v1955_v49 = vmul.f32 %v1951_v45, %v1939_v39  ;;  %v1954_v50 = vmul.f32 %v1950_v46, %v1938_v9  ;;  %v1957_v59 = vmul.f32 %v1953_v47, %v1941_v40 }
 0x5ce   : > { %v1956_v60 = vmul.f32 %v1952_v48, %v1940_v41 }
 0x5cf   : > { %v1958_v5 = vadd.f32 %v1954_v50, %v1938_v9  ;;  %v1959_v7 = vadd.f32 %v1955_v49, %v1939_v39  ;;  %v1961_v8 = vadd.f32 %v1957_v59, %v1941_v40  ;;  %v2006_v9 = vpop.permute.xlu1 %2005 }
 0x5d0   : > { %v1960_v58 = vadd.f32 %v1956_v60, %v1940_v41 }
 0x5d1   : > { %v1962_v0 = vmul.f32 0.7978846, %v1958_v5  ;;  %v1963_v6 = vmul.f32 0.7978846, %v1959_v7  ;;  %v1965_v20 = vmul.f32 0.7978846, %v1961_v8 }
 0x5d2   : > { %v1964_v12 = vmul.f32 0.7978846, %v1960_v58 }
 0x5d3   : > { %3678 = vtanh.f32 %v1962_v0 }
 0x5d4   : > { %3680 = vtanh.f32 %v1963_v6 }
 0x5d5   : > { %3682 = vtanh.f32 %v1964_v12 }
 0x5d6   : > { %3684 = vtanh.f32 %v1965_v20 }
 0x5dd   : > { %v3679_v1 = vpop.eup %3678 }
 0x5de   : > { %v3681_v54 = vpop.eup %3680  ;;  %v1970_v14 = vadd.f32 1.0, %v3679_v1 }
 0x5df   : > { %v3683_v52 = vpop.eup %3682  ;;  %v1971_v28 = vadd.f32 1.0, %v3681_v54 }
 0x5e0   : > { %v3685_v19 = vpop.eup %3684  ;;  %v1974_v21 = vmul.f32 %v1970_v14, %v1942_v15  ;;  %v1972_v22 = vadd.f32 1.0, %v3683_v52 }
 0x5e1   : > { %v1975_v23 = vmul.f32 %v1971_v28, %v1943_v51  ;;  %v1973_v25 = vadd.f32 1.0, %v3685_v19  ;;  %v2157_v51 = vpop.permute.xlu1 %2156  ;;  %v2152_v28 = vpop.permute.xlu0 %2151 }
 0x5e2   : > { %v1976_v26 = vmul.f32 %v1972_v22, %v1944_v62 }
 0x5e3   : > { %v3556_v27 = vpack.c.bf16 %v1975_v23, %v1974_v21  ;;  %v1977_v30 = vmul.f32 %v1973_v25, %v1945_v24 }
 0x5e5   : > { %3557 = vmatprep.subr.bf16.mxu0 %v3556_v27  ;;  %v3560_v57 = vpack.c.bf16 %v1977_v30, %v1976_v26  ;;  %v2181_v62 = vpop.permute.xlu1 %2180  ;;  %v2176_v22 = vpop.permute.xlu0 %2175 }
 0x5e6   : > { %3559 = vmatpush3.bf16.msra.mxu0 %v3556_v27 }
 0x5e7   : > { %3561 = vmatprep.subr.bf16.mxu0 %v3560_v57 }
 0x5e9   : > { %v2167_v23 = vpop.permute.xlu1 %2166  ;;  %v2162_v24 = vpop.permute.xlu0 %2161 }
 0x5ea   : > { %3563 = vmatpush3.bf16.msra.mxu0 %v3560_v57 }
 0x5ed   : > { %3515 = vmatmul.mubr.msk.f32.vlgmr.msra.gmra.mrb[4].mxu0 %vm927_vm0, %v3379_v31 }
 0x5ee   : > { %3517 = vmatprep.mubr.msk.f32.mxu0 %vm927_vm0, %v3380_v32 }
 0x5f1   : > { %3518 = vmatmul.mubr.msk.f32.gmra.mrb[6].mxu0 %vm927_vm0, %v3381_v33 }
 0x6c0   : > { %v3516_v13 = vpop.f32.mrb[4].mxu0 }
 0x6c1   : > { %v2092_v63 = vadd.f32 %v3516_v13, %v1996_v18  ;;  %v2086_v35 = vpop.f32.mrb[5].mxu0  ;;  %v2186_v18 = vpop.permute.xlu0 %2185 }
 0x6c2   : > { %v2087_v36 = vadd.f32 %v2086_v35, %v1991_v34  ;;  %v2191_v34 = vpop.permute.xlu1 %2190 }
 0x6c4   : > { %v2115_v37 = vadd.f32 %v2092_v63, %v2087_v36  ;;  %v3519_v53 = vpop.f32.mrb[6].mxu0 }
 0x6c5   : > { %v2096_v10 = vpop.f32.mrb[7].mxu0  ;;  %v2102_v40 = vadd.f32 %v3519_v53, %v2006_v9 }
 0x6c6   : > { %v2097_v39 = vadd.f32 %v2096_v10, %v2001_v38 }
 0x6c8   : > { %v2116_v41 = vadd.f32 %v2115_v37, %v2097_v39 }
 0x6ca   : > { %v2117_v55 = vadd.f32 %v2116_v41, %v2102_v40 }
 0x6cc   : > { %v2118_v42 = vrot.slane %v2117_v55, 4 }
 0x6ce   : > { %v2119_v43 = vadd.f32 %v2118_v42, %v2117_v55 }
 0x6d0   : > { %v2120_v44 = vrot.slane %v2119_v43, 2 }
 0x6d2   : > { %v2121_v45 = vadd.f32 %v2120_v44, %v2119_v43 }
 0x6d4   : > { %v2122_v46 = vrot.slane %v2121_v45, 1 }
 0x6d6   : > { %v2123_v47 = vadd.f32 %v2122_v46, %v2121_v45 }
 0x6d8   : > { %v2124_v48 = vmul.f32 0.03125, %v2123_v47 }
 0x6da   : > { %v2125_v49 = vsub.f32 %v2087_v36, %v2124_v48  ;;  %v2126_v50 = vsub.f32 %v2092_v63, %v2124_v48  ;;  %v2127_v59 = vsub.f32 %v2097_v39, %v2124_v48  ;;  %v2128_v60 = vsub.f32 %v2102_v40, %v2124_v48 }
 0x6dc   : > { %v2129_v5 = vmul.f32 %v2125_v49, %v2125_v49  ;;  %v2130_v7 = vmul.f32 %v2126_v50, %v2126_v50  ;;  %v2131_v8 = vmul.f32 %v2127_v59, %v2127_v59  ;;  %v2132_v0 = vmul.f32 %v2128_v60, %v2128_v60 }
 0x6de   : > { %v2133_v58 = vadd.f32 %v2130_v7, %v2129_v5 }
 0x6e0   : > { %v2134_v6 = vadd.f32 %v2133_v58, %v2131_v8 }
 0x6e2   : > { %v2135_v12 = vadd.f32 %v2134_v6, %v2132_v0 }
 0x6e4   : > { %v2136_v20 = vrot.slane %v2135_v12, 4 }
 0x6e6   : > { %v2137_v1 = vadd.f32 %v2136_v20, %v2135_v12 }
 0x6e8   : > { %v2138_v54 = vrot.slane %v2137_v1, 2 }
 0x6ea   : > { %v2139_v15 = vadd.f32 %v2138_v54, %v2137_v1 }
 0x6ec   : > { %v2140_v14 = vrot.slane %v2139_v15, 1 }
 0x6ee   : > { %v2141_v52 = vadd.f32 %v2140_v14, %v2139_v15 }
 0x6f0   : > { %v2142_v19 = vmul.f32 0.03125, %v2141_v52 }
 0x6f2   : > { %v2143_v21 = vadd.f32 1e-05, %v2142_v19 }
 0x6f4   : > { %3686 = vrsqrt.f32 %v2143_v21 }
 0x6fe   : > { %v3687_v25 = vpop.eup %3686 }
 0x6ff   : > { %v2145_v26 = vmul.f32 %v3687_v25, %v2125_v49  ;;  %v2146_v27 = vmul.f32 %v3687_v25, %v2126_v50  ;;  %v2147_v30 = vmul.f32 %v3687_v25, %v2127_v59  ;;  %v2148_v57 = vmul.f32 %v3687_v25, %v2128_v60 }
 0x701   : > { %v2169_v31 = vmul.f32 %v2152_v28, %v2145_v26  ;;  %v2170_v32 = vmul.f32 %v2157_v51, %v2146_v27  ;;  %v2171_v33 = vmul.f32 %v2162_v24, %v2147_v30  ;;  %v2172_v56 = vmul.f32 %v2167_v23, %v2148_v57 }
 0x703   : > { %v2193_v13 = vadd.f32 %v2176_v22, %v2169_v31  ;;  %v2194_v63 = vadd.f32 %v2181_v62, %v2170_v32  ;;  %v2195_v35 = vadd.f32 %v2186_v18, %v2171_v33  ;;  %v2196_v36 = vadd.f32 %v2191_v34, %v2172_v56  ;;  %v2246_v31 = vld [vmem:[%s5055_s12 + $0x28] sm:$0xff]  ;;  %v2247_v32 = vld [vmem:[%s5055_s12 + $0x30] sm:$0xff]  ;;  %v2248_v33 = vld [vmem:[%s5055_s12 + $0x38] sm:$0x3]  ;;  %v2280_v34 = vpop.permute.xlu0 %2279 }
 0x704   : > { %v3822_v56 = vmov 0.0  }
 0x705   : > { %v2203_v37 = vmul.f32 0.044715, %v2195_v35  ;;  %v2201_v53 = vmul.f32 0.044715, %v2193_v13  ;;  %v2202_v38 = vmul.f32 0.044715, %v2194_v63  ;;  %2617 = vmatprep.mubr.f32.mxu0 %v3822_v56 }
 0x706   : > { %v2204_v10 = vmul.f32 0.044715, %v2196_v36  ;;  %v2197_v8 = vmul.f32 0.5, %v2193_v13  ;;  %v2198_v6 = vmul.f32 0.5, %v2194_v63  ;;  %v2199_v54 = vmul.f32 0.5, %v2195_v35 }
 0x707   : > { %v2205_v39 = vmul.f32 %v2201_v53, %v2193_v13  ;;  %v2207_v9 = vmul.f32 %v2203_v37, %v2195_v35  ;;  %v2206_v40 = vmul.f32 %v2202_v38, %v2194_v63  ;;  %v2200_v52 = vmul.f32 0.5, %v2196_v36  ;;  %v2275_v18 = vpop.permute.xlu0 %2274 }
 0x708   : > { %v2208_v41 = vmul.f32 %v2204_v10, %v2196_v36 }
 0x709   : > { %v2209_v55 = vmul.f32 %v2205_v39, %v2193_v13  ;;  %v2211_v42 = vmul.f32 %v2207_v9, %v2195_v35  ;;  %v2210_v43 = vmul.f32 %v2206_v40, %v2194_v63 }
 0x70a   : > { %v2212_v44 = vmul.f32 %v2208_v41, %v2196_v36 }
 0x70b   : > { %v2213_v45 = vadd.f32 %v2209_v55, %v2193_v13  ;;  %v2215_v46 = vadd.f32 %v2211_v42, %v2195_v35  ;;  %v2214_v47 = vadd.f32 %v2210_v43, %v2194_v63  ;;  %v2285_v13 = vpop.permute.xlu1 %2284  ;;  %v2260_v63 = vpop.permute.xlu0 %2259 }
 0x70c   : > { %v2216_v48 = vadd.f32 %v2212_v44, %v2196_v36 }
 0x70d   : > { %v2217_v49 = vmul.f32 0.7978846, %v2213_v45  ;;  %v2219_v50 = vmul.f32 0.7978846, %v2215_v46  ;;  %v2218_v59 = vmul.f32 0.7978846, %v2214_v47 }
 0x70e   : > { %v2220_v60 = vmul.f32 0.7978846, %v2216_v48 }
 0x70f   : > { %3688 = vtanh.f32 %v2217_v49  ;;  %v2265_v35 = vpop.permute.xlu1 %2264  ;;  %v2270_v40 = vpop.permute.xlu0 %2269 }
 0x710   : > { %3690 = vtanh.f32 %v2218_v59 }
 0x711   : > { %3692 = vtanh.f32 %v2219_v50 }
 0x712   : > { %3694 = vtanh.f32 %v2220_v60 }
 0x713   : > { %v2290_v45 = vpop.permute.xlu1 %2289 }
 0x719   : > { %v3689_v5 = vpop.eup %3688 }
 0x71a   : > { %v3691_v7 = vpop.eup %3690  ;;  %v2225_v58 = vadd.f32 1.0, %v3689_v5 }
 0x71b   : > { %v3693_v0 = vpop.eup %3692  ;;  %v2226_v12 = vadd.f32 1.0, %v3691_v7 }
 0x71c   : > { %v3695_v20 = vpop.eup %3694  ;;  %v2229_v1 = vmul.f32 %v2225_v58, %v2197_v8  ;;  %v2227_v15 = vadd.f32 1.0, %v3693_v0 }
 0x71d   : > { %v2230_v14 = vmul.f32 %v2226_v12, %v2198_v6  ;;  %v2228_v51 = vadd.f32 1.0, %v3695_v20 }
 0x71e   : > { %v2233_v28 = vadd.f32 %v2229_v1, %v4428_v16  ;;  %v2231_v19 = vmul.f32 %v2227_v15, %v2199_v54  ;;  %v2243_v16 = vld [vmem:[%s5055_s12 + $0x10] sm:$0xff] }
 0x71f   : > { %v2234_v21 = vadd.f32 %v2230_v14, %v4425_v4  ;;  %v2232_v62 = vmul.f32 %v2228_v51, %v2200_v52  ;;  %v2242_v4 = vld [vmem:[%s5055_s12 + $0x8] sm:$0xff]  ;;  %v2295_v52 = vpop.permute.xlu1 %2294 }
 0x720   : > { %v2237_v22 = vmul.f32 %v4431_v3, %v2233_v28  ;;  %v2235_v23 = vadd.f32 %v2231_v19, %v4438_v17  ;;  %v2244_v17 = vld [vmem:[%s5055_s12 + $0x18] sm:$0xff] }
 0x721   : > { %v2238_v24 = vmul.f32 %v4431_v3, %v2234_v21  ;;  %v2236_v25 = vadd.f32 %v2232_v62, %v4453_v11  ;;  %v2245_v11 = vld [vmem:[%s5055_s12 + $0x20] sm:$0xff] }
 0x722   : > { %v2239_v26 = vmul.f32 %v4431_v3, %v2235_v23 }
 0x723   : > { %v3564_v27 = vpack.c.bf16 %v2238_v24, %v2237_v22  ;;  %v2240_v30 = vmul.f32 %v4431_v3, %v2236_v25 }
 0x725   : > { %3565 = vmatprep.subr.bf16.mxu1 %v3564_v27  ;;  %v3568_v57 = vpack.c.bf16 %v2240_v30, %v2239_v26 }
 0x726   : > { %3567 = vmatpush3.bf16.msra.mxu1 %v3564_v27 }
 0x727   : > { %3569 = vmatprep.subr.bf16.mxu1 %v3568_v57 }
 0x72a   : > { %3571 = vmatpush3.bf16.msra.mxu1 %v3568_v57 }
 0x72d   : > { %3529 = vmatmul.mubr.msk.f32.vlgmr.msra.gmra.mrb[4].mxu1 %vm927_vm0, %v2242_v4 }
 0x72e   : > { %3531 = vmatprep.mubr.msk.f32.mxu1 %vm927_vm0, %v2243_v16 }
 0x731   : > { %3532 = vmatmul.mubr.msk.f32.gmra.mrb[6].mxu1 %vm927_vm0, %v2244_v17 }
 0x732   : > { %3534 = vmatprep.mubr.msk.f32.mxu1 %vm927_vm0, %v2245_v11 }
 0x735   : > { %3535 = vmatmul.mubr.msk.f32.gmra.mrb[8].mxu1 %vm927_vm0, %v2246_v31 }
 0x736   : > { %3537 = vmatprep.mubr.msk.f32.mxu1 %vm927_vm0, %v2247_v32 }
 0x739   : > { %3538 = vmatmul.mubr.msk.f32.gmra.mrb[10].mxu1 %vm927_vm0, %v2248_v33  ;;  %vm3823_vm0 = vmmov 1  }
 0x73a   : > { %2623 = vmatprep.mubr.f32.mxu1 %v3822_v56  ;;  %vm4739_vm1 = vmpackc.low %vm2481_vm7, %vm3823_vm0 }
 0x800   : > { %v3530_v36 = vpop.f32.mrb[4].mxu1 }
 0x801   : > { %v2393_v37 = vadd.f32 %v3530_v36, %v2265_v35  ;;  %v2387_v53 = vpop.f32.mrb[5].mxu1 }
 0x802   : > { %v2388_v38 = vadd.f32 %v2387_v53, %v2260_v63 }
 0x803   : > { %v2427_v10 = vmul.f32 %v4431_v3, %v2393_v37 }
 0x804   : > { %v2426_v39 = vmul.f32 %v4431_v3, %v2388_v38  ;;  %v3533_v9 = vpop.f32.mrb[6].mxu1 }
 0x805   : > { %v4632_v41 = vmul.f32 0.17677669, %v2427_v10  ;;  %v2403_v55 = vadd.f32 %v3533_v9, %v2275_v18  ;;  %v2397_v42 = vpop.f32.mrb[7].mxu1 }
 0x806   : > { %v4634_v43 = vmul.f32 0.17677669, %v2426_v39  ;;  %v2398_v44 = vadd.f32 %v2397_v42, %v2270_v40 }
 0x807   : > { %v2482_v46 = vsel %vm2481_vm7, %v4632_v41, -inf  ;;  %v4639_v47 = vmul.f32 %v4431_v3, %v2403_v55  ;;  %v2661_v20 = vsel %vm2660_vm8, %v4632_v41, -inf }
 0x808   : > { %v2483_v48 = vmax.f32 %v4634_v43, %v2482_v46  ;;  %v4643_v49 = vmul.f32 %v4431_v3, %v2398_v44  ;;  %v3536_v50 = vpop.f32.mrb[8].mxu1 }
 0x809   : > { %v2996_v59 = vmin.f32 %v4639_v47, 20.0  ;;  %v2413_v60 = vadd.f32 %v3536_v50, %v2285_v13  ;;  %v2407_v5 = vpop.f32.mrb[9].mxu1  ;;  %v2449_v24 = vrot.slane %v4639_v47, 5  ;;  %vm2992_vm12 = vcmp.gt.f32.partialorder %v4639_v47, 20.0 }
 0x80a   : > { %v2484_v7 = vrot.slane %v2483_v48, 4  ;;  %v4647_v8 = vmul.f32 0.17677669, %v4643_v49  ;;  %v2994_v58 = vmin.f32 %v4643_v49, 20.0  ;;  %v2408_v12 = vadd.f32 %v2407_v5, %v2280_v34 }
 0x80b   : > { %v3002_v0 = vmul.f32 1.442695, %v2996_v59  ;;  %v2431_v6 = vmul.f32 %v4431_v3, %v2413_v60  ;;  %vm2990_vm13 = vcmp.gt.f32.partialorder %v4643_v49, 20.0 }
 0x80c   : > { %v2485_v1 = vmax.f32 %v2483_v48, %v2484_v7  ;;  %v2663_v54 = vsel %vm2662_vm9, %v4647_v8, -inf  ;;  %v2998_v15 = vmul.f32 1.442695, %v2994_v58  ;;  %v3539_v14 = vpop.f32.mrb[10].mxu1  ;;  %v2430_v19 = vmul.f32 %v4431_v3, %v2408_v12 }
 0x80d   : > { %3696 = vpow2.f32 %v3002_v0  ;;  %v2664_v51 = vmax.f32 %v2661_v20, %v2663_v54  ;;  %v2452_v28 = vrot.slane %v2431_v6, 5  ;;  %v2417_v21 = vpop.f32.mrb[11].mxu1  ;;  %v2423_v22 = vadd.f32 %v3539_v14, %v2295_v52 }
 0x80e   : > { %v2486_v62 = vrot.slane %v2485_v1, 2  ;;  %3698 = vpow2.f32 %v2998_v15  ;;  %v2418_v23 = vadd.f32 %v2417_v21, %v2290_v45  ;;  %v2450_v26 = vrot.slane %v2430_v19, 5 }
 0x80f   : > { %v2665_v25 = vrot.slane %v2664_v51, 4  ;;  %v2433_v30 = vmul.f32 %v4431_v3, %v2423_v22 }
 0x810   : > { %v2487_v27 = vmax.f32 %v2485_v1, %v2486_v62  ;;  %v2432_v57 = vmul.f32 %v4431_v3, %v2418_v23  ;;  %v2451_v16 = vsel %vm2448_vm10, %v2449_v24, %v2450_v26  ;;  %v2453_v17 = vsel %vm2448_vm10, %v2450_v26, %v2452_v28 }
 0x811   : > { %v2666_v4 = vmax.f32 %v2664_v51, %v2665_v25  ;;  %v2466_v31 = vmul.f32 0.17677669, %v2451_v16  ;;  %v4661_v32 = vmul.f32 0.17677669, %v2453_v17  ;;  %v2456_v33 = vrot.slane %v2433_v30, 5 }
 0x812   : > { %v2488_v11 = vrot.slane %v2487_v27, 1  ;;  %v2454_v18 = vrot.slane %v2432_v57, 5 }
 0x813   : > { %v2667_v34 = vrot.slane %v2666_v4, 2  ;;  %v2490_v63 = vsel %vm2481_vm7, %v4661_v32, -inf  ;;  %v2671_v55 = vsel %vm2660_vm8, %v4661_v32, -inf }
 0x814   : > { %v2489_v13 = vmax.f32 %v2487_v27, %v2488_v11  ;;  %v2491_v36 = vmax.f32 %v2466_v31, %v2490_v63  ;;  %v4666_v3 = vsel %vm2448_vm10, %v2452_v28, %v2454_v18  ;;  %v4669_v37 = vsel %vm2448_vm10, %v2454_v18, %v2456_v33 }
 0x815   : > { %v2668_v35 = vmax.f32 %v2666_v4, %v2667_v34  ;;  %v4674_v10 = vmul.f32 0.17677669, %v4666_v3  ;;  %v2995_v42 = vmin.f32 %v4666_v3, 20.0  ;;  %v2997_v7 = vmin.f32 %v4669_v37, 20.0 }
 0x816   : > { %v2498_v53 = vsub.f32 %v4634_v43, %v2489_v13  ;;  %v2500_v38 = vsub.f32 %v4632_v41, %v2489_v13  ;;  %v2492_v40 = vrot.slane %v2491_v36, 4  ;;  %vm2991_vm14 = vcmp.gt.f32.partialorder %v4666_v3, 20.0 }
 0x817   : > { %v3697_v39 = vpop.eup %3696  ;;  %v2669_v9 = vrot.slane %v2668_v35, 1  ;;  %v2672_v43 = vsel %vm2662_vm9, %v4674_v10, -inf  ;;  %v3000_v58 = vmul.f32 1.442695, %v2995_v42  ;;  %v3004_v1 = vmul.f32 1.442695, %v2997_v7 }
 0x818   : > { %v3699_v44 = vpop.eup %3698  ;;  %v2502_v45 = vmul.f32 1.442695, %v2498_v53  ;;  %v2506_v46 = vmul.f32 1.442695, %v2500_v38  ;;  %v3008_v48 = vadd.f32 1.0, %v3697_v39  ;;  %v2493_v60 = vmax.f32 %v2491_v36, %v2492_v40 }
 0x819   : > { %v2670_v50 = vmax.f32 %v2668_v35, %v2669_v9  ;;  %v3006_v59 = vadd.f32 1.0, %v3699_v44  ;;  %v2673_v5 = vmax.f32 %v2671_v55, %v2672_v43  ;;  %vm2993_vm15 = vcmp.gt.f32.partialorder %v4669_v37, 20.0 }
 0x81a   : > { %3700 = vpow2.f32 %v2502_v45  ;;  %v2494_v12 = vrot.slane %v2493_v60, 2 }
 0x81b   : > { %3702 = vpow2.f32 %v2506_v46  ;;  %v2680_v0 = vsub.f32 %v4632_v41, %v2670_v50  ;;  %v2682_v6 = vsub.f32 %v4647_v8, %v2670_v50  ;;  %v2674_v20 = vrot.slane %v2673_v5, 4 }
 0x81c   : > { %3704 = vlog2.f32 %v3008_v48  ;;  %v2495_v14 = vmax.f32 %v2493_v60, %v2494_v12 }
 0x81d   : > { %v2684_v54 = vmul.f32 1.442695, %v2680_v0  ;;  %v2688_v15 = vmul.f32 1.442695, %v2682_v6  ;;  %3706 = vlog2.f32 %v3006_v59  ;;  %v2675_v52 = vmax.f32 %v2673_v5, %v2674_v20 }
 0x81e   : > { %3708 = vpow2.f32 %v3000_v58  ;;  %v2496_v51 = vrot.slane %v2495_v14, 1 }
 0x81f   : > { %3710 = vpow2.f32 %v2684_v54  ;;  %v2676_v28 = vrot.slane %v2675_v52, 2 }
 0x820   : > { %3712 = vpow2.f32 %v2688_v15  ;;  %v2497_v19 = vmax.f32 %v2495_v14, %v2496_v51 }
 0x821   : > { %3714 = vpow2.f32 %v3004_v1  ;;  %v2677_v21 = vmax.f32 %v2675_v52, %v2676_v28 }
 0x822   : > { %v2499_v41 = vsub.f32 %v2466_v31, %v2497_v19  ;;  %v2501_v8 = vsub.f32 %v4661_v32, %v2497_v19 }
 0x823   : > { %v2678_v22 = vrot.slane %v2677_v21, 1 }
 0x824   : > { %v4685_v62 = vpop.eup %3700  ;;  %v2504_v24 = vmul.f32 1.442695, %v2499_v41  ;;  %v2508_v25 = vmul.f32 1.442695, %v2501_v8 }
 0x825   : > { %v4687_v23 = vpop.eup %3702  ;;  %v2679_v30 = vmax.f32 %v2677_v21, %v2678_v22 }
 0x826   : > { %v3705_v26 = vpop.eup %3704  ;;  %v2510_v27 = vsel %vm2481_vm7, %v4687_v23, 0.0  ;;  %3716 = vpow2.f32 %v2504_v24 }
 0x827   : > { %v3707_v57 = vpop.eup %3706  ;;  %v2511_v4 = vadd.f32 %v4685_v62, %v2510_v27  ;;  %v3015_v16 = vmul.f32 0.6931472, %v3705_v26  ;;  %3718 = vpow2.f32 %v2508_v25  ;;  %v2681_v31 = vsub.f32 %v4661_v32, %v2679_v30 }
 0x828   : > { %v3709_v17 = vpop.eup %3708  ;;  %v3011_v11 = vmul.f32 0.6931472, %v3707_v57  ;;  %v2683_v33 = vsub.f32 %v4674_v10, %v2679_v30 }
 0x829   : > { %v4695_v34 = vpop.eup %3710  ;;  %v2512_v18 = vrot.slane %v2511_v4, 4  ;;  %v3020_v13 = vsel %vm2992_vm12, %v4639_v47, %v3015_v16  ;;  %v3007_v63 = vadd.f32 1.0, %v3709_v17  ;;  %v2686_v38 = vmul.f32 1.442695, %v2681_v31 }
 0x82a   : > { %v4699_v35 = vpop.eup %3712  ;;  %v3024_v36 = vadd.f32 0.001, %v3020_v13  ;;  %v3018_v53 = vsel %vm2990_vm13, %v4643_v49, %v3011_v11  ;;  %v2690_v39 = vmul.f32 1.442695, %v2683_v33  ;;  %v2697_v10 = vrot.slane %v4695_v34, 2 }
 0x82b   : > { %v3715_v9 = vpop.eup %3714  ;;  %v2513_v40 = vadd.f32 %v2512_v18, %v2511_v4  ;;  %v3022_v32 = vadd.f32 0.001, %v3018_v53  ;;  %3720 = vlog2.f32 %v3007_v63  ;;  %v2698_v42 = vrot.slane %v4699_v35, 2 }
 0x82c   : > { %v4703_v55 = vrot.slane %v3024_v36, 4  ;;  %3722 = vpow2.f32 %v2686_v38  ;;  %v3009_v47 = vadd.f32 1.0, %v3715_v9 }
 0x82d   : > { %v2514_v44 = vrot.slane %v2513_v40, 2  ;;  %v3038_v45 = vrot.slane %v3022_v32, 4  ;;  %3724 = vpow2.f32 %v2690_v39  ;;  %v2699_v49 = vsel %vm2696_vm11, %v2697_v10, %v2698_v42 }
 0x82e   : > { %3726 = vlog2.f32 %v3009_v47  ;;  %v2707_v46 = vsel %vm2481_vm7, %v2698_v42, 0.0 }
 0x82f   : > { %v2515_v48 = vadd.f32 %v2514_v44, %v2513_v40  ;;  %v4710_v43 = vsel %vm2662_vm9, %v3038_v45, %v4703_v55  ;;  %v2708_v50 = vadd.f32 %v2707_v46, %v2699_v49 }
 0x830   : > { %v3717_v59 = vpop.eup %3716 }
 0x831   : > { %v2516_v60 = vrot.slane %v2515_v48, 1  ;;  %v2709_v5 = vrot.slane %v2708_v50, 4  ;;  %v3719_v7 = vpop.eup %3718 }
 0x832   : > { %v2518_v0 = vsel %vm2481_vm7, %v3719_v7, 0.0 }
 0x833   : > { %v2517_v58 = vadd.f32 %v2516_v60, %v2515_v48  ;;  %v2710_v6 = vadd.f32 %v2709_v5, %v2708_v50  ;;  %v2519_v12 = vadd.f32 %v3717_v59, %v2518_v0 }
 0x835   : > { %v3721_v20 = vpop.eup %3720  ;;  %3728 = vrcp.f32 %v2517_v58  ;;  %v2711_v1 = vrot.slane %v2710_v6, 2  ;;  %v2520_v15 = vrot.slane %v2519_v12, 4 }
 0x836   : > { %v4713_v54 = vpop.eup %3722  ;;  %v3013_v14 = vmul.f32 0.6931472, %v3721_v20 }
 0x837   : > { %v4715_v52 = vpop.eup %3724  ;;  %v2700_v51 = vrot.slane %v4713_v54, 2  ;;  %v2712_v28 = vadd.f32 %v2711_v1, %v2710_v6  ;;  %v2521_v21 = vadd.f32 %v2520_v15, %v2519_v12 }
 0x838   : > { %v3727_v19 = vpop.eup %3726  ;;  %v3019_v41 = vsel %vm2991_vm14, %v4666_v3, %v3013_v14  ;;  %v2701_v8 = vrot.slane %v4715_v52, 2 }
 0x839   : > { %v3017_v22 = vmul.f32 0.6931472, %v3727_v19  ;;  %v3023_v24 = vadd.f32 0.001, %v3019_v41  ;;  %v2713_v25 = vrot.slane %v2712_v28, 1  ;;  %v2522_v26 = vrot.slane %v2521_v21, 2 }
 0x83a   : > { %v2702_v27 = vsel %vm2696_vm11, %v2700_v51, %v2701_v8  ;;  %v2715_v30 = vsel %vm2481_vm7, %v2701_v8, 0.0 }
 0x83b   : > { %v3021_v57 = vsel %vm2993_vm15, %v4669_v37, %v3017_v22  ;;  %v2714_v4 = vadd.f32 %v2713_v25, %v2712_v28  ;;  %v2716_v16 = vadd.f32 %v2715_v30, %v2702_v27  ;;  %v3041_v11 = vrot.slane %v3023_v24, 4  ;;  %v4783_v30 = vld [vmem:[%s4047_s30] sm:$0xf]  ;;  %s495_s30 = sand.u32 1, %s3805_s19  }
 0x83c   : > { %v3025_v17 = vadd.f32 0.001, %v3021_v57  ;;  %v2523_v31 = vadd.f32 %v2522_v26, %v2521_v21  ;;  %v4786_v57 = vrot.slane %v4783_v30, 1  ;;  %s3291_s1 = sshll.u32 %s495_s30, 2  ;;  %s3181_s27 = scalar_lea.sflag [#allocation3], %s495_s30 }
 0x83d   : > { %v2717_v3 = vrot.slane %v2716_v16, 4  ;;  %3730 = vrcp.f32 %v2714_v4  ;;  %v3408_v4 = vclamps-f32 %v4783_v30, 5.0  ;;  %s497_s2 = scalar_lea.vmem [#allocation2], %s3291_s1  ;;  %s3757_s1 = scalar_lea.vmem %s3756_s17, 128 }
 0x83e   : > { %v4725_v33 = vrot.slane %v3025_v17, 4  ;;  %v2524_v18 = vrot.slane %v2523_v31, 1  ;;  %s3197_s20 = sshll.u32 %s497_s2, 4  ;;  %s3198_s20 = int_to_ptr.vmem [resolvable:$true] %s3197_s20 }
 0x83f   : > { %v3729_v13 = vpop.eup %3728  ;;  %v2718_v63 = vadd.f32 %v2717_v3, %v2716_v16  ;;  %v2862_v16 = vsub.s32 2, %v4042_v29  ;;  %s3751_s16 = scalar_lea.vmem %s3198_s20, 64  ;;  %p3758_p0 = scmp.lt.s32.totalorder %s3198_s20, %s3756_s17 }
 0x840   : > { %v4729_v36 = vsel %vm2662_vm9, %v3041_v11, %v4725_v33  ;;  %v2525_v53 = vadd.f32 %v2524_v18, %v2523_v31  ;;  %v2527_v38 = vmul.f32 %v3729_v13, %v4685_v62  ;;  %v2530_v37 = vmul.f32 %v3729_v13, %v4687_v23  ;;  %p3752_p11 = scmp.ne.s32.totalorder %s3198_s20, %s3751_s16  ;;  %p3759_p1 = scmp.lt.s32.totalorder %s3757_s1, %s3751_s16 }
 0x841   : > { %v2719_v39 = vrot.slane %v2718_v63, 2  ;;  %v4736_v62 = vadd.s32 8, %v4042_v29  ;;  %v3409_v31 = vclamps-f32 %v4786_v57, 5.0 }
 0x842   : > { %3732 = vrcp.f32 %v2525_v53  ;;  %v2532_v45 = vmul.f32 0.99, %v2527_v38  ;;  %v2534_v49 = vmul.f32 0.99, %v2530_v37  ;;  %v2863_v37 = vrot.slane %v3408_v4, %v2862_v16  ;;  %p3753_p12 = pnand %p3752_p11, %p3943_p5  ;;  %p3760_p2 = por %p3759_p1, %p3758_p0 }
 0x843   : > { %v2720_v9 = vadd.f32 %v2719_v39, %v2718_v63  ;;  %vm2438_vm3 = vcmp.le.s32.totalorder %v4202_v61, %v4736_v62  ;;  %v3406_v61 = vsel %vm2437_vm2, 1.0, %v3822_v56  ;;  %vm2643_vm10 = vcmp.eq.s32.totalorder %v4736_v62, 9 }
 0x844   : > { %v2536_v58 = vadd.f32 0.001, %v2532_v45  ;;  %v2538_v0 = vadd.f32 0.001, %v2534_v49  ;;  %v3407_v51 = vsel %vm2438_vm3, 1.0, %v3822_v56  ;;  %p3754_p13 = pneg %p3753_p12 }
 0x845   : > { %v2721_v40 = vrot.slane %v2720_v9, 1 }
 0x846   : > { %v3575_v1 = vpack.c.bf16 %v2538_v0, %v2536_v58  ;;  %p3761_p3 = pnand %p3760_p2, %p3754_p13 }
 0x847   : > { %v3731_v32 = vpop.eup %3730  ;;  %v2722_v10 = vadd.f32 %v2721_v40, %v2720_v9  ;;  %v2867_v40 = vrot.slane %v3409_v31, %v2862_v16 }
 0x848   : > { %v2724_v47 = vmul.f32 %v3731_v32, %v4695_v34  ;;  %v2727_v42 = vmul.f32 %v3731_v32, %v4699_v35 }
 0x849   : > { %3734 = vrcp.f32 %v2722_v10 }
 0x84a   : > { %v2729_v23 = vmul.f32 0.99, %v2724_v47  ;;  %v2731_v5 = vmul.f32 0.99, %v2727_v42 }
 0x84c   : > { %v3733_v44 = vpop.eup %3732  ;;  %v2735_v20 = vadd.f32 0.001, %v2731_v5 }
 0x84d   : > { %v2529_v46 = vmul.f32 %v3733_v44, %v3717_v59  ;;  %v2531_v48 = vmul.f32 %v3733_v44, %v3719_v7  ;;  %v2733_v7 = vadd.f32 0.001, %v2729_v23 }
 0x84e   : > { %v4759_v19 = vrot.slane %v2735_v20, 2 }
 0x84f   : > { %v2533_v50 = vmul.f32 0.99, %v2529_v46  ;;  %v2535_v60 = vmul.f32 0.99, %v2531_v48 }
 0x851   : > { %v2537_v6 = vadd.f32 0.001, %v2533_v50  ;;  %v2539_v12 = vadd.f32 0.001, %v2535_v60 }
 0x853   : > { %v3735_v35 = vpop.eup %3734  ;;  %v3572_v59 = vpack.c.bf16 %v2539_v12, %v2537_v6 }
 0x854   : > { %v2726_v15 = vmul.f32 %v3735_v35, %v4713_v54  ;;  %v2728_v14 = vmul.f32 %v3735_v35, %v4715_v52  ;;  %v2741_v52 = vrot.slane %v2733_v7, 2 }
 0x855   : > { %3574 = vmatprep.subr.msk.bf16.mxu0 %vm4739_vm1, %v3572_v59  ;;  %3584 = vmatprep.subr.msk.bf16.mxu1 %vm4739_vm1, %v3572_v59 }
 0x856   : > { %3577 = vmatpush1.bf16.msk.msra.mxu0 %vm4739_vm1, %v3575_v1  ;;  %3585 = vmatpush1.bf16.msk.msra.mxu1 %vm4739_vm1, %v3575_v1  ;;  %v2730_v54 = vmul.f32 0.99, %v2726_v15  ;;  %v2732_v28 = vmul.f32 0.99, %v2728_v14  ;;  %v2743_v24 = vsel %vm2696_vm11, %v2741_v52, %v4759_v19 }
 0x857   : > { %v3581_v27 = vpack.c.bf16 %v4759_v19, %v2743_v24 }
 0x858   : > { %v2734_v21 = vadd.f32 0.001, %v2730_v54  ;;  %v2736_v41 = vadd.f32 0.001, %v2732_v28 }
 0x859   : > { %3412 = vmatmul.mubr.msk.f32.vlgmr.msra.gmra.mrb[8].mxu0 %vm2540_vm4, %v3406_v61  ;;  %3413 = vmatmul.mubr.msk.f32.vlgmr.msra.gmra.mrb[12].mxu1 %vm2540_vm4, %v3407_v51 }
 0x85a   : > { %v2744_v8 = vrot.slane %v2734_v21, 2  ;;  %v4763_v22 = vrot.slane %v2736_v41, 2  ;;  %2817 = vmatprep.mubr.f32.mxu0 %v3822_v56 }
 0x85c   : > { %v4770_v25 = vsel %vm2696_vm11, %v2744_v8, %v4763_v22  ;;  %vm3052_vm11 = vcmask 1040384  }
 0x85d   : > { %v3578_v26 = vpack.c.bf16 %v4763_v22, %v4770_v25 }
 0x85f   : > { %3580 = vmatprep.subr.msk.bf16.mxu0 %vm4739_vm1, %v3578_v26 }
 0x860   : > { %3583 = vmatpush1.bf16.msk.msra.mxu0 %vm4739_vm1, %v3581_v27 }
 0x863   : > { %3424 = vmatmul.mubr.msk.f32.vlgmr.msra.gmra.mrb[10].mxu0 %vm2540_vm4, %v3406_v61 }
 0x864   : > { %2823 = vmatprep.mubr.f32.mxu0 %v3822_v56 }
 0x867   : > { %3425 = vmatmul.mubr.msk.f32.gmra.mrb[12].mxu0 %vm2540_vm4, %v3407_v51 }
 0x92c   : > { %v2619_v17 = vpop.f32.mrb[8].mxu0  ;;  %v2625_v11 = vpop.f32.mrb[12].mxu1 }
 0x92d   : > { %v2630_v3 = vsub.f32 %v2619_v17, %v2536_v58  ;;  %v2632_v18 = vsub.f32 %v2625_v11, %v2538_v0  ;;  %v2621_v13 = vpop.f32.mrb[9].mxu0  ;;  %v2627_v63 = vpop.f32.mrb[13].mxu1  ;;  %v2646_v59 = vmul.f32 10.0, %v2625_v11  ;;  %v2644_v61 = vmul.f32 10.0, %v2619_v17 }
 0x92e   : > { %v2631_v56 = vsub.f32 %v2621_v13, %v2537_v6  ;;  %v2633_v53 = vsub.f32 %v2627_v63, %v2539_v12  ;;  %v2647_v15 = vmul.f32 10.0, %v2627_v63 }
 0x92f   : > { %v2634_v38 = vmul.f32 10.0, %v2630_v3  ;;  %v2636_v39 = vmul.f32 10.0, %v2632_v18  ;;  %v3420_v52 = vadd.f32 -5.0, %v2646_v59  ;;  %v3418_v16 = vadd.f32 -5.0, %v2644_v61 }
 0x930   : > { %v2635_v9 = vmul.f32 10.0, %v2631_v56  ;;  %v2637_v32 = vmul.f32 10.0, %v2633_v53  ;;  %v3421_v26 = vadd.f32 -5.0, %v2647_v15 }
 0x931   : > { %v4795_v10 = vadd.f32 -5.0, %v2634_v38  ;;  %v4797_v47 = vadd.f32 -5.0, %v2636_v39 }
 0x932   : > { %v4799_v42 = vadd.f32 -5.0, %v2635_v9  ;;  %v4801_v44 = vadd.f32 -5.0, %v2637_v32  ;;  %v2655_v38 = vsel %vm2643_vm10, 5.0, %v3421_v26 }
 0x933   : > { %vm2868_vm5 = vcmp.ge.f32.partialorder %v2863_v37, %v4795_v10  ;;  %vm2870_vm6 = vcmp.ge.f32.partialorder %v2863_v37, %v4797_v47  ;;  %v2656_v9 = vsub.f32 %v3418_v16, %v4795_v10 }
 0x934   : > { %v2872_v45 = vsel %vm2868_vm5, 1, %v3815_v2  ;;  %v2874_v49 = vsel %vm2870_vm6, 1, %v3815_v2  ;;  %vm2869_vm8 = vcmp.ge.f32.partialorder %v2867_v40, %v4799_v42  ;;  %vm2871_vm9 = vcmp.ge.f32.partialorder %v2867_v40, %v4801_v44 }
 0x935   : > { %v2876_v46 = vsel %vm2481_vm7, %v2874_v49, 0  ;;  %v2873_v48 = vsel %vm2869_vm8, 1, %v3815_v2  ;;  %v2875_v50 = vsel %vm2871_vm9, 1, %v3815_v2  ;;  %v2645_v2 = vmul.f32 10.0, %v2621_v13 }
 0x936   : > { %v2877_v23 = vadd.s32 %v2876_v46, %v2872_v45  ;;  %v2819_v60 = vpop.f32.mrb[10].mxu0  ;;  %v2884_v5 = vsel %vm2481_vm7, %v2875_v50, 0 }
 0x937   : > { %v2821_v58 = vpop.f32.mrb[11].mxu0  ;;  %v2885_v6 = vadd.s32 %v2884_v5, %v2873_v48  ;;  %v2832_v7 = vsub.f32 %v2819_v60, %v2743_v24  ;;  %v2844_v41 = vmul.f32 10.0, %v2819_v60  ;;  %v4815_v18 = vadd.f32 -5.0, %v2645_v2 }
 0x938   : > { %v2878_v0 = vrot.slane %v2877_v23, 4  ;;  %v2833_v51 = vsub.f32 %v2821_v58, %v4770_v25  ;;  %v2845_v11 = vmul.f32 10.0, %v2821_v58  ;;  %v2654_v25 = vsel %vm2643_vm10, 5.0, %v3420_v52 }
 0x939   : > { %v2886_v34 = vrot.slane %v2885_v6, 4  ;;  %v2836_v21 = vmul.f32 10.0, %v2832_v7  ;;  %v4821_v63 = vadd.f32 -5.0, %v2844_v41  ;;  %v2658_v49 = vsub.f32 %v2654_v25, %v4797_v47 }
 0x93a   : > { %v2879_v12 = vadd.s32 %v2878_v0, %v2877_v23  ;;  %v2825_v35 = vpop.f32.mrb[12].mxu0  ;;  %v2837_v24 = vmul.f32 10.0, %v2833_v51  ;;  %v4829_v32 = vadd.f32 -5.0, %v2845_v11  ;;  %v2659_v23 = vsub.f32 %v2655_v38, %v4801_v44 }
 0x93b   : > { %v2827_v20 = vpop.f32.mrb[13].mxu0  ;;  %v2887_v14 = vadd.s32 %v2886_v34, %v2885_v6  ;;  %v4819_v13 = vadd.f32 -5.0, %v2836_v21  ;;  %v2834_v56 = vsub.f32 %v2825_v35, %v4759_v19  ;;  %v2846_v39 = vmul.f32 10.0, %v2825_v35 }
 0x93c   : > { %v2880_v1 = vrot.slane %v2879_v12, 2  ;;  %v4827_v40 = vadd.f32 -5.0, %v2837_v24  ;;  %v2835_v45 = vsub.f32 %v2827_v20, %v4763_v22  ;;  %v2657_v19 = vsub.f32 %v4815_v18, %v4799_v42 }
 0x93d   : > { %v2888_v28 = vrot.slane %v2887_v14, 2  ;;  %v2856_v50 = vsub.f32 %v4821_v63, %v4819_v13  ;;  %v2838_v60 = vmul.f32 10.0, %v2834_v56  ;;  %v3432_v5 = vadd.f32 -5.0, %v2846_v39 }
 0x93e   : > { %v2881_v54 = vadd.s32 %v2880_v1, %v2879_v12  ;;  %v2847_v58 = vmul.f32 10.0, %v2827_v20  ;;  %v2857_v6 = vsub.f32 %v4829_v32, %v4827_v40  ;;  %v2839_v12 = vmul.f32 10.0, %v2835_v45 }
 0x93f   : > { %v2889_v27 = vadd.s32 %v2888_v28, %v2887_v14  ;;  %v3428_v38 = vadd.f32 -5.0, %v2838_v60  ;;  %v2854_v60 = vsel %vm2643_vm10, 5.0, %v3432_v5 }
 0x940   : > { %v2882_v8 = vrot.slane %v2881_v54, 1 }
 0x941   : > { %v2890_v17 = vrot.slane %v2889_v27, 1 }
 0x942   : > { %v2883_v3 = vadd.s32 %v2882_v8, %v2881_v54 }
 0x943   : > { %v2891_v37 = vadd.s32 %v2890_v17, %v2889_v27 }
 0x944   : > { %v3434_v53 = vadd.s32 4294967295, %v2883_v3 }
 0x945   : > { %v3435_v46 = vadd.s32 4294967295, %v2891_v37 }
 0x946   : > { %vm2894_vm12 = vcmp.gt.s32.totalorder %v3434_v53, 0 }
 0x947   : > { %v2895_v48 = vsel %vm2894_vm12, %v3434_v53, 0  ;;  %vm2896_vm14 = vcmp.gt.s32.totalorder %v3435_v46, 0 }
 0x948   : > { %vm2898_vm13 = vcmp.lt.s32.totalorder %v2895_v48, 9  ;;  %v2897_v22 = vsel %vm2896_vm14, %v3435_v46, 0  ;;  %vm2473_vm14 = vcmp.le.f32.partialorder %v4783_v30, 5.0 }
 0x949   : > { %v4838_v0 = vsel %vm2898_vm13, %v2895_v48, 9  ;;  %vm2900_vm1 = vcmp.lt.s32.totalorder %v2897_v22, 9  ;;  %vm2471_vm13 = vcmp.ge.f32.partialorder %v4783_v30, -5.0 }
 0x94a   : > { %vm4844_vm15 = vcmp.eq.s32.totalorder %v4042_v29, %v4838_v0  ;;  %vm4850_vm0 = vcmp.eq.s32.totalorder %v4736_v62, %v4838_v0  ;;  %v3436_v59 = vadd.s32 4294967295, %v4838_v0  ;;  %v4879_v21 = vsel %vm2900_vm1, %v2897_v22, 9 }
 0x94b   : > { %v2906_v7 = vsel %vm4844_vm15, %v4795_v10, 0.0  ;;  %v2908_v20 = vsel %vm4850_vm0, %v4797_v47, 0.0  ;;  %v2926_v1 = vsel %vm4844_vm15, %v2656_v9, 0.0  ;;  %v2928_v15 = vsel %vm4850_vm0, %v2658_v49, 0.0 }
 0x94c   : > { %v2910_v14 = vsel %vm2481_vm7, %v2908_v20, 0.0  ;;  %v2930_v61 = vsel %vm2481_vm7, %v2928_v15, 0.0  ;;  %vm3030_vm2 = vcmp.eq.s32.totalorder %v4042_v29, %v3436_v59  ;;  %vm3032_vm3 = vcmp.eq.s32.totalorder %v4736_v62, %v3436_v59 }
 0x94d   : > { %v2911_v51 = vadd.f32 %v2910_v14, %v2906_v7  ;;  %v2931_v10 = vadd.f32 %v2930_v61, %v2926_v1  ;;  %v3048_v54 = vsel %vm3030_vm2, %v4710_v43, 0.0  ;;  %v3050_v47 = vsel %vm3032_vm3, %v4703_v55, 0.0 }
 0x94e   : > { %v3053_v2 = vsel %vm3052_vm11, %v3050_v47, 0.0  ;;  %v3073_v28 = vsel %vm4844_vm15, %v4710_v43, 0.0  ;;  %v3075_v52 = vsel %vm4850_vm0, %v4703_v55, 0.0  ;;  %vm4886_vm4 = vcmp.eq.s32.totalorder %v4042_v29, %v4879_v21 }
 0x94f   : > { %v2912_v41 = vrot.slane %v2911_v51, 4  ;;  %v2932_v8 = vrot.slane %v2931_v10, 4  ;;  %v4881_v26 = vadd.f32 %v3053_v2, %v3048_v54  ;;  %v3077_v27 = vsel %vm3052_vm11, %v3075_v52, 0.0 }
 0x950   : > { %v3078_v16 = vadd.f32 %v3077_v27, %v3073_v28  ;;  %vm4892_vm5 = vcmp.eq.s32.totalorder %v4736_v62, %v4879_v21  ;;  %v3437_v43 = vadd.s32 4294967295, %v4879_v21  ;;  %v2907_v18 = vsel %vm4886_vm4, %v4799_v42, 0.0 }
 0x951   : > { %v2913_v11 = vadd.f32 %v2912_v41, %v2911_v51  ;;  %v2933_v3 = vadd.f32 %v2932_v8, %v2931_v10  ;;  %v2909_v17 = vsel %vm4892_vm5, %v4801_v44, 0.0  ;;  %v2927_v56 = vsel %vm4886_vm4, %v2657_v19, 0.0 }
 0x952   : > { %v2918_v25 = vsel %vm2481_vm7, %v2909_v17, 0.0  ;;  %v2929_v53 = vsel %vm4892_vm5, %v2659_v23, 0.0  ;;  %vm3031_vm6 = vcmp.eq.s32.totalorder %v4042_v29, %v3437_v43  ;;  %vm3033_vm8 = vcmp.eq.s32.totalorder %v4736_v62, %v3437_v43 }
 0x953   : > { %v2914_v37 = vrot.slane %v2913_v11, 2  ;;  %v2934_v39 = vrot.slane %v2933_v3, 2  ;;  %v2919_v9 = vadd.f32 %v2918_v25, %v2907_v18  ;;  %v2938_v45 = vsel %vm2481_vm7, %v2929_v53, 0.0 }
 0x954   : > { %v2939_v49 = vadd.f32 %v2938_v45, %v2927_v56  ;;  %v3433_v42 = vadd.f32 -5.0, %v2847_v58  ;;  %v3079_v46 = vrot.slane %v3078_v16, 4  ;;  %v3049_v19 = vsel %vm3031_vm6, %v4729_v36, 0.0 }
 0x955   : > { %v2935_v44 = vadd.f32 %v2934_v39, %v2933_v3  ;;  %v2920_v48 = vrot.slane %v2919_v9, 4  ;;  %v2915_v22 = vadd.f32 %v2914_v37, %v2913_v11  ;;  %v3051_v23 = vsel %vm3033_vm8, %v4725_v33, 0.0 }
 0x956   : > { %v2940_v59 = vrot.slane %v2939_v49, 4  ;;  %v3061_v1 = vsel %vm3052_vm11, %v3051_v23, 0.0  ;;  %v3429_v29 = vadd.f32 -5.0, %v2839_v12  ;;  %v3074_v58 = vsel %vm4886_vm4, %v4729_v36, 0.0 }
 0x957   : > { %v2936_v7 = vrot.slane %v2935_v44, 1  ;;  %v2921_v20 = vadd.f32 %v2920_v48, %v2919_v9  ;;  %v3062_v14 = vadd.f32 %v3061_v1, %v3049_v19  ;;  %v2855_v61 = vsel %vm2643_vm10, 5.0, %v3433_v42 }
 0x958   : > { %v2941_v15 = vadd.f32 %v2940_v59, %v2939_v49  ;;  %v3080_v10 = vadd.f32 %v3079_v46, %v3078_v16  ;;  %v3076_v5 = vsel %vm4892_vm5, %v4725_v33, 0.0  ;;  %v2858_v54 = vsub.f32 %v2854_v60, %v3428_v38 }
 0x959   : > { %v2937_v51 = vadd.f32 %v2936_v7, %v2935_v44  ;;  %v2916_v47 = vrot.slane %v2915_v22, 1  ;;  %v3085_v12 = vsel %vm3052_vm11, %v3076_v5, 0.0  ;;  %v2946_v28 = vsel %vm4844_vm15, %v4819_v13, 0.0 }
 0x95a   : > { %v2942_v2 = vrot.slane %v2941_v15, 2  ;;  %v2922_v36 = vrot.slane %v2921_v20, 2  ;;  %v3086_v52 = vadd.f32 %v3085_v12, %v3074_v58  ;;  %v2859_v62 = vsub.f32 %v2855_v61, %v3429_v29 }
 0x95b   : > { %3736 = vrcp.f32 %v2937_v51  ;;  %v2966_v33 = vsel %vm4844_vm15, %v2856_v50, 0.0  ;;  %v2947_v8 = vsel %vm4886_vm4, %v4827_v40, 0.0  ;;  %v2967_v27 = vsel %vm4886_vm4, %v2857_v6, 0.0  ;;  %vm4971_vm15 = vmand %vm2471_vm13, %vm2473_vm14 }
 0x95c   : > { %v2943_v41 = vadd.f32 %v2942_v2, %v2941_v15  ;;  %v3081_v16 = vrot.slane %v3080_v10, 2  ;;  %v3087_v43 = vrot.slane %v3086_v52, 4  ;;  %v2948_v11 = vsel %vm4850_vm0, %v3428_v38, 0.0 }
 0x95d   : > { %v2968_v13 = vsel %vm4850_vm0, %v2858_v54, 0.0  ;;  %v2917_v63 = vadd.f32 %v2916_v47, %v2915_v22  ;;  %v2950_v34 = vsel %vm2481_vm7, %v2948_v11, 0.0  ;;  %v2923_v18 = vadd.f32 %v2922_v36, %v2921_v20 }
 0x95e   : > { %v2944_v50 = vrot.slane %v2943_v41, 1  ;;  %v2970_v3 = vsel %vm2481_vm7, %v2968_v13, 0.0  ;;  %v3088_v17 = vadd.f32 %v3087_v43, %v3086_v52  ;;  %v2951_v40 = vadd.f32 %v2950_v34, %v2946_v28 }
 0x95f   : > { %v2971_v32 = vadd.f32 %v2970_v3, %v2966_v33  ;;  %v3055_v6 = vrot.slane %v4881_v26, 4  ;;  %v2949_v25 = vsel %vm4892_vm5, %v3429_v29, 0.0  ;;  %v2969_v35 = vsel %vm4892_vm5, %v2859_v62, 0.0 }
 0x960   : > { %v2945_v24 = vadd.f32 %v2944_v50, %v2943_v41  ;;  %v3082_v56 = vadd.f32 %v3081_v16, %v3080_v10  ;;  %v3089_v53 = vrot.slane %v3088_v17, 2  ;;  %v2958_v39 = vsel %vm2481_vm7, %v2949_v25, 0.0 }
 0x961   : > { %v2972_v38 = vrot.slane %v2971_v32, 4  ;;  %v3056_v37 = vadd.f32 %v3055_v6, %v4881_v26  ;;  %v2978_v9 = vsel %vm2481_vm7, %v2969_v35, 0.0  ;;  %v2924_v45 = vrot.slane %v2923_v18, 1 }
 0x962   : > { %3738 = vrcp.f32 %v2945_v24  ;;  %v3090_v49 = vadd.f32 %v3089_v53, %v3088_v17  ;;  %v4955_v44 = vadd.f32 %v2958_v39, %v2947_v8  ;;  %v3095_v46 = vsub.f32 %v3408_v4, %v2917_v63 }
 0x963   : > { %v2973_v42 = vadd.f32 %v2972_v38, %v2971_v32  ;;  %v3057_v55 = vrot.slane %v3056_v37, 2  ;;  %v2979_v48 = vadd.f32 %v2978_v9, %v2967_v27  ;;  %v3063_v19 = vrot.slane %v3062_v14, 4 }
 0x964   : > { %v3083_v59 = vrot.slane %v3082_v56, 1  ;;  %vm3072_vm9 = vcmp.eq.s32.totalorder %v4879_v21, 9  ;;  %v3091_v26 = vrot.slane %v3090_v49, 1  ;;  %v2925_v29 = vadd.f32 %v2924_v45, %v2923_v18 }
 0x965   : > { %v3737_v22 = vpop.eup %3736  ;;  %v2974_v23 = vrot.slane %v2973_v42, 2  ;;  %v3058_v7 = vadd.f32 %v3057_v55, %v3056_v37  ;;  %v2980_v20 = vrot.slane %v2979_v48, 4  ;;  %v3064_v1 = vadd.f32 %v3063_v19, %v3062_v14 }
 0x966   : > { %v3097_v60 = vmul.f32 %v3737_v22, %v3095_v46  ;;  %v3092_v15 = vadd.f32 %v3091_v26, %v3090_v49  ;;  %v2952_v58 = vrot.slane %v2951_v40, 4  ;;  %v3096_v52 = vsub.f32 %v3409_v31, %v2925_v29 }
 0x967   : > { %v2975_v61 = vadd.f32 %v2974_v23, %v2973_v42  ;;  %v3059_v51 = vrot.slane %v3058_v7, 1  ;;  %v2981_v4 = vadd.f32 %v2980_v20, %v2979_v48  ;;  %v3065_v5 = vrot.slane %v3064_v1, 2 }
 0x968   : > { %v3099_v10 = vsub.f32 1.0, %v3097_v60  ;;  %v3094_v47 = vsel %vm3072_vm9, 1.0, %v3092_v15  ;;  %v2953_v14 = vadd.f32 %v2952_v58, %v2951_v40  ;;  %vm3026_vm7 = vcmp.eq.s32.totalorder %v4838_v0, 0 }
 0x969   : > { %v2976_v54 = vrot.slane %v2975_v61, 1  ;;  %v3060_v2 = vadd.f32 %v3059_v51, %v3058_v7  ;;  %v2982_v28 = vrot.slane %v2981_v4, 2  ;;  %v3066_v36 = vadd.f32 %v3065_v5, %v3064_v1 }
 0x96a   : > { %v3101_v12 = vmul.f32 %v3099_v10, %v3097_v60  ;;  %v3084_v16 = vadd.f32 %v3083_v59, %v3082_v56  ;;  %vm3071_vm10 = vcmp.eq.s32.totalorder %v4838_v0, 9  ;;  %vm3027_vm12 = vcmp.eq.s32.totalorder %v4879_v21, 0 }
 0x96b   : > { %v2977_v62 = vadd.f32 %v2976_v54, %v2975_v61  ;;  %v3069_v33 = vsel %vm3026_vm7, 1.0, %v3060_v2  ;;  %v2983_v8 = vadd.f32 %v2982_v28, %v2981_v4  ;;  %v3067_v27 = vrot.slane %v3066_v36, 1 }
 0x96c   : > { %v3739_v41 = vpop.eup %3738  ;;  %v3107_v13 = vmul.f32 %v3101_v12, %v3069_v33  ;;  %v3093_v34 = vsel %vm3071_vm10, 1.0, %v3084_v16  ;;  %v3139_v3 = vmul.f32 %v3099_v10, %v3069_v33  ;;  %v2960_v40 = vrot.slane %v4955_v44, 4 }
 0x96d   : > { %v3098_v43 = vmul.f32 %v3739_v41, %v3096_v52  ;;  %v2987_v11 = vmul.f32 %v3737_v22, %v2977_v62  ;;  %v2984_v63 = vrot.slane %v2983_v8, 1  ;;  %v3068_v50 = vadd.f32 %v3067_v27, %v3066_v36 }
 0x96e   : > { %v3113_v17 = vadd.f32 %v3093_v34, %v3069_v33  ;;  %v3131_v53 = vmul.f32 %v3097_v60, %v3093_v34  ;;  %v2961_v21 = vadd.f32 %v2960_v40, %v4955_v44  ;;  %v3141_v26 = vmul.f32 %v3139_v3, %v3099_v10 }
 0x96f   : > { %v3103_v18 = vmul.f32 %v3097_v60, %v2987_v11  ;;  %v3100_v31 = vsub.f32 1.0, %v3098_v43  ;;  %v2985_v32 = vadd.f32 %v2984_v63, %v2983_v8  ;;  %v3070_v24 = vsel %vm3027_vm12, 1.0, %v3068_v50 }
 0x970   : > { %v3115_v6 = vmul.f32 2.0, %v2987_v11  ;;  %v3114_v56 = vadd.f32 %v3094_v47, %v3070_v24  ;;  %v3132_v37 = vmul.f32 %v3098_v43, %v3094_v47  ;;  %v3133_v49 = vmul.f32 %v3131_v53, %v3097_v60 }
 0x971   : > { %v3105_v25 = vmul.f32 %v3103_v18, %v3097_v60  ;;  %v3102_v35 = vmul.f32 %v3100_v31, %v3098_v43  ;;  %v2989_v38 = vmul.f32 %v3739_v41, %v2985_v32  ;;  %v3140_v42 = vmul.f32 %v3100_v31, %v3070_v24 }
 0x972   : > { %v3117_v0 = vsub.f32 %v3113_v17, %v3115_v6  ;;  %v3135_v39 = vmul.f32 %v3115_v6, %v3101_v12  ;;  %v3134_v22 = vmul.f32 %v3132_v37, %v3098_v43  ;;  %v2954_v29 = vrot.slane %v2953_v14, 2  ;;  %v3750_v6 = vld [vmem:[%s4056_s23] ss:$0 sm:$0xff]  ;;  %s3439_s23 = sshll.u32 %s3926_s22, 6 }
 0x973   : > { %v3109_v9 = vadd.f32 %v3107_v13, %v3105_v25  ;;  %v3108_v45 = vmul.f32 %v3102_v35, %v3070_v24  ;;  %v3104_v46 = vmul.f32 %v3098_v43, %v2989_v38  ;;  %v3116_v55 = vmul.f32 2.0, %v2989_v38  ;;  %s5001_s26 = scalar_lea.hbm %s5057_s14, %s3439_s23 }
 0x974   : > { %v3119_v48 = vmul.f32 %v3117_v0, %v3101_v12  ;;  %v3137_v59 = vadd.f32 %v3135_v39, %v3133_v49  ;;  %v3129_v15 = vmul.f32 %v2987_v11, %v2987_v11  ;;  %v3142_v58 = vmul.f32 %v3140_v42, %v3100_v31 }
 0x975   : > { %v3111_v19 = vmul.f32 %v3109_v9, %v2977_v62  ;;  %v3106_v23 = vmul.f32 %v3104_v46, %v3098_v43  ;;  %v3118_v7 = vsub.f32 %v3114_v56, %v3116_v55  ;;  %v3136_v1 = vmul.f32 %v3116_v55, %v3102_v35 }
 0x976   : > { %v3121_v20 = vadd.f32 %v3119_v48, %v2987_v11  ;;  %v3143_v61 = vadd.f32 %v3141_v26, %v3137_v59  ;;  %v2962_v44 = vrot.slane %v2961_v21, 2  ;;  %v3130_v2 = vmul.f32 %v2989_v38, %v2989_v38 }
 0x977   : > { %v3110_v51 = vadd.f32 %v3108_v45, %v3106_v23  ;;  %v3120_v60 = vmul.f32 %v3118_v7, %v3102_v35  ;;  %v3138_v4 = vadd.f32 %v3136_v1, %v3134_v22  ;;  %v2955_v28 = vadd.f32 %v2954_v29, %v2953_v14 }
 0x978   : > { %3740 = vrcp.f32 %v3121_v20  ;;  %v3145_v5 = vmul.f32 %v3143_v61, %v3129_v15  ;;  %v2963_v36 = vadd.f32 %v2962_v44, %v2961_v21  ;;  %vm2472_vm0 = vcmp.ge.f32.partialorder %v4786_v57, -5.0 }
 0x979   : > { %v3112_v54 = vmul.f32 %v3110_v51, %v2985_v32  ;;  %v3122_v47 = vadd.f32 %v3120_v60, %v2989_v38  ;;  %v3144_v12 = vadd.f32 %v3142_v58, %v3138_v4  ;;  %v2956_v52 = vrot.slane %v2955_v28, 1 }
 0x97a   : > { %v2964_v41 = vrot.slane %v2963_v36, 1  ;;  %vm2474_vm1 = vcmp.le.f32.partialorder %v4786_v57, 5.0  ;;  %vm3174_vm3 = vcmask 1042434   ;;  %v3169_v45 = vmul.f32 %v3750_v6, %v4783_v30 }
 0x97b   : > { %3742 = vrcp.f32 %v3122_v47  ;;  %v3146_v10 = vmul.f32 %v3144_v12, %v3130_v2  ;;  %v2957_v33 = vadd.f32 %v2956_v52, %v2955_v28  ;;  %vm4980_vm2 = vmand %vm2472_vm0, %vm2474_vm1 }
 0x97c   : > { %v2965_v13 = vadd.f32 %v2964_v41, %v2963_v36  ;;  %3170 = vst [vmem:[%s497_s2] sm:$0x3] %v3169_v45 }
 0x982   : > { %v3741_v62 = vpop.eup %3740 }
 0x983   : > { %v3124_v8 = vmul.f32 %v3741_v62, %v3111_v19  ;;  %v3149_v27 = vmul.f32 %v3741_v62, %v3145_v5 }
 0x985   : > { %v3127_v14 = vadd.f32 %v3124_v8, %v2957_v33  ;;  %v3151_v43 = vmul.f32 %v3741_v62, %v3149_v27  ;;  %v3743_v11 = vpop.eup %3742 }
 0x986   : > { %v3126_v63 = vmul.f32 %v3743_v11, %v3112_v54  ;;  %v3150_v50 = vmul.f32 %v3743_v11, %v3146_v10 }
 0x987   : > { %3744 = vlog2.f32 %v3151_v43  ;;  %v3157_v34 = vsel %vm4971_vm15, %v3127_v14, %v4783_v30 }
 0x988   : > { %v3128_v18 = vadd.f32 %v3126_v63, %v2965_v13  ;;  %v3152_v31 = vmul.f32 %v3743_v11, %v3150_v50  ;;  %v3162_v17 = vrot.slane %v3157_v34, 2 }
 0x98a   : > { %3746 = vlog2.f32 %v3152_v31  ;;  %v3158_v40 = vsel %vm4980_vm2, %v3128_v18, %v4786_v57 }
 0x98b   : > { %v3165_v32 = vrot.slane %v3158_v40, 1 }
 0x98d   : > { %v3167_v24 = vsel %vm3052_vm11, %v3162_v17, %v3165_v32 }
 0x98e   : > { %v3171_v25 = vmul.f32 %v3750_v6, %v3167_v24 }
 0x990   : > { %3172 = vst [vmem:[%s497_s2 + $0x2] sm:$0x3] %v3171_v25 }
 0x991   : > { %v3745_v35 = vpop.eup %3744 }
 0x992   : > { %v3154_v56 = vmul.f32 0.6931472, %v3745_v35 }
 0x994   : > { %v3747_v53 = vpop.eup %3746  ;;  %v3159_v0 = vsel %vm4971_vm15, %v3154_v56, 0.0 }
 0x995   : > { %v3156_v38 = vmul.f32 0.6931472, %v3747_v53 }
 0x997   : > { %v3160_v57 = vsel %vm4980_vm2, %v3156_v38, 0.0 }
 0x998   : > { %v3168_v37 = vadd.f32 %v3160_v57, %v3159_v0 }
 0x99a   : > { %v3173_v39 = vmul.f32 %v3750_v6, %v3168_v37 }
 0x99c   : > { %v3175_v9 = vsel %vm3174_vm3, %v3173_v39, 0.0 }
 0x99d   : > { %3176 = vadd.xlane.f32.xlu0 %v3175_v9 }
 0x99e   : > { %3764 = shalt.err (!%p3761_p3)
}
 0x99f   : > { %s3765_s22 = scalar_lea.hbm %s5001_s26, 64  ;;  %s3769_s23 = scalar_lea.hbm %s5057_s14, 128 }
 0x9a0   : > { %p3766_p4 = scmp.ne.s32.totalorder %s5001_s26, %s3765_s22  ;;  %p3770_p9 = scmp.lt.u32.totalorder %s5001_s26, %s5057_s14 }
 0x9a1   : > { %p3771_p10 = scmp.lt.u32.totalorder %s3769_s23, %s3765_s22  ;;  %p3773_p12 = scmp.lt.u32.totalorder %s3765_s22, %s5001_s26 }
 0x9a2   : > { %p3767_p7 = pnand %p3766_p4, %p3943_p5 }
 0x9a3   : > { %p3772_p11 = por %p3771_p10, %p3770_p9 }
 0x9a4   : > { %p3768_p8 = pneg %p3767_p7 }
 0x9a5   : > { %p3774_p13 = por %p3773_p12, %p3772_p11 }
 0x9a7   : > { %p3775_p0 = pnand %p3774_p13, %p3768_p8 }
 0x9a9   : > { %3778 = shalt.err (!%p3775_p0)
}
 0x9aa   : > { %3586 = dma.vmem_to_hbm [thread:$0]  (%p3943_p5), %s3198_s20, 64, %s5001_s26, %s3181_s27   ;;  %vm3178_vm11 = vcmask 2050  }
 0x9ab   : > { %s512_s17 = scalar_lea.vmem %s5058_s15, %s4038_s25 }
 0xa2a   : > { %v3177_v30 = vpop.xlane.xlu0 %3176 }
 0xa2b   : > { %3179 = vst.msk [vmem:[%s512_s17 - $0x2] sm:$0x4] %vm3178_vm11, %v3177_v30 }
 0xa2c PF: > { %p3592_p1 = scmp.ge.s32.totalorder %s3813_s21, 2  ;;  %s3212_s22 = sand.u32 1, %s3801_s18  }
 0xa2d   : > { %s3213_s30 = scalar_lea.sflag [#allocation3], %s3212_s22 }
 0xa2e   : > { %p3589_p2 = pnand %p3592_p1, %p3947_p6 }
 0xa30   : > { %3796 = dma.done.wait (!%p3589_p2), %s3213_s30, 64  }
 0xa31   : > { %3798 = vsyncadd (!%p3589_p2), %s3213_s30, 4294967232  ;;  %s5090_s21 = sld [smem:[#allocation6_spill]]  ;;  %s5091_s28 = sld [smem:[#allocation5_spill]] }
 0xa32   : > { %s5092_s20 = sld [smem:[#allocation7_spill]]  ;;  %s5093_s18 = smov %s3805_s19 }
 0xa37   : > { %p26_p5 = scmp.ge.s32.totalorder %s5090_s21, 4   ;;  %s5094_s19 = smov %s5091_s28 }
 0xa39   :  { %28 = sbr.rel (!%p26_p5) target bundleno = 7 (0x7), region = 149 }
 0xa40   :  { %3224 = vsyncpa [#allocation3], 1 }
 0xa41   :  { %3226 = vsyncpa [#allocation3 + $0x1], 1 }

</bundles_post_ra>
